<compile_context>
chip_gen: v5e
topology: v5e:2x2
jax: 0.10.0
libtpu: 0.0.40
codegen_flags: <defaults>
</compile_context>

<pallas_src>
import jax
import jax.numpy as jnp
from jax.experimental import pallas as pl
from jax.experimental.pallas import tpu as pltpu


def _round_up(x, m):
    return ((x + m - 1) // m) * m


def mlp_edge_kernel(src_ref, dst_ref, h_ref, w1s_ref, w1d_ref, b1_ref, w2_ref,
                    b2_ref, o_ref):
    # src_ref, dst_ref : (TE, 1)  int32 edge endpoints for this tile (VMEM)
    # h_ref            : (N, F)   resident node features (MXU dtype)
    # w1s_ref, w1d_ref : (F, H)   W1 split into src / dst halves (MXU dtype)
    # b1_ref           : (1, H)   f32
    # w2_ref           : (1, H)   f32 second-layer weights as a row
    # b2_ref           : (1, 1)   f32 scalar, SMEM
    # o_ref            : (1, 1, TE) f32 lane-dense row of per-edge scores
    te = src_ref.shape[0]
    n_nodes = h_ref.shape[0]
    dt = h_ref.dtype

    # In-kernel gather as a one-hot MXU matmul: exact row selection, no HBM
    # round trip for the gathered rows.
    node_ids = jax.lax.broadcasted_iota(jnp.int32, (te, n_nodes), 1)
    one = jnp.ones((), dt)
    zero = jnp.zeros((), dt)
    onehot_s = jnp.where(node_ids == src_ref[...], one, zero)    # (TE, N)
    onehot_d = jnp.where(node_ids == dst_ref[...], one, zero)    # (TE, N)

    h_nodes = h_ref[...]                                         # (N, F)
    hs = jnp.dot(onehot_s, h_nodes,
                 preferred_element_type=jnp.float32).astype(dt)  # (TE, F) == h[src]
    hd = jnp.dot(onehot_d, h_nodes,
                 preferred_element_type=jnp.float32).astype(dt)  # (TE, F) == h[dst]

    # First layer: concat(hs, hd) @ W1 == hs @ W1s + hd @ W1d (f32 accumulate).
    h1 = jnp.dot(hs, w1s_ref[...], preferred_element_type=jnp.float32)
    h1 = h1 + jnp.dot(hd, w1d_ref[...], preferred_element_type=jnp.float32)
    h1 = jnp.maximum(h1 + b1_ref[...], 0.0)                      # bias + ReLU, f32

    # Second layer (H -> 1) on the VPU/XLU: broadcast-mul + lane reduction.
    s = jnp.sum(h1 * w2_ref[...], axis=-1) + b2_ref[0, 0]        # (TE,) f32

    # Lane-dense store: one (1, TE) row per tile (unmasked vst).
    o_ref[0, 0, :] = s.astype(o_ref.dtype)


def mlp_predictor_scores(h, src, dst, w1, b1, w2, b2, *,
                         tile_e=2048, mxu_dtype=jnp.bfloat16):
    """Per-edge scores, shape (E,) float32."""
    E = int(src.shape[0])
    N, F = h.shape
    H = w1.shape[1]
    assert w1.shape[0] == 2 * F

    # h must fit comfortably in VMEM for the resident-feature / fused-gather path.
    # TODO(synk): for node sets too large for VMEM (or very large N where the
    # one-hot gather's VPU cost dominates), switch h to memory_space=pl.ANY and
    # do a manual make_async_copy row gather keyed off scalar-prefetched indices.
    assert N * F * jnp.dtype(mxu_dtype).itemsize <= 8 * 1024 * 1024, (
        "node feature table too large for the VMEM-resident gather path")

    # Lane-aligned edge tile, large enough to amortize per-grid-step overhead,
    # clamped for small E.  If everything fits in one tile, split into two so
    # the "parallel" grid axis can feed both v7x TensorCores.
    E128 = _round_up(max(E, 1), 128)
    tile_e = max(128, min(_round_up(tile_e, 128), E128))
    if tile_e == E128 and E128 >= 256:
        tile_e = _round_up(E128 // 2, 128)
    E_pad = _round_up(E, tile_e)
    n_tiles = E_pad // tile_e

    # Pad the index arrays (pad edges gather node 0; scores discarded below).
    pad = E_pad - E
    src_p = jnp.pad(src.astype(jnp.int32), (0, pad)).reshape(E_pad, 1)
    dst_p = jnp.pad(dst.astype(jnp.int32), (0, pad)).reshape(E_pad, 1)

    # Cast MXU inputs; accumulation, bias, relu and the final reduce stay f32.
    h_c = h.astype(mxu_dtype)                         # (N, F) resident in VMEM
    w1s = w1[:F].astype(mxu_dtype)                    # (F, H)
    w1d = w1[F:].astype(mxu_dtype)                    # (F, H)
    b1_row = b1.reshape(1, H).astype(jnp.float32)
    w2_row = w2.reshape(1, H).astype(jnp.float32)
    b2_sc = b2.reshape(1, 1).astype(jnp.float32)

    out = pl.pallas_call(
        mlp_edge_kernel,
        out_shape=jax.ShapeDtypeStruct((n_tiles, 1, tile_e), jnp.float32),
        grid_spec=pltpu.PrefetchScalarGridSpec(
            num_scalar_prefetch=0,
            grid=(n_tiles,),
            in_specs=[
                pl.BlockSpec((tile_e, 1), lambda i: (i, 0)),        # src ids
                pl.BlockSpec((tile_e, 1), lambda i: (i, 0)),        # dst ids
                pl.BlockSpec((N, F), lambda i: (0, 0)),             # h (resident)
                pl.BlockSpec((F, H), lambda i: (0, 0)),             # W1 src half
                pl.BlockSpec((F, H), lambda i: (0, 0)),             # W1 dst half
                pl.BlockSpec((1, H), lambda i: (0, 0)),             # b1
                pl.BlockSpec((1, H), lambda i: (0, 0)),             # w2 row
                pl.BlockSpec(memory_space=pltpu.MemorySpace.SMEM),  # b2 scalar
            ],
            out_specs=pl.BlockSpec((1, 1, tile_e), lambda i: (i, 0, 0)),
        ),
        compiler_params=pltpu.CompilerParams(
            dimension_semantics=("parallel",),        # >=2 tiles -> both v7x cores
            vmem_limit_bytes=32 * 1024 * 1024,        # raise v5e's 16 MiB default
        ),
    )(src_p, dst_p, h_c, w1s, w1d, b1_row, w2_row, b2_sc)

    return out.reshape(E_pad)[:E]                     # drop pad edges; ".squeeze(1)"


if __name__ == "__main__":
    h_feats = 32
    num_nodes = 64
    num_edges = 1000          # deliberately not a multiple of the tile (exercises padding)

    key = jax.random.PRNGKey(0)
    k_h, k_src, k_dst, k_w1, k_b1, k_w2, k_b2 = jax.random.split(key, 7)

    # Node features and a small synthetic edge list (the "graph").
    h = jax.random.normal(k_h, (num_nodes, h_feats), dtype=jnp.float32)
    src = jax.random.randint(k_src, (num_edges,), 0, num_nodes)
    dst = jax.random.randint(k_dst, (num_edges,), 0, num_nodes)

    # Parameter init (shapes from nn.Linear(2F, F) and nn.Linear(F, 1)),
    # stored as [in, out] (transposed relative to PyTorch's [out, in]).
    bound1 = 1.0 / jnp.sqrt(2.0 * h_feats)
    bound2 = 1.0 / jnp.sqrt(float(h_feats))
    w1 = jax.random.uniform(k_w1, (2 * h_feats, h_feats), jnp.float32, -bound1, bound1)
    b1 = jax.random.uniform(k_b1, (h_feats,), jnp.float32, -bound1, bound1)
    w2 = jax.random.uniform(k_w2, (h_feats, 1), jnp.float32, -bound2, bound2)
    b2 = jax.random.uniform(k_b2, (1,), jnp.float32, -bound2, bound2)

    # --- Exact f32 mode: must match the PyTorch-equivalent reference closely.
    scores_f32 = mlp_predictor_scores(h, src, dst, w1, b1, w2, b2,
                                      mxu_dtype=jnp.float32)
    scores_f32 = jax.block_until_ready(scores_f32)

    x_ref = jnp.concatenate([h[src], h[dst]], axis=1)
    h1_ref = jnp.maximum(x_ref @ w1 + b1, 0.0)
    ref_f32 = jnp.sum(h1_ref * w2[:, 0], axis=-1) + b2[0]
    assert scores_f32.shape == (num_edges,)
    assert jnp.allclose(scores_f32, ref_f32, atol=2e-4, rtol=2e-4)

    # --- Default bf16-MXU mode: compare against a precision-matched reference
    # (the in-kernel one-hot gather returns the bf16 node rows exactly).
    scores_bf16 = mlp_predictor_scores(h, src, dst, w1, b1, w2, b2)
    scores_bf16 = jax.block_until_ready(scores_bf16)

    hb = h.astype(jnp.bfloat16)
    h1_b = (jnp.dot(hb[src], w1[:h_feats].astype(jnp.bfloat16),
                    preferred_element_type=jnp.float32)
            + jnp.dot(hb[dst], w1[h_feats:].astype(jnp.bfloat16),
                      preferred_element_type=jnp.float32))
    h1_b = jnp.maximum(h1_b + b1, 0.0)
    ref_bf16 = jnp.sum(h1_b * w2[:, 0], axis=-1) + b2[0]
    assert scores_bf16.shape == (num_edges,)
    assert jnp.allclose(scores_bf16, ref_bf16, atol=2e-3, rtol=2e-3)

    print("KERNEL_OK")
</pallas_src>

<mosaic_0001>
module attributes {stable_mosaic.version = 11 : i64} {
  func.func @mlp_edge_kernel(%arg0: i32, %arg1: memref<512x1xi32, #tpu.memory_space<vmem>>, %arg2: memref<512x1xi32, #tpu.memory_space<vmem>>, %arg3: memref<64x32xf32, #tpu.memory_space<vmem>>, %arg4: memref<32x32xf32, #tpu.memory_space<vmem>>, %arg5: memref<32x32xf32, #tpu.memory_space<vmem>>, %arg6: memref<1x32xf32, #tpu.memory_space<vmem>>, %arg7: memref<1x32xf32, #tpu.memory_space<vmem>>, %arg8: memref<1x1xf32, #tpu.memory_space<smem>>, %arg9: memref<1x1x512xf32, #tpu.memory_space<vmem>>) attributes {dimension_semantics = [#tpu.dimension_semantics<parallel>], iteration_bounds = array<i64: 2>, scalar_prefetch = 0 : i64, scratch_operands = 0 : i64, tpu.core_type = #tpu.core_type<tc>, window_params = [{transform_indices = @transform_0, window_bounds = array<i64: 512, 1>}, {transform_indices = @transform_1, window_bounds = array<i64: 512, 1>}, {pipeline_mode = #tpu.pipeline_mode<synchronous>, transform_indices = @transform_2, window_bounds = array<i64: 64, 32>}, {pipeline_mode = #tpu.pipeline_mode<synchronous>, transform_indices = @transform_3, window_bounds = array<i64: 32, 32>}, {pipeline_mode = #tpu.pipeline_mode<synchronous>, transform_indices = @transform_4, window_bounds = array<i64: 32, 32>}, {pipeline_mode = #tpu.pipeline_mode<synchronous>, transform_indices = @transform_5, window_bounds = array<i64: 1, 32>}, {pipeline_mode = #tpu.pipeline_mode<synchronous>, transform_indices = @transform_6, window_bounds = array<i64: 1, 32>}, {transform_indices = @transform_7, window_bounds = array<i64: 1, 1>}, {transform_indices = @transform_8, window_bounds = array<i64: 1, 1, 512>}]} {
    %0 = tpu.iota {dimensions = array<i32: 1>} : vector<512x64xi32>
    %c0 = arith.constant 0 : index
    %c0_0 = arith.constant 0 : index
    %1 = vector.load %arg1[%c0, %c0_0] : memref<512x1xi32, #tpu.memory_space<vmem>>, vector<512x1xi32>
    %2 = vector.broadcast %1 : vector<512x1xi32> to vector<512x64xi32>
    %3 = arith.cmpi eq, %0, %2 : vector<512x64xi32>
    %cst = arith.constant 1.000000e+00 : f32
    %cst_1 = arith.constant 0.000000e+00 : f32
    %4 = vector.broadcast %cst : f32 to vector<512x64xf32>
    %5 = vector.broadcast %cst_1 : f32 to vector<512x64xf32>
    %6 = arith.select %3, %4, %5 : vector<512x64xi1>, vector<512x64xf32>
    %c0_2 = arith.constant 0 : index
    %c0_3 = arith.constant 0 : index
    %7 = vector.load %arg2[%c0_2, %c0_3] : memref<512x1xi32, #tpu.memory_space<vmem>>, vector<512x1xi32>
    %8 = vector.broadcast %7 : vector<512x1xi32> to vector<512x64xi32>
    %9 = arith.cmpi eq, %0, %8 : vector<512x64xi32>
    %cst_4 = arith.constant 1.000000e+00 : f32
    %cst_5 = arith.constant 0.000000e+00 : f32
    %10 = vector.broadcast %cst_4 : f32 to vector<512x64xf32>
    %11 = vector.broadcast %cst_5 : f32 to vector<512x64xf32>
    %12 = arith.select %9, %10, %11 : vector<512x64xi1>, vector<512x64xf32>
    %c0_6 = arith.constant 0 : index
    %c0_7 = arith.constant 0 : index
    %13 = vector.load %arg3[%c0_6, %c0_7] : memref<64x32xf32, #tpu.memory_space<vmem>>, vector<64x32xf32>
    %cst_8 = arith.constant dense<0.000000e+00> : vector<512x32xf32>
    %14 = tpu.matmul %6, %13, %cst_8 {dimension_numbers = #tpu.dot_dimension_numbers<[1], [0], [0], [1], [0, 0, 1, 1], [], []>} : vector<512x64xf32>, vector<64x32xf32>, vector<512x32xf32> -> vector<512x32xf32>
    %cst_9 = arith.constant dense<0.000000e+00> : vector<512x32xf32>
    %15 = tpu.matmul %12, %13, %cst_9 {dimension_numbers = #tpu.dot_dimension_numbers<[1], [0], [0], [1], [0, 0, 1, 1], [], []>} : vector<512x64xf32>, vector<64x32xf32>, vector<512x32xf32> -> vector<512x32xf32>
    %c0_10 = arith.constant 0 : index
    %c0_11 = arith.constant 0 : index
    %16 = vector.load %arg4[%c0_10, %c0_11] : memref<32x32xf32, #tpu.memory_space<vmem>>, vector<32x32xf32>
    %cst_12 = arith.constant dense<0.000000e+00> : vector<512x32xf32>
    %17 = tpu.matmul %14, %16, %cst_12 {dimension_numbers = #tpu.dot_dimension_numbers<[1], [0], [0], [1], [0, 0, 1, 1], [], []>} : vector<512x32xf32>, vector<32x32xf32>, vector<512x32xf32> -> vector<512x32xf32>
    %c0_13 = arith.constant 0 : index
    %c0_14 = arith.constant 0 : index
    %18 = vector.load %arg5[%c0_13, %c0_14] : memref<32x32xf32, #tpu.memory_space<vmem>>, vector<32x32xf32>
    %cst_15 = arith.constant dense<0.000000e+00> : vector<512x32xf32>
    %19 = tpu.matmul %15, %18, %cst_15 {dimension_numbers = #tpu.dot_dimension_numbers<[1], [0], [0], [1], [0, 0, 1, 1], [], []>} : vector<512x32xf32>, vector<32x32xf32>, vector<512x32xf32> -> vector<512x32xf32>
    %20 = arith.addf %17, %19 : vector<512x32xf32>
    %c0_16 = arith.constant 0 : index
    %c0_17 = arith.constant 0 : index
    %21 = vector.load %arg6[%c0_16, %c0_17] : memref<1x32xf32, #tpu.memory_space<vmem>>, vector<1x32xf32>
    %22 = vector.broadcast %21 : vector<1x32xf32> to vector<512x32xf32>
    %23 = arith.addf %20, %22 : vector<512x32xf32>
    %cst_18 = arith.constant 0.000000e+00 : f32
    %24 = vector.broadcast %cst_18 : f32 to vector<512x32xf32>
    %25 = arith.maximumf %23, %24 : vector<512x32xf32>
    %c0_19 = arith.constant 0 : index
    %c0_20 = arith.constant 0 : index
    %26 = vector.load %arg7[%c0_19, %c0_20] : memref<1x32xf32, #tpu.memory_space<vmem>>, vector<1x32xf32>
    %27 = vector.broadcast %26 : vector<1x32xf32> to vector<512x32xf32>
    %28 = arith.mulf %25, %27 : vector<512x32xf32>
    %cst_21 = arith.constant dense<0.000000e+00> : vector<512xf32>
    %29 = vector.multi_reduction <add>, %28, %cst_21 [1] : vector<512x32xf32> to vector<512xf32>
    %c0_22 = arith.constant 0 : index
    %c0_23 = arith.constant 0 : index
    %30 = memref.load %arg8[%c0_22, %c0_23] : memref<1x1xf32, #tpu.memory_space<smem>>
    %31 = vector.broadcast %30 : f32 to vector<512xf32>
    %32 = arith.addf %29, %31 : vector<512xf32>
    %c0_24 = arith.constant 0 : index
    %c0_25 = arith.constant 0 : index
    %c0_26 = arith.constant 0 : index
    %33 = vector.load %arg9[%c0_24, %c0_25, %c0_26] : memref<1x1x512xf32, #tpu.memory_space<vmem>>, vector<1x1x512xf32>
    %34 = vector.shape_cast %33 : vector<1x1x512xf32> to vector<512xf32>
    %35 = vector.shape_cast %32 : vector<512xf32> to vector<1x1x512xf32>
    tpu.vector_store %arg9[%c0_24, %c0_25, %c0_26], %35 {strides = array<i32>} : memref<1x1x512xf32, #tpu.memory_space<vmem>>, vector<1x1x512xf32>,
    return
  }
  func.func @transform_0(%arg0: i32) -> (i32, i32) {
    %c0_i32 = arith.constant 0 : i32
    %c0_i32_0 = arith.constant 0 : i32
    return %arg0, %c0_i32 : i32, i32
  }
  func.func @transform_1(%arg0: i32) -> (i32, i32) {
    %c0_i32 = arith.constant 0 : i32
    %c0_i32_0 = arith.constant 0 : i32
    return %arg0, %c0_i32 : i32, i32
  }
  func.func @transform_2(%arg0: i32) -> (i32, i32) {
    %c0_i32 = arith.constant 0 : i32
    %c0_i32_0 = arith.constant 0 : i32
    %c0_i32_1 = arith.constant 0 : i32
    return %c0_i32, %c0_i32_0 : i32, i32
  }
  func.func @transform_3(%arg0: i32) -> (i32, i32) {
    %c0_i32 = arith.constant 0 : i32
    %c0_i32_0 = arith.constant 0 : i32
    %c0_i32_1 = arith.constant 0 : i32
    return %c0_i32, %c0_i32_0 : i32, i32
  }
  func.func @transform_4(%arg0: i32) -> (i32, i32) {
    %c0_i32 = arith.constant 0 : i32
    %c0_i32_0 = arith.constant 0 : i32
    %c0_i32_1 = arith.constant 0 : i32
    return %c0_i32, %c0_i32_0 : i32, i32
  }
  func.func @transform_5(%arg0: i32) -> (i32, i32) {
    %c0_i32 = arith.constant 0 : i32
    %c0_i32_0 = arith.constant 0 : i32
    %c0_i32_1 = arith.constant 0 : i32
    return %c0_i32, %c0_i32_0 : i32, i32
  }
  func.func @transform_6(%arg0: i32) -> (i32, i32) {
    %c0_i32 = arith.constant 0 : i32
    %c0_i32_0 = arith.constant 0 : i32
    %c0_i32_1 = arith.constant 0 : i32
    return %c0_i32, %c0_i32_0 : i32, i32
  }
  func.func @transform_7(%arg0: i32) -> (i32, i32) {
    %c0_i32 = arith.constant 0 : i32
    %c0_i32_0 = arith.constant 0 : i32
    %c0_i32_1 = arith.constant 0 : i32
    return %c0_i32, %c0_i32_0 : i32, i32
  }
  func.func @transform_8(%arg0: i32) -> (i32, i32, i32) {
    %c0_i32 = arith.constant 0 : i32
    %c0_i32_0 = arith.constant 0 : i32
    %c0_i32_1 = arith.constant 0 : i32
    return %arg0, %c0_i32, %c0_i32_0 : i32, i32, i32
  }
}

</mosaic_0001>

<bundles_post_ra>
// kernel: tpu_custom_call.1
= control target key start
LH: loop header
LB: loop body
LE: loop exit
PB: predicated region body
PF: predicated region fallthrough
CT: control target
= control target key end

     0   :  { %s7052_s0 = inlined_call_operand.vmem [shape: s32[1024,1], index: 0, kind: input, shape index: {}]   ;;  %s7053_s1 = inlined_call_operand.vmem [shape: s32[1024,1], index: 1, kind: input, shape index: {}]   ;;  %s7054_s2 = inlined_call_operand.vmem [shape: f32[64,32], index: 2, kind: input, shape index: {}]   ;;  %s7055_s3 = inlined_call_operand.vmem [shape: f32[32,32], index: 3, kind: input, shape index: {}]   ;;  %s7056_s4 = inlined_call_operand.vmem [shape: f32[32,32], index: 4, kind: input, shape index: {}]   ;;  %s7057_s5 = inlined_call_operand.vmem [shape: f32[1,32], index: 5, kind: input, shape index: {}]   ;;  %s7058_s6 = inlined_call_operand.vmem [shape: f32[1,32], index: 6, kind: input, shape index: {}]   ;;  %s7059_s7 = inlined_call_operand.<no memory space> [shape: f32[1,1], index: 7, kind: input, shape index: {}]   ;;  %s7060_s8 = inlined_call_operand.hbm [shape: f32[2,1,512], index: 8, kind: output, shape index: {}]  }
   0x1   :  { %13 = sst [smem:[#allocation2]] %s7059_s7 }
   0x2   :  { %14 = vsyncpa [#allocation4], 0 }
   0x3   :  { %16 = vsyncpa [#allocation4 + $0x1], 0  ;;  %s5221_s29 = smov 0   ;;  %s5223_s30 = smov 0  }
   0x4   :  { %s5225_s9 = smov 0   ;;  %s5227_s10 = smov 0  }
   0x5 LB: > { %s5242_s7 = sadd.s32 4294967295, %s5169_s10   ;;  %s4786_s11 = sadd.s32 4294967294, %s5169_s10   ;;  %s5169_s10 = sphi %s5227_s10, %s7069_s10   ;;  %s5165_s9 = sphi %s5225_s9, %s7068_s9   ;;  %s5161_s30 = sphi %s5223_s30, %s7067_s30   ;;  %s5157_s29 = sphi %s5221_s29, %s7066_s29  }
   0x6   : > { %s5246_s12 = sadd.s32 1, %s5169_s10   ;;  %s207_s13 = sadd.s32 1, %s5165_s9 }
   0x7   : > { %s204_s14 = ssub.s32 %s5169_s10, %s5246_s12  ;;  %p217_p0 = scmp.ne.s32.totalorder %s5165_s9, %s5161_s30 }
   0x8   : > { %p205_p1 = scmp.eq.s32.totalorder %s204_s14, 0  ;;  %p218_p2 = scmp.eq.s32.totalorder %s5242_s7, 1 }
   0x9   : > { %p223_p3 = scmp.ne.s32.totalorder %s5161_s30, %s5157_s29  ;;  %p224_p4 = scmp.eq.s32.totalorder %s4786_s11, 1 }
   0xa   : > { %s5257_s15 = scalar_select %p205_p1, %s5165_s9, %s207_s13  }
   0xb   : > { %p5259_p5 = por %p218_p2, %p217_p0  ;;  %p5263_p6 = por %p224_p4, %p223_p3 }
   0xc   : > { %p4789_p7 = scmp.ge.s32.totalorder %s5169_s10, 1  ;;  %p278_p8 = scmp.lt.s32.totalorder %s5169_s10, 3 }
   0xe   : > { %p279_p9 = pnand %p4789_p7, %p278_p8 }
   0xf   : > { %s4791_s18 = sshll.u32 (!%p279_p9), %s5242_s7, 6  ;;  %s3113_s23 = sld [smem:[#allocation2]] (!%p279_p9) }
  0x10   : > { %282 = sbr.rel (%p279_p9) target bundleno = 1993 (0x7c9), region = 52  ;;  %p318_p10 = scmp.lt.s32.totalorder (!%p279_p9), %s4791_s18, 127 }
  0x11   : > { %s314_s21 = sand.u32 (!%p279_p9), 1, %s5161_s30   ;;  %s5052_s24 = sshll.u32 (!%p279_p9), %s5242_s7, 2 }
  0x12   : > { %s4710_s27 = scalar_lea.hbm (!%p279_p9), %s7060_s8, %s5052_s24  ;;  %s5127_s20 = scalar_lea.hbm (!%p279_p9), %s7060_s8, 8 }
  0x13   : > { %s4714_s11 = sshll.u32 (!%p279_p9), %s4710_s27, 4  ;;  %s4715_s11 = int_to_ptr.hbm [resolvable:$true] %s4714_s11 }
  0x15   : > { %v5171_v0 = vmov 0   ;;  %s7071_s18 = smov (!%p318_p10, %s4791_s18), 127  ;;  %v1106_v28 = vld [vmem:[%s7054_s2 + $0x38] sm:$0xff]  ;;  %v1105_v29 = vld [vmem:[%s7054_s2 + $0x30] sm:$0xff]  ;;  %v1104_v33 = vld [vmem:[%s7054_s2 + $0x28] sm:$0xff]  ;;  %v329_v54 = vlaneseq  ;;  %vm1107_vm0 = vcmask 523264  }
  0x16   : > { %5098 = vset.pattern.permute.xlu2 %v5171_v0  ;;  %5097 = vset.pattern.permute.xlu1 %v5171_v0  ;;  %s4792_s19 = sshll.u32 %s7071_s18, 3  ;;  %v1103_v34 = vld [vmem:[%s7054_s2 + $0x20] sm:$0xff]  ;;  %v1102_v35 = vld [vmem:[%s7054_s2 + $0x18] sm:$0xff]  ;;  %v1101_v39 = vld [vmem:[%s7054_s2 + $0x10] sm:$0xff]  ;;  %v5172_v62 = vmov 0.0   ;;  %s5121_s18 = sshra.s32 %s4715_s11, 4  ;;  %s5122_s18 = int_to_ptr.hbm [resolvable:$true] %s5121_s18 }
  0x17   : > { %5096 = vset.pattern.permute.xlu0 %v5171_v0  ;;  %s5278_s22 = scalar_lea.vmem %s7052_s0, %s4792_s19  ;;  %1308 = vmatpush.msra.mxu0 %v1106_v28  ;;  %v1100_v40 = vld [vmem:[%s7054_s2 + $0x8] sm:$0xff]  ;;  %v1099_v41 = vld [vmem:[%s7054_s2] sm:$0xff]  ;;  %v5356_v58 = vand.u32 127, %v329_v54  ;;  %s5430_s13 = scalar_lea.vmem %s7053_s1, %s4792_s19 }
  0x18   : > { %v335_v1 = vld [vmem:[%s5278_s22 + $0x20] sm:$0xff]  ;;  %v333_v2 = vld [vmem:[%s5278_s22 + $0x10] sm:$0xff]  ;;  %v336_v4 = vld [vmem:[%s5278_s22 + $0x28] sm:$0xff]  ;;  %1709 = vmatpush.msra.mxu1 %v1106_v28  ;;  %s5123_s19 = scalar_lea.hbm %s5122_s18, 4  ;;  %p5128_p0 = scmp.lt.s32.totalorder %s5122_s18, %s7060_s8 }
  0x19   : > { %v331_v3 = vld [vmem:[%s5278_s22] sm:$0xff]  ;;  %408 = vperm.xlu2 %5098, %v335_v1   ;;  %402 = vperm.xlu1 %5097, %v333_v2   ;;  %v334_v5 = vld [vmem:[%s5278_s22 + $0x18] sm:$0xff]  ;;  %v332_v6 = vld [vmem:[%s5278_s22 + $0x8] sm:$0xff]  ;;  %p5124_p11 = scmp.ne.s32.totalorder %s5122_s18, %s5123_s19  ;;  %p5129_p1 = scmp.lt.s32.totalorder %s5127_s20, %s5123_s19 }
  0x1a   : > { %396 = vperm.xlu0 %5096, %v331_v3   ;;  %v339_v7 = vld [vmem:[%s5278_s22 + $0x40] sm:$0xff]  ;;  %v338_v8 = vld [vmem:[%s5278_s22 + $0x38] sm:$0xff]  ;;  %v337_v9 = vld [vmem:[%s5278_s22 + $0x30] sm:$0xff]  ;;  %1309 = vmatpush.msra.mxu0 %v1105_v29 }
  0x1b   : > { %v342_v10 = vld [vmem:[%s5278_s22 + $0x58] sm:$0xff]  ;;  %v341_v11 = vld [vmem:[%s5278_s22 + $0x50] sm:$0xff]  ;;  %v340_v12 = vld [vmem:[%s5278_s22 + $0x48] sm:$0xff]  ;;  %1710 = vmatpush.msra.mxu1 %v1105_v29  ;;  %p5125_p12 = pnand %p5124_p11, %p5259_p5  ;;  %p5130_p2 = por %p5129_p1, %p5128_p0 }
  0x1c   : > { %v345_v13 = vld [vmem:[%s5278_s22 + $0x70] sm:$0xff]  ;;  %v344_v14 = vld [vmem:[%s5278_s22 + $0x68] sm:$0xff]  ;;  %v343_v15 = vld [vmem:[%s5278_s22 + $0x60] sm:$0xff]  ;;  %1310 = vmatpush.msra.mxu0 %v1104_v33 }
  0x1d   : > { %v348_v16 = vld [vmem:[%s5278_s22 + $0x88] sm:$0xff]  ;;  %v347_v17 = vld [vmem:[%s5278_s22 + $0x80] sm:$0xff]  ;;  %v346_v18 = vld [vmem:[%s5278_s22 + $0x78] sm:$0xff]  ;;  %1711 = vmatpush.msra.mxu1 %v1104_v33  ;;  %p5126_p13 = pneg %p5125_p12 }
  0x1e   : > { %v351_v19 = vld [vmem:[%s5278_s22 + $0xa0] sm:$0xff]  ;;  %v350_v20 = vld [vmem:[%s5278_s22 + $0x98] sm:$0xff]  ;;  %v349_v21 = vld [vmem:[%s5278_s22 + $0x90] sm:$0xff]  ;;  %1311 = vmatpush.msra.mxu0 %v1103_v34 }
  0x1f   : > { %v354_v22 = vld [vmem:[%s5278_s22 + $0xb8] sm:$0xff]  ;;  %v353_v23 = vld [vmem:[%s5278_s22 + $0xb0] sm:$0xff]  ;;  %v352_v24 = vld [vmem:[%s5278_s22 + $0xa8] sm:$0xff]  ;;  %1712 = vmatpush.msra.mxu1 %v1103_v34  ;;  %p5131_p3 = pnand %p5130_p2, %p5126_p13 }
  0x20   : > { %v357_v25 = vld [vmem:[%s5278_s22 + $0xd0] sm:$0xff]  ;;  %v356_v26 = vld [vmem:[%s5278_s22 + $0xc8] sm:$0xff]  ;;  %v355_v27 = vld [vmem:[%s5278_s22 + $0xc0] sm:$0xff]  ;;  %1312 = vmatpush.msra.mxu0 %v1102_v35 }
  0x21   : > { %411 = vperm.xlu2 %5098, %v336_v4   ;;  %405 = vperm.xlu1 %5097, %v334_v5   ;;  %v360_v30 = vld [vmem:[%s5278_s22 + $0xe8] sm:$0xff]  ;;  %v359_v31 = vld [vmem:[%s5278_s22 + $0xe0] sm:$0xff]  ;;  %v358_v32 = vld [vmem:[%s5278_s22 + $0xd8] sm:$0xff] }
  0x22   : > { %399 = vperm.xlu0 %5096, %v332_v6   ;;  %v363_v36 = vld [vmem:[%s5278_s22 + $0x100] sm:$0xff]  ;;  %v362_v37 = vld [vmem:[%s5278_s22 + $0xf8] sm:$0xff]  ;;  %v361_v38 = vld [vmem:[%s5278_s22 + $0xf0] sm:$0xff]  ;;  %1713 = vmatpush.msra.mxu1 %v1102_v35 }
  0x23   : > { %1313 = vmatpush.msra.mxu0 %v1101_v39  ;;  %v366_v42 = vld [vmem:[%s5278_s22 + $0x118] sm:$0xff]  ;;  %v365_v43 = vld [vmem:[%s5278_s22 + $0x110] sm:$0xff]  ;;  %v364_v44 = vld [vmem:[%s5278_s22 + $0x108] sm:$0xff] }
  0x24   : > { %1714 = vmatpush.msra.mxu1 %v1101_v39  ;;  %v369_v46 = vld [vmem:[%s5278_s22 + $0x130] sm:$0xff]  ;;  %v368_v47 = vld [vmem:[%s5278_s22 + $0x128] sm:$0xff]  ;;  %v367_v48 = vld [vmem:[%s5278_s22 + $0x120] sm:$0xff] }
  0x25   : > { %1314 = vmatpush.msra.mxu0 %v1100_v40  ;;  %v372_v50 = vld [vmem:[%s5278_s22 + $0x148] sm:$0xff]  ;;  %v371_v51 = vld [vmem:[%s5278_s22 + $0x140] sm:$0xff]  ;;  %v370_v52 = vld [vmem:[%s5278_s22 + $0x138] sm:$0xff] }
  0x26   : > { %1715 = vmatpush.msra.mxu1 %v1100_v40  ;;  %v375_v55 = vld [vmem:[%s5278_s22 + $0x160] sm:$0xff]  ;;  %v374_v56 = vld [vmem:[%s5278_s22 + $0x158] sm:$0xff]  ;;  %v373_v57 = vld [vmem:[%s5278_s22 + $0x150] sm:$0xff] }
  0x27   : > { %1315 = vmatpush.msra.mxu0 %v1099_v41  ;;  %v378_v0 = vld [vmem:[%s5278_s22 + $0x178] sm:$0xff]  ;;  %v377_v1 = vld [vmem:[%s5278_s22 + $0x170] sm:$0xff]  ;;  %v376_v2 = vld [vmem:[%s5278_s22 + $0x168] sm:$0xff] }
  0x28   : > { %1716 = vmatpush.msra.mxu1 %v1099_v41  ;;  %v390_v28 = vld [vmem:[%s5278_s22 + $0x1d8] sm:$0xff]  ;;  %v389_v29 = vld [vmem:[%s5278_s22 + $0x1d0] sm:$0xff]  ;;  %v716_v41 = vld [vmem:[%s5430_s13 + $0x8] sm:$0xff] }
  0x29   : > { %420 = vperm.xlu2 %5098, %v339_v7   ;;  %417 = vperm.xlu1 %5097, %v338_v8   ;;  %v381_v7 = vld [vmem:[%s5278_s22 + $0x190] sm:$0xff]  ;;  %v380_v8 = vld [vmem:[%s5278_s22 + $0x188] sm:$0xff] }
  0x2a   : > { %414 = vperm.xlu0 %5096, %v337_v9   ;;  %v379_v9 = vld [vmem:[%s5278_s22 + $0x180] sm:$0xff]  ;;  %v393_v35 = vld [vmem:[%s5278_s22 + $0x1f0] sm:$0xff] }
  0x31   : > { %429 = vperm.xlu2 %5098, %v342_v10   ;;  %426 = vperm.xlu1 %5097, %v341_v11  }
  0x32   : > { %423 = vperm.xlu0 %5096, %v340_v12  }
  0x39   : > { %438 = vperm.xlu2 %5098, %v345_v13   ;;  %435 = vperm.xlu1 %5097, %v344_v14   ;;  %v384_v14 = vld [vmem:[%s5278_s22 + $0x1a8] sm:$0xff] }
  0x3a   : > { %432 = vperm.xlu0 %5096, %v343_v15   ;;  %v383_v15 = vld [vmem:[%s5278_s22 + $0x1a0] sm:$0xff] }
  0x41   : > { %447 = vperm.xlu2 %5098, %v348_v16   ;;  %444 = vperm.xlu1 %5097, %v347_v17   ;;  %v382_v16 = vld [vmem:[%s5278_s22 + $0x198] sm:$0xff] }
  0x42   : > { %441 = vperm.xlu0 %5096, %v346_v18  }
  0x49   : > { %456 = vperm.xlu2 %5098, %v351_v19   ;;  %453 = vperm.xlu1 %5097, %v350_v20  }
  0x4a   : > { %450 = vperm.xlu0 %5096, %v349_v21   ;;  %v387_v21 = vld [vmem:[%s5278_s22 + $0x1c0] sm:$0xff] }
  0x51   : > { %465 = vperm.xlu2 %5098, %v354_v22   ;;  %462 = vperm.xlu1 %5097, %v353_v23   ;;  %v386_v22 = vld [vmem:[%s5278_s22 + $0x1b8] sm:$0xff]  ;;  %v385_v23 = vld [vmem:[%s5278_s22 + $0x1b0] sm:$0xff] }
  0x52   : > { %459 = vperm.xlu0 %5096, %v352_v24  }
  0x59   : > { %474 = vperm.xlu2 %5098, %v357_v25   ;;  %471 = vperm.xlu1 %5097, %v356_v26  }
  0x5a   : > { %468 = vperm.xlu0 %5096, %v355_v27  }
  0x61   : > { %483 = vperm.xlu2 %5098, %v360_v30   ;;  %480 = vperm.xlu1 %5097, %v359_v31   ;;  %v388_v30 = vld [vmem:[%s5278_s22 + $0x1c8] sm:$0xff] }
  0x62   : > { %477 = vperm.xlu0 %5096, %v358_v32  }
  0x69   : > { %492 = vperm.xlu2 %5098, %v363_v36   ;;  %489 = vperm.xlu1 %5097, %v362_v37   ;;  %v392_v36 = vld [vmem:[%s5278_s22 + $0x1e8] sm:$0xff]  ;;  %v391_v37 = vld [vmem:[%s5278_s22 + $0x1e0] sm:$0xff] }
  0x6a   : > { %486 = vperm.xlu0 %5096, %v361_v38  }
  0x71   : > { %501 = vperm.xlu2 %5098, %v366_v42   ;;  %498 = vperm.xlu1 %5097, %v365_v43   ;;  %v715_v42 = vld [vmem:[%s5430_s13] sm:$0xff] }
  0x72   : > { %495 = vperm.xlu0 %5096, %v364_v44   ;;  %v394_v44 = vld [vmem:[%s5278_s22 + $0x1f8] sm:$0xff] }
  0x73   : > { %v5340_v45 = vpop.permute.xlu2 %408 }
  0x74   : > { %vm591_vm5 = vcmp.eq.s32.totalorder %v5356_v58, %v5340_v45 }
  0x75   : > { %v655_v27 = vsel %vm591_vm5, 1.0, %v5172_v62 }
  0x79   : > { %510 = vperm.xlu2 %5098, %v369_v46   ;;  %507 = vperm.xlu1 %5097, %v368_v47  }
  0x7a   : > { %504 = vperm.xlu0 %5096, %v367_v48   ;;  %v719_v48 = vld [vmem:[%s5430_s13 + $0x20] sm:$0xff] }
  0x7b   : > { %v5345_v49 = vpop.permute.xlu2 %411 }
  0x7c   : > { %vm592_vm6 = vcmp.eq.s32.totalorder %v5356_v58, %v5345_v49  ;;  %v718_v49 = vld [vmem:[%s5430_s13 + $0x18] sm:$0xff] }
  0x7d   : > { %v656_v34 = vsel %vm592_vm6, 1.0, %v5172_v62 }
  0x81   : > { %519 = vperm.xlu2 %5098, %v372_v50   ;;  %516 = vperm.xlu1 %5097, %v371_v51   ;;  %v717_v50 = vld [vmem:[%s5430_s13 + $0x10] sm:$0xff] }
  0x82   : > { %513 = vperm.xlu0 %5096, %v370_v52  }
  0x83   : > { %v5350_v53 = vpop.permute.xlu2 %420 }
  0x84   : > { %vm595_vm9 = vcmp.eq.s32.totalorder %v5356_v58, %v5350_v53 }
  0x89   : > { %528 = vperm.xlu2 %5098, %v375_v55   ;;  %525 = vperm.xlu1 %5097, %v374_v56   ;;  %v659_v56 = vsel %vm595_vm9, 1.0, %v5172_v62 }
  0x8a   : > { %522 = vperm.xlu0 %5096, %v373_v57   ;;  %v722_v57 = vld [vmem:[%s5430_s13 + $0x38] sm:$0xff] }
  0x8b   : > { %v5358_v59 = vpop.permute.xlu2 %429  ;;  %v403_v60 = vpop.permute.xlu1 %402 }
  0x8c   : > { %v397_v61 = vpop.permute.xlu0 %396  ;;  %vm589_vm3 = vcmp.eq.s32.totalorder %v5356_v58, %v403_v60  ;;  %v721_v60 = vld [vmem:[%s5430_s13 + $0x30] sm:$0xff]  ;;  %vm598_vm12 = vcmp.eq.s32.totalorder %v5356_v58, %v5358_v59 }
  0x8d   : > { %vm587_vm1 = vcmp.eq.s32.totalorder %v5356_v58, %v397_v61  ;;  %v653_v13 = vsel %vm589_vm3, 1.0, %v5172_v62  ;;  %v720_v61 = vld [vmem:[%s5430_s13 + $0x28] sm:$0xff]  ;;  %v729_v59 = vld [vmem:[%s5430_s13 + $0x70] sm:$0xff] }
  0x8e   : > { %v651_v63 = vsel %vm587_vm1, 1.0, %v5172_v62 }
  0x8f   : > { %4795 = vmatmul.msk.f32.vlgmr.msra.gmra.mxu0 %vm1107_vm0, %v651_v63 }
  0x91   : > { %537 = vperm.xlu2 %5098, %v378_v0   ;;  %534 = vperm.xlu1 %5097, %v377_v1  }
  0x92   : > { %531 = vperm.xlu0 %5096, %v376_v2   ;;  %v725_v2 = vld [vmem:[%s5430_s13 + $0x50] sm:$0xff] }
  0x93   : > { %v5366_v3 = vpop.permute.xlu2 %438  ;;  %v406_v4 = vpop.permute.xlu1 %405 }
  0x94   : > { %v400_v5 = vpop.permute.xlu0 %399  ;;  %vm590_vm4 = vcmp.eq.s32.totalorder %v5356_v58, %v406_v4  ;;  %v724_v4 = vld [vmem:[%s5430_s13 + $0x48] sm:$0xff]  ;;  %vm601_vm15 = vcmp.eq.s32.totalorder %v5356_v58, %v5366_v3 }
  0x95   : > { %vm588_vm2 = vcmp.eq.s32.totalorder %v5356_v58, %v400_v5  ;;  %v654_v20 = vsel %vm590_vm4, 1.0, %v5172_v62  ;;  %v723_v5 = vld [vmem:[%s5430_s13 + $0x40] sm:$0xff] }
  0x96   : > { %v652_v6 = vsel %vm588_vm2, 1.0, %v5172_v62  ;;  %vm1918_vm2 = vcmask 261120  }
  0x97   : > { %4796 = vmatmul.msk.f32.gmra.mxu0 %vm1107_vm0, %v652_v6 }
  0x99   : > { %546 = vperm.xlu2 %5098, %v381_v7   ;;  %543 = vperm.xlu1 %5097, %v380_v8  }
  0x9a   : > { %540 = vperm.xlu0 %5096, %v379_v9  }
  0x9b   : > { %v5375_v10 = vpop.permute.xlu2 %447  ;;  %v5377_v11 = vpop.permute.xlu1 %417 }
  0x9c   : > { %v415_v12 = vpop.permute.xlu0 %414  ;;  %vm594_vm8 = vcmp.eq.s32.totalorder %v5356_v58, %v5377_v11  ;;  %v728_v11 = vld [vmem:[%s5430_s13 + $0x68] sm:$0xff]  ;;  %vm604_vm4 = vcmp.eq.s32.totalorder %v5356_v58, %v5375_v10 }
  0x9d   : > { %vm593_vm7 = vcmp.eq.s32.totalorder %v5356_v58, %v415_v12  ;;  %v658_v47 = vsel %vm594_vm8, 1.0, %v5172_v62  ;;  %v727_v12 = vld [vmem:[%s5430_s13 + $0x60] sm:$0xff] }
  0x9e   : > { %v657_v40 = vsel %vm593_vm7, 1.0, %v5172_v62 }
  0x9f   : > { %4797 = vmatmul.msk.f32.gmra.mxu0 %vm1107_vm0, %v653_v13  ;;  %v726_v13 = vld [vmem:[%s5430_s13 + $0x58] sm:$0xff] }
  0xa1   : > { %555 = vperm.xlu2 %5098, %v384_v14   ;;  %552 = vperm.xlu1 %5097, %v383_v15  }
  0xa2   : > { %549 = vperm.xlu0 %5096, %v382_v16   ;;  %v1913_v16 = vld [vmem:[%s7055_s3 + $0x18] sm:$0xff] }
  0xa3   : > { %v5385_v17 = vpop.permute.xlu2 %456  ;;  %v5387_v18 = vpop.permute.xlu1 %426  ;;  %2524 = vmatpush.msra.mxu3 %v1913_v16  ;;  %v746_v16 = vld [vmem:[%s5430_s13 + $0xf8] sm:$0xff] }
  0xa4   : > { %v5389_v19 = vpop.permute.xlu0 %423  ;;  %vm597_vm11 = vcmp.eq.s32.totalorder %v5356_v58, %v5387_v18  ;;  %v662_v18 = vsel %vm598_vm12, 1.0, %v5172_v62  ;;  %vm607_vm7 = vcmp.eq.s32.totalorder %v5356_v58, %v5385_v17 }
  0xa5   : > { %vm596_vm10 = vcmp.eq.s32.totalorder %v5356_v58, %v5389_v19  ;;  %v661_v9 = vsel %vm597_vm11, 1.0, %v5172_v62  ;;  %v731_v19 = vld [vmem:[%s5430_s13 + $0x80] sm:$0xff] }
  0xa6   : > { %v660_v1 = vsel %vm596_vm10, 1.0, %v5172_v62 }
  0xa7   : > { %4798 = vmatmul.msk.f32.gmra.mxu0 %vm1107_vm0, %v654_v20  ;;  %v730_v20 = vld [vmem:[%s5430_s13 + $0x78] sm:$0xff] }
  0xa9   : > { %564 = vperm.xlu2 %5098, %v387_v21   ;;  %561 = vperm.xlu1 %5097, %v386_v22   ;;  %v1912_v22 = vld [vmem:[%s7055_s3 + $0x10] sm:$0xff] }
  0xaa   : > { %558 = vperm.xlu0 %5096, %v385_v23   ;;  %v1911_v23 = vld [vmem:[%s7055_s3 + $0x8] sm:$0xff]  ;;  %2525 = vmatpush.msra.mxu3 %v1912_v22 }
  0xab   : > { %v5398_v24 = vpop.permute.xlu2 %465  ;;  %v5400_v25 = vpop.permute.xlu1 %435 }
  0xac   : > { %v5402_v26 = vpop.permute.xlu0 %432  ;;  %2526 = vmatpush.msra.mxu3 %v1911_v23  ;;  %vm600_vm14 = vcmp.eq.s32.totalorder %v5356_v58, %v5400_v25  ;;  %v668_v23 = vsel %vm604_vm4, 1.0, %v5172_v62 }
  0xad   : > { %vm599_vm13 = vcmp.eq.s32.totalorder %v5356_v58, %v5402_v26 }
  0xaf   : > { %4799 = vmatmul.msk.f32.gmra.mxu0 %vm1107_vm0, %v655_v27  ;;  %v1910_v27 = vld [vmem:[%s7055_s3] sm:$0xff] }
  0xb0   : > { %2527 = vmatpush.msra.mxu3 %v1910_v27  ;;  %v749_v27 = vld [vmem:[%s5430_s13 + $0x110] sm:$0xff] }
  0xb1   : > { %573 = vperm.xlu2 %5098, %v390_v28   ;;  %570 = vperm.xlu1 %5097, %v389_v29  }
  0xb2   : > { %567 = vperm.xlu0 %5096, %v388_v30   ;;  %v663_v30 = vsel %vm599_vm13, 1.0, %v5172_v62  ;;  %vm610_vm13 = vcmp.eq.s32.totalorder %v5356_v58, %v5398_v24 }
  0xb3   : > { %v5411_v31 = vpop.permute.xlu1 %444  ;;  %v5415_v33 = vpop.permute.xlu2 %474 }
  0xb4   : > { %v5413_v32 = vpop.permute.xlu0 %441  ;;  %vm603_vm3 = vcmp.eq.s32.totalorder %v5356_v58, %v5411_v31 }
  0xb5   : > { %vm602_vm1 = vcmp.eq.s32.totalorder %v5356_v58, %v5413_v32 }
  0xb7   : > { %4800 = vmatmul.msk.f32.gmra.mxu0 %vm1107_vm0, %v656_v34  ;;  %v734_v34 = vld [vmem:[%s5430_s13 + $0x98] sm:$0xff] }
  0xb9   : > { %582 = vperm.xlu2 %5098, %v393_v35   ;;  %579 = vperm.xlu1 %5097, %v392_v36   ;;  %v733_v35 = vld [vmem:[%s5430_s13 + $0x90] sm:$0xff]  ;;  %v732_v36 = vld [vmem:[%s5430_s13 + $0x88] sm:$0xff] }
  0xba   : > { %576 = vperm.xlu0 %5096, %v391_v37  }
  0xbb   : > { %v5423_v38 = vpop.permute.xlu1 %453  ;;  %v5437_v43 = vpop.permute.xlu2 %483 }
  0xbc   : > { %v5432_v39 = vpop.permute.xlu0 %450  ;;  %vm606_vm6 = vcmp.eq.s32.totalorder %v5356_v58, %v5423_v38 }
  0xbd   : > { %vm605_vm5 = vcmp.eq.s32.totalorder %v5356_v58, %v5432_v39 }
  0xbf   : > { %4801 = vmatmul.msk.f32.gmra.mxu0 %vm1107_vm0, %v657_v40 }
  0xc1   : > { %783 = vperm.xlu2 %5098, %v716_v41   ;;  %780 = vperm.xlu1 %5097, %v715_v42   ;;  %v664_v41 = vsel %vm600_vm14, 1.0, %v5172_v62  ;;  %v737_v42 = vld [vmem:[%s5430_s13 + $0xb0] sm:$0xff] }
  0xc2   : > { %585 = vperm.xlu0 %5096, %v394_v44   ;;  %v736_v44 = vld [vmem:[%s5430_s13 + $0xa8] sm:$0xff] }
  0xc3   : > { %v5443_v45 = vpop.permute.xlu1 %462  ;;  %v5452_v51 = vpop.permute.xlu2 %492 }
  0xc4   : > { %v5445_v46 = vpop.permute.xlu0 %459  ;;  %vm609_vm11 = vcmp.eq.s32.totalorder %v5356_v58, %v5443_v45 }
  0xc5   : > { %vm608_vm8 = vcmp.eq.s32.totalorder %v5356_v58, %v5445_v46  ;;  %v759_v46 = vld [vmem:[%s5430_s13 + $0x160] sm:$0xff] }
  0xc7   : > { %4802 = vmatmul.msk.f32.gmra.mxu0 %vm1107_vm0, %v658_v47  ;;  %v735_v47 = vld [vmem:[%s5430_s13 + $0xa0] sm:$0xff] }
  0xc9   : > { %792 = vperm.xlu2 %5098, %v719_v48   ;;  %789 = vperm.xlu1 %5097, %v718_v49  }
  0xca   : > { %786 = vperm.xlu0 %5096, %v717_v50   ;;  %v665_v50 = vsel %vm601_vm15, 1.0, %v5172_v62 }
  0xcb   : > { %v5456_v52 = vpop.permute.xlu1 %471  ;;  %v5467_v53 = vpop.permute.xlu2 %501 }
  0xcc   : > { %v5458_v55 = vpop.permute.xlu0 %468 }
  0xcd   : > { %vm611_vm15 = vcmp.eq.s32.totalorder %v5356_v58, %v5458_v55 }
  0xcf   : > { %4803 = vmatmul.msk.f32.gmra.mxu0 %vm1107_vm0, %v659_v56  ;;  %v740_v56 = vld [vmem:[%s5430_s13 + $0xc8] sm:$0xff] }
  0xd1   : > { %801 = vperm.xlu2 %5098, %v722_v57   ;;  %798 = vperm.xlu1 %5097, %v721_v60   ;;  %v739_v57 = vld [vmem:[%s5430_s13 + $0xc0] sm:$0xff]  ;;  %v738_v60 = vld [vmem:[%s5430_s13 + $0xb8] sm:$0xff] }
  0xd2   : > { %795 = vperm.xlu0 %5096, %v720_v61  }
  0xd3   : > { %v5469_v63 = vpop.permute.xlu1 %480  ;;  %v5484_v8 = vpop.permute.xlu2 %510 }
  0xd4   : > { %v5471_v0 = vpop.permute.xlu0 %477 }
  0xd7   : > { %4804 = vmatmul.msk.f32.gmra.mxu0 %vm1107_vm0, %v660_v1 }
  0xd9   : > { %810 = vperm.xlu2 %5098, %v725_v2   ;;  %807 = vperm.xlu1 %5097, %v724_v4   ;;  %v666_v2 = vsel %vm602_vm1, 1.0, %v5172_v62  ;;  %v743_v4 = vld [vmem:[%s5430_s13 + $0xe0] sm:$0xff] }
  0xda   : > { %804 = vperm.xlu0 %5096, %v723_v5   ;;  %v742_v5 = vld [vmem:[%s5430_s13 + $0xd8] sm:$0xff] }
  0xdb   : > { %v5480_v6 = vpop.permute.xlu1 %489  ;;  %v5503_v21 = vpop.permute.xlu2 %519 }
  0xdc   : > { %v5482_v7 = vpop.permute.xlu0 %486 }
  0xdf   : > { %4805 = vmatmul.msk.f32.gmra.mxu0 %vm1107_vm0, %v661_v9  ;;  %v741_v9 = vld [vmem:[%s5430_s13 + $0xd0] sm:$0xff] }
  0xe1   : > { %819 = vperm.xlu2 %5098, %v728_v11   ;;  %816 = vperm.xlu1 %5097, %v727_v12  }
  0xe2   : > { %813 = vperm.xlu0 %5096, %v726_v13   ;;  %v667_v13 = vsel %vm603_vm3, 1.0, %v5172_v62  ;;  %vm612_vm3 = vcmp.eq.s32.totalorder %v5356_v58, %v5456_v52 }
  0xe3   : > { %v5493_v14 = vpop.permute.xlu1 %498  ;;  %v5527_v37 = vpop.permute.xlu2 %528 }
  0xe4   : > { %v5495_v15 = vpop.permute.xlu0 %495 }
  0xe7   : > { %4806 = vmatmul.msk.f32.gmra.mxu0 %vm1107_vm0, %v662_v18  ;;  %v745_v18 = vld [vmem:[%s5430_s13 + $0xf0] sm:$0xff] }
  0xe9   : > { %828 = vperm.xlu2 %5098, %v731_v19   ;;  %825 = vperm.xlu1 %5097, %v730_v20   ;;  %v744_v20 = vld [vmem:[%s5430_s13 + $0xe8] sm:$0xff] }
  0xea   : > { %822 = vperm.xlu0 %5096, %v729_v59  }
  0xeb   : > { %v5518_v28 = vpop.permute.xlu1 %507  ;;  %v5542_v25 = vpop.permute.xlu2 %537 }
  0xec   : > { %v5520_v29 = vpop.permute.xlu0 %504 }
  0xef   : > { %4807 = vmatmul.msk.f32.gmra.mxu0 %vm1107_vm0, %v663_v30  ;;  %v748_v30 = vld [vmem:[%s5430_s13 + $0x108] sm:$0xff] }
  0xf1   : > { %837 = vperm.xlu2 %5098, %v734_v34   ;;  %834 = vperm.xlu1 %5097, %v733_v35   ;;  %v747_v34 = vld [vmem:[%s5430_s13 + $0x100] sm:$0xff] }
  0xf2   : > { %831 = vperm.xlu0 %5096, %v732_v36  }
  0xf3   : > { %v5531_v26 = vpop.permute.xlu1 %516  ;;  %v5559_v1 = vpop.permute.xlu2 %546 }
  0xf4   : > { %v5533_v40 = vpop.permute.xlu0 %513 }
  0xf7   : > { %4808 = vmatmul.msk.f32.gmra.mxu0 %vm1107_vm0, %v664_v41 }
  0xf9   : > { %846 = vperm.xlu2 %5098, %v737_v42   ;;  %843 = vperm.xlu1 %5097, %v736_v44   ;;  %v669_v42 = vsel %vm605_vm5, 1.0, %v5172_v62  ;;  %v752_v44 = vld [vmem:[%s5430_s13 + $0x128] sm:$0xff]  ;;  %vm613_vm5 = vcmp.eq.s32.totalorder %v5356_v58, %v5415_v33 }
  0xfa   : > { %840 = vperm.xlu0 %5096, %v735_v47   ;;  %v751_v47 = vld [vmem:[%s5430_s13 + $0x120] sm:$0xff] }
  0xfb   : > { %v5544_v48 = vpop.permute.xlu1 %525  ;;  %v5576_v19 = vpop.permute.xlu2 %555 }
  0xfc   : > { %v5546_v49 = vpop.permute.xlu0 %522 }
  0xff   : > { %4809 = vmatmul.msk.f32.gmra.mxu0 %vm1107_vm0, %v665_v50  ;;  %v750_v50 = vld [vmem:[%s5430_s13 + $0x118] sm:$0xff] }
 0x101   : > { %855 = vperm.xlu2 %5098, %v740_v56   ;;  %852 = vperm.xlu1 %5097, %v739_v57  }
 0x102   : > { %849 = vperm.xlu0 %5096, %v738_v60  }
 0x103   : > { %v5555_v3 = vpop.permute.xlu1 %534  ;;  %v5592_v35 = vpop.permute.xlu2 %564 }
 0x104   : > { %v5557_v61 = vpop.permute.xlu0 %531 }
 0x107   : > { %4810 = vmatmul.msk.f32.gmra.mxu0 %vm1107_vm0, %v666_v2  ;;  %v670_v2 = vsel %vm606_vm6, 1.0, %v5172_v62 }
 0x109   : > { %864 = vperm.xlu2 %5098, %v743_v4   ;;  %861 = vperm.xlu1 %5097, %v742_v5   ;;  %v755_v4 = vld [vmem:[%s5430_s13 + $0x140] sm:$0xff]  ;;  %v754_v5 = vld [vmem:[%s5430_s13 + $0x138] sm:$0xff] }
 0x10a   : > { %858 = vperm.xlu0 %5096, %v741_v9   ;;  %v753_v9 = vld [vmem:[%s5430_s13 + $0x130] sm:$0xff] }
 0x10b   : > { %v5568_v32 = vpop.permute.xlu1 %543  ;;  %v5608_v39 = vpop.permute.xlu2 %573 }
 0x10c   : > { %v1317_v11 = vpop.f32.mrf.mxu0  ;;  %v5570_v12 = vpop.permute.xlu0 %540 }
 0x10d   : > { %4987 = vmatmul.msk.f32.vlgmr.msra.gmra.mxu3 %vm1918_vm2, %v1317_v11 }
 0x10f   : > { %4811 = vmatmul.msk.f32.gmra.mxu0 %vm1107_vm0, %v667_v13 }
 0x111   : > { %873 = vperm.xlu2 %5098, %v746_v16   ;;  %870 = vperm.xlu1 %5097, %v745_v18   ;;  %v671_v18 = vsel %vm607_vm7, 1.0, %v5172_v62  ;;  %vm614_vm7 = vcmp.eq.s32.totalorder %v5356_v58, %v5471_v0 }
 0x112   : > { %867 = vperm.xlu0 %5096, %v744_v20   ;;  %v758_v20 = vld [vmem:[%s5430_s13 + $0x158] sm:$0xff] }
 0x113   : > { %v5582_v31 = vpop.permute.xlu1 %552  ;;  %v5626_v16 = vpop.permute.xlu2 %582 }
 0x114   : > { %v1320_v59 = vpop.f32.mrf.mxu0  ;;  %v5584_v22 = vpop.permute.xlu0 %549 }
 0x115   : > { %4988 = vmatmul.msk.f32.gmra.mxu3 %vm1918_vm2, %v1320_v59  ;;  %v757_v59 = vld [vmem:[%s5430_s13 + $0x150] sm:$0xff] }
 0x117   : > { %4812 = vmatmul.msk.f32.gmra.mxu0 %vm1107_vm0, %v668_v23  ;;  %v756_v23 = vld [vmem:[%s5430_s13 + $0x148] sm:$0xff] }
 0x119   : > { %882 = vperm.xlu2 %5098, %v749_v27   ;;  %879 = vperm.xlu1 %5097, %v748_v30  }
 0x11a   : > { %876 = vperm.xlu0 %5096, %v747_v34  }
 0x11b   : > { %v5596_v10 = vpop.permute.xlu1 %561 }
 0x11c   : > { %v1323_v36 = vpop.f32.mrf.mxu0  ;;  %v5598_v41 = vpop.permute.xlu0 %558 }
 0x11d   : > { %4989 = vmatmul.msk.f32.gmra.mxu3 %vm1918_vm2, %v1323_v36  ;;  %v672_v36 = vsel %vm608_vm8, 1.0, %v5172_v62 }
 0x11f   : > { %4813 = vmatmul.msk.f32.gmra.mxu0 %vm1107_vm0, %v669_v42  ;;  %v761_v42 = vld [vmem:[%s5430_s13 + $0x170] sm:$0xff] }
 0x121   : > { %891 = vperm.xlu2 %5098, %v752_v44   ;;  %888 = vperm.xlu1 %5097, %v751_v47   ;;  %v760_v44 = vld [vmem:[%s5430_s13 + $0x168] sm:$0xff]  ;;  %v784_v47 = vpop.permute.xlu2 %783 }
 0x122   : > { %885 = vperm.xlu0 %5096, %v750_v50   ;;  %vm972_vm10 = vcmp.eq.s32.totalorder %v5356_v58, %v784_v47 }
 0x123   : > { %v5610_v56 = vpop.permute.xlu1 %570 }
 0x124   : > { %v1326_v57 = vpop.f32.mrf.mxu0  ;;  %v5612_v60 = vpop.permute.xlu0 %567 }
 0x125   : > { %4990 = vmatmul.msk.f32.gmra.mxu3 %vm1918_vm2, %v1326_v57  ;;  %v1036_v57 = vsel %vm972_vm10, 1.0, %v5172_v62 }
 0x127   : > { %4814 = vmatmul.msk.f32.gmra.mxu0 %vm1107_vm0, %v670_v2  ;;  %v673_v2 = vsel %vm609_vm11, 1.0, %v5172_v62  ;;  %vm616_vm11 = vcmp.eq.s32.totalorder %v5356_v58, %v5437_v43 }
 0x129   : > { %900 = vperm.xlu2 %5098, %v755_v4   ;;  %897 = vperm.xlu1 %5097, %v754_v5   ;;  %v764_v4 = vld [vmem:[%s5430_s13 + $0x188] sm:$0xff]  ;;  %v763_v5 = vld [vmem:[%s5430_s13 + $0x180] sm:$0xff]  ;;  %v793_v47 = vpop.permute.xlu2 %792 }
 0x12a   : > { %894 = vperm.xlu0 %5096, %v753_v9   ;;  %vm975_vm1 = vcmp.eq.s32.totalorder %v5356_v58, %v793_v47 }
 0x12b   : > { %v5622_v38 = vpop.permute.xlu1 %579 }
 0x12c   : > { %v1329_v11 = vpop.f32.mrf.mxu0  ;;  %v5624_v13 = vpop.permute.xlu0 %576 }
 0x12d   : > { %4991 = vmatmul.msk.f32.gmra.mxu3 %vm1918_vm2, %v1329_v11  ;;  %v762_v11 = vld [vmem:[%s5430_s13 + $0x178] sm:$0xff] }
 0x12f   : > { %4815 = vmatmul.msk.f32.gmra.mxu0 %vm1107_vm0, %v671_v18 }
 0x131   : > { %909 = vperm.xlu2 %5098, %v758_v20   ;;  %906 = vperm.xlu1 %5097, %v757_v59   ;;  %v674_v20 = vsel %vm610_vm13, 1.0, %v5172_v62  ;;  %v767_v59 = vld [vmem:[%s5430_s13 + $0x1a0] sm:$0xff]  ;;  %vm617_vm13 = vcmp.eq.s32.totalorder %v5356_v58, %v5482_v7 }
 0x132   : > { %903 = vperm.xlu0 %5096, %v756_v23   ;;  %v766_v23 = vld [vmem:[%s5430_s13 + $0x198] sm:$0xff] }
 0x133   : > { %v781_v17 = vpop.permute.xlu1 %780 }
 0x134   : > { %vm971_vm9 = vcmp.eq.s32.totalorder %v5356_v58, %v781_v17  ;;  %v1332_v27 = vpop.f32.mrf.mxu0  ;;  %v5637_v30 = vpop.permute.xlu0 %585 }
 0x135   : > { %4992 = vmatmul.msk.f32.gmra.mxu3 %vm1918_vm2, %v1332_v27  ;;  %v1035_v34 = vsel %vm971_vm9, 1.0, %v5172_v62  ;;  %v765_v27 = vld [vmem:[%s5430_s13 + $0x190] sm:$0xff]  ;;  %vm615_vm9 = vcmp.eq.s32.totalorder %v5356_v58, %v5469_v63 }
 0x136   : > { %4859 = vmatmul.msk.f32.vlgmr.msra.gmra.mxu1 %vm1107_vm0, %v1035_v34 }
 0x137   : > { %4816 = vmatmul.msk.f32.gmra.mxu0 %vm1107_vm0, %v672_v36  ;;  %v675_v36 = vsel %vm611_vm15, 1.0, %v5172_v62  ;;  %vm618_vm15 = vcmp.eq.s32.totalorder %v5356_v58, %v5480_v6 }
 0x139   : > { %918 = vperm.xlu2 %5098, %v761_v42   ;;  %915 = vperm.xlu1 %5097, %v760_v44   ;;  %v770_v42 = vld [vmem:[%s5430_s13 + $0x1b8] sm:$0xff]  ;;  %v769_v44 = vld [vmem:[%s5430_s13 + $0x1b0] sm:$0xff] }
 0x13a   : > { %912 = vperm.xlu0 %5096, %v759_v46   ;;  %v768_v46 = vld [vmem:[%s5430_s13 + $0x1a8] sm:$0xff] }
 0x13b   : > { %v790_v17 = vpop.permute.xlu1 %789 }
 0x13c   : > { %v1335_v50 = vpop.f32.mrf.mxu0  ;;  %v787_v9 = vpop.permute.xlu0 %786  ;;  %vm974_vm14 = vcmp.eq.s32.totalorder %v5356_v58, %v790_v17 }
 0x13d   : > { %4993 = vmatmul.msk.f32.gmra.mxu3 %vm1918_vm2, %v1335_v50  ;;  %vm973_vm12 = vcmp.eq.s32.totalorder %v5356_v58, %v787_v9  ;;  %v1038_v34 = vsel %vm974_vm14, 1.0, %v5172_v62  ;;  %v1039_v50 = vsel %vm975_vm1, 1.0, %v5172_v62  ;;  %v771_v9 = vld [vmem:[%s5430_s13 + $0x1c0] sm:$0xff] }
 0x13e   : > { %4860 = vmatmul.msk.f32.gmra.mxu1 %vm1107_vm0, %v1036_v57  ;;  %v1037_v18 = vsel %vm973_vm12, 1.0, %v5172_v62  ;;  %v676_v57 = vsel %vm612_vm3, 1.0, %v5172_v62  ;;  %vm619_vm3 = vcmp.eq.s32.totalorder %v5356_v58, %v5452_v51  ;;  %v1916_v51 = vld [vmem:[%s7056_s4 + $0x10] sm:$0xff] }
 0x13f   : > { %4817 = vmatmul.msk.f32.gmra.mxu0 %vm1107_vm0, %v673_v2  ;;  %v773_v2 = vld [vmem:[%s5430_s13 + $0x1d0] sm:$0xff] }
 0x141   : > { %927 = vperm.xlu2 %5098, %v764_v4   ;;  %924 = vperm.xlu1 %5097, %v763_v5   ;;  %v772_v4 = vld [vmem:[%s5430_s13 + $0x1c8] sm:$0xff] }
 0x142   : > { %921 = vperm.xlu0 %5096, %v762_v11  }
 0x144   : > { %v1338_v45 = vpop.f32.mrf.mxu0  ;;  %v796_v5 = vpop.permute.xlu0 %795 }
 0x145   : > { %4994 = vmatmul.msk.f32.gmra.mxu3 %vm1918_vm2, %v1338_v45  ;;  %vm976_vm4 = vcmp.eq.s32.totalorder %v5356_v58, %v796_v5  ;;  %v677_v45 = vsel %vm613_vm5, 1.0, %v5172_v62  ;;  %vm620_vm5 = vcmp.eq.s32.totalorder %v5356_v58, %v5495_v15 }
 0x146   : > { %4861 = vmatmul.msk.f32.gmra.mxu1 %vm1107_vm0, %v1037_v18  ;;  %v1040_v11 = vsel %vm976_vm4, 1.0, %v5172_v62  ;;  %v776_v18 = vld [vmem:[%s5430_s13 + $0x1e8] sm:$0xff] }
 0x147   : > { %4818 = vmatmul.msk.f32.gmra.mxu0 %vm1107_vm0, %v674_v20  ;;  %v775_v20 = vld [vmem:[%s5430_s13 + $0x1e0] sm:$0xff] }
 0x149   : > { %936 = vperm.xlu2 %5098, %v767_v59   ;;  %933 = vperm.xlu1 %5097, %v766_v23   ;;  %v799_v59 = vpop.permute.xlu1 %798  ;;  %v774_v23 = vld [vmem:[%s5430_s13 + $0x1d8] sm:$0xff] }
 0x14a   : > { %930 = vperm.xlu0 %5096, %v765_v27   ;;  %vm977_vm6 = vcmp.eq.s32.totalorder %v5356_v58, %v799_v59  ;;  %v678_v27 = vsel %vm614_vm7, 1.0, %v5172_v62  ;;  %vm621_vm7 = vcmp.eq.s32.totalorder %v5356_v58, %v5493_v14 }
 0x14b   : > { %v1041_v17 = vsel %vm977_vm6, 1.0, %v5172_v62 }
 0x14c   : > { %v1341_v24 = vpop.f32.mrf.mxu0  ;;  %v805_v47 = vpop.permute.xlu0 %804 }
 0x14d   : > { %4995 = vmatmul.msk.f32.gmra.mxu3 %vm1918_vm2, %v1341_v24  ;;  %v778_v24 = vld [vmem:[%s5430_s13 + $0x1f8] sm:$0xff]  ;;  %vm979_vm10 = vcmp.eq.s32.totalorder %v5356_v58, %v805_v47 }
 0x14e   : > { %4862 = vmatmul.msk.f32.gmra.mxu1 %vm1107_vm0, %v1038_v34  ;;  %v802_v34 = vpop.permute.xlu2 %801  ;;  %v1043_v63 = vsel %vm979_vm10, 1.0, %v5172_v62 }
 0x14f   : > { %4819 = vmatmul.msk.f32.gmra.mxu0 %vm1107_vm0, %v675_v36  ;;  %v777_v36 = vld [vmem:[%s5430_s13 + $0x1f0] sm:$0xff]  ;;  %vm978_vm8 = vcmp.eq.s32.totalorder %v5356_v58, %v802_v34  ;;  %s4700_s13 = scalar_lea.sflag [#allocation4], %s314_s21 }
 0x151   : > { %945 = vperm.xlu2 %5098, %v770_v42   ;;  %942 = vperm.xlu1 %5097, %v769_v44   ;;  %v1042_v42 = vsel %vm978_vm8, 1.0, %v5172_v62  ;;  %v679_v44 = vsel %vm615_vm9, 1.0, %v5172_v62  ;;  %vm622_vm9 = vcmp.eq.s32.totalorder %v5356_v58, %v5467_v53 }
 0x152   : > { %939 = vperm.xlu0 %5096, %v768_v46  }
 0x154   : > { %v1344_v55 = vpop.f32.mrf.mxu0 }
 0x155   : > { %4996 = vmatmul.msk.f32.gmra.mxu3 %vm1918_vm2, %v1344_v55  ;;  %v680_v55 = vsel %vm616_vm11, 1.0, %v5172_v62  ;;  %vm623_vm11 = vcmp.eq.s32.totalorder %v5356_v58, %v5520_v29 }
 0x156   : > { %4863 = vmatmul.msk.f32.gmra.mxu1 %vm1107_vm0, %v1039_v50  ;;  %v808_v50 = vpop.permute.xlu1 %807 }
 0x157   : > { %4820 = vmatmul.msk.f32.gmra.mxu0 %vm1107_vm0, %v676_v57  ;;  %vm980_vm12 = vcmp.eq.s32.totalorder %v5356_v58, %v808_v50 }
 0x158   : > { %v1044_v43 = vsel %vm980_vm12, 1.0, %v5172_v62 }
 0x159   : > { %954 = vperm.xlu2 %5098, %v773_v2   ;;  %951 = vperm.xlu1 %5097, %v772_v4   ;;  %v681_v2 = vsel %vm617_vm13, 1.0, %v5172_v62  ;;  %v811_v4 = vpop.permute.xlu2 %810  ;;  %vm624_vm13 = vcmp.eq.s32.totalorder %v5356_v58, %v5518_v28 }
 0x15a   : > { %948 = vperm.xlu0 %5096, %v771_v9   ;;  %vm981_vm14 = vcmp.eq.s32.totalorder %v5356_v58, %v811_v4  ;;  %v682_v9 = vsel %vm618_vm15, 1.0, %v5172_v62  ;;  %vm625_vm15 = vcmp.eq.s32.totalorder %v5356_v58, %v5484_v8 }
 0x15b   : > { %v1045_v7 = vsel %vm981_vm14, 1.0, %v5172_v62 }
 0x15c   : > { %v1347_v52 = vpop.f32.mrf.mxu0 }
 0x15d   : > { %4997 = vmatmul.msk.f32.gmra.mxu3 %vm1918_vm2, %v1347_v52  ;;  %v814_v52 = vpop.permute.xlu0 %813 }
 0x15e   : > { %4864 = vmatmul.msk.f32.gmra.mxu1 %vm1107_vm0, %v1040_v11  ;;  %vm982_vm1 = vcmp.eq.s32.totalorder %v5356_v58, %v814_v52 }
 0x15f   : > { %4821 = vmatmul.msk.f32.gmra.mxu0 %vm1107_vm0, %v677_v45  ;;  %v1046_v6 = vsel %vm982_vm1, 1.0, %v5172_v62  ;;  %v1917_v45 = vld [vmem:[%s7056_s4 + $0x18] sm:$0xff] }
 0x160   : > { %2123 = vmatpush.msra.mxu2 %v1917_v45 }
 0x161   : > { %963 = vperm.xlu2 %5098, %v776_v18   ;;  %960 = vperm.xlu1 %5097, %v775_v20   ;;  %v683_v18 = vsel %vm619_vm3, 1.0, %v5172_v62  ;;  %v817_v20 = vpop.permute.xlu1 %816  ;;  %v820_v34 = vpop.permute.xlu2 %819  ;;  %vm626_vm3 = vcmp.eq.s32.totalorder %v5356_v58, %v5533_v40 }
 0x162   : > { %957 = vperm.xlu0 %5096, %v774_v23   ;;  %2124 = vmatpush.msra.mxu2 %v1916_v51  ;;  %v1915_v23 = vld [vmem:[%s7056_s4 + $0x8] sm:$0xff]  ;;  %vm983_vm4 = vcmp.eq.s32.totalorder %v5356_v58, %v817_v20  ;;  %vm984_vm6 = vcmp.eq.s32.totalorder %v5356_v58, %v820_v34 }
 0x164   : > { %v1350_v33 = vpop.f32.mrf.mxu0  ;;  %2125 = vmatpush.msra.mxu2 %v1915_v23 }
 0x165   : > { %4998 = vmatmul.msk.f32.gmra.mxu3 %vm1918_vm2, %v1350_v33  ;;  %v1914_v33 = vld [vmem:[%s7056_s4] sm:$0xff] }
 0x166   : > { %4865 = vmatmul.msk.f32.gmra.mxu1 %vm1107_vm0, %v1041_v17  ;;  %2126 = vmatpush.msra.mxu2 %v1914_v33  ;;  %v690_v33 = vsel %vm626_vm3, 1.0, %v5172_v62  ;;  %vm633_vm3 = vcmp.eq.s32.totalorder %v5356_v58, %v5555_v3 }
 0x167   : > { %4822 = vmatmul.msk.f32.gmra.mxu0 %vm1107_vm0, %v678_v27  ;;  %v1047_v27 = vsel %vm983_vm4, 1.0, %v5172_v62 }
 0x169   : > { %969 = vperm.xlu2 %5098, %v778_v24   ;;  %v684_v24 = vsel %vm620_vm5, 1.0, %v5172_v62  ;;  %vm627_vm5 = vcmp.eq.s32.totalorder %v5356_v58, %v5531_v26 }
 0x16a   : > { %966 = vperm.xlu0 %5096, %v777_v36  }
 0x16c   : > { %v1353_v0 = vpop.f32.mrf.mxu0 }
 0x16d   : > { %4999 = vmatmul.msk.f32.gmra.mxu3 %vm1918_vm2, %v1353_v0  ;;  %v1048_v0 = vsel %vm984_vm6, 1.0, %v5172_v62 }
 0x16e   : > { %4866 = vmatmul.msk.f32.gmra.mxu1 %vm1107_vm0, %v1042_v42  ;;  %v685_v42 = vsel %vm621_vm7, 1.0, %v5172_v62  ;;  %vm628_vm7 = vcmp.eq.s32.totalorder %v5356_v58, %v5503_v21 }
 0x16f   : > { %4823 = vmatmul.msk.f32.gmra.mxu0 %vm1107_vm0, %v679_v44  ;;  %v823_v44 = vpop.permute.xlu0 %822 }
 0x170   : > { %vm985_vm8 = vcmp.eq.s32.totalorder %v5356_v58, %v823_v44 }
 0x174   : > { %v1356_v46 = vpop.f32.mrf.mxu0 }
 0x175   : > { %5000 = vmatmul.msk.f32.gmra.mxu3 %vm1918_vm2, %v1356_v46  ;;  %v1049_v46 = vsel %vm985_vm8, 1.0, %v5172_v62 }
 0x176   : > { %4867 = vmatmul.msk.f32.gmra.mxu1 %vm1107_vm0, %v1043_v63  ;;  %v686_v63 = vsel %vm622_vm9, 1.0, %v5172_v62  ;;  %vm629_vm9 = vcmp.eq.s32.totalorder %v5356_v58, %v5546_v49 }
 0x177   : > { %4824 = vmatmul.msk.f32.gmra.mxu0 %vm1107_vm0, %v680_v55  ;;  %v826_v55 = vpop.permute.xlu1 %825  ;;  %v832_v52 = vpop.permute.xlu0 %831 }
 0x178   : > { %vm986_vm10 = vcmp.eq.s32.totalorder %v5356_v58, %v826_v55  ;;  %vm988_vm14 = vcmp.eq.s32.totalorder %v5356_v58, %v832_v52 }
 0x179   : > { %v1052_v45 = vsel %vm988_vm14, 1.0, %v5172_v62 }
 0x17c   : > { %v1359_v57 = vpop.f32.mrf.mxu0 }
 0x17d   : > { %5001 = vmatmul.msk.f32.gmra.mxu3 %vm1918_vm2, %v1359_v57  ;;  %v1050_v57 = vsel %vm986_vm10, 1.0, %v5172_v62 }
 0x17e   : > { %4868 = vmatmul.msk.f32.gmra.mxu1 %vm1107_vm0, %v1044_v43  ;;  %v687_v43 = vsel %vm623_vm11, 1.0, %v5172_v62  ;;  %vm630_vm11 = vcmp.eq.s32.totalorder %v5356_v58, %v5544_v48 }
 0x17f   : > { %4825 = vmatmul.msk.f32.gmra.mxu0 %vm1107_vm0, %v681_v2  ;;  %v829_v2 = vpop.permute.xlu2 %828  ;;  %v835_v20 = vpop.permute.xlu1 %834 }
 0x180   : > { %vm987_vm12 = vcmp.eq.s32.totalorder %v5356_v58, %v829_v2  ;;  %vm989_vm1 = vcmp.eq.s32.totalorder %v5356_v58, %v835_v20 }
 0x181   : > { %v1053_v23 = vsel %vm989_vm1, 1.0, %v5172_v62 }
 0x184   : > { %v1362_v5 = vpop.f32.mrf.mxu0 }
 0x185   : > { %5002 = vmatmul.msk.f32.gmra.mxu3 %vm1918_vm2, %v1362_v5 }
 0x186   : > { %4869 = vmatmul.msk.f32.gmra.mxu1 %vm1107_vm0, %v1045_v7  ;;  %v1051_v7 = vsel %vm987_vm12, 1.0, %v5172_v62 }
 0x187   : > { %4826 = vmatmul.msk.f32.gmra.mxu0 %vm1107_vm0, %v682_v9  ;;  %v688_v9 = vsel %vm624_vm13, 1.0, %v5172_v62  ;;  %vm631_vm13 = vcmp.eq.s32.totalorder %v5356_v58, %v5527_v37 }
 0x18c   : > { %v1365_v11 = vpop.f32.mrf.mxu0 }
 0x18d   : > { %5003 = vmatmul.msk.f32.gmra.mxu3 %vm1918_vm2, %v1365_v11 }
 0x18e   : > { %4870 = vmatmul.msk.f32.gmra.mxu1 %vm1107_vm0, %v1046_v6 }
 0x18f   : > { %4827 = vmatmul.msk.f32.gmra.mxu0 %vm1107_vm0, %v683_v18  ;;  %v689_v18 = vsel %vm625_vm15, 1.0, %v5172_v62  ;;  %vm632_vm15 = vcmp.eq.s32.totalorder %v5356_v58, %v5557_v61 }
 0x190   : > { %v5758_v59 = vpop.f32.mrf.mxu3 }
 0x194   : > { %v1368_v17 = vpop.f32.mrf.mxu0 }
 0x195   : > { %5004 = vmatmul.msk.f32.gmra.mxu3 %vm1918_vm2, %v1368_v17  ;;  %v838_v17 = vpop.permute.xlu2 %837 }
 0x196   : > { %4871 = vmatmul.msk.f32.gmra.mxu1 %vm1107_vm0, %v1047_v27  ;;  %vm990_vm4 = vcmp.eq.s32.totalorder %v5356_v58, %v838_v17 }
 0x197   : > { %4828 = vmatmul.msk.f32.gmra.mxu0 %vm1107_vm0, %v684_v24  ;;  %v1054_v34 = vsel %vm990_vm4, 1.0, %v5172_v62 }
 0x198   : > { %v5774_v36 = vpop.f32.mrf.mxu3 }
 0x19c   : > { %v1371_v15 = vpop.f32.mrf.mxu0 }
 0x19d   : > { %5005 = vmatmul.msk.f32.gmra.mxu3 %vm1918_vm2, %v1371_v15  ;;  %v691_v15 = vsel %vm627_vm5, 1.0, %v5172_v62  ;;  %v847_v2 = vpop.permute.xlu2 %846  ;;  %vm634_vm5 = vcmp.eq.s32.totalorder %v5356_v58, %v5542_v25 }
 0x19e   : > { %4872 = vmatmul.msk.f32.gmra.mxu1 %vm1107_vm0, %v1048_v0  ;;  %v841_v0 = vpop.permute.xlu0 %840  ;;  %vm993_vm10 = vcmp.eq.s32.totalorder %v5356_v58, %v847_v2 }
 0x19f   : > { %4829 = vmatmul.msk.f32.gmra.mxu0 %vm1107_vm0, %v685_v42  ;;  %vm991_vm6 = vcmp.eq.s32.totalorder %v5356_v58, %v841_v0 }
 0x1a0   : > { %v5784_v47 = vpop.f32.mrf.mxu3 }
 0x1a4   : > { %v1374_v14 = vpop.f32.mrf.mxu0 }
 0x1a5   : > { %5006 = vmatmul.msk.f32.gmra.mxu3 %vm1918_vm2, %v1374_v14  ;;  %v1055_v14 = vsel %vm991_vm6, 1.0, %v5172_v62 }
 0x1a6   : > { %4873 = vmatmul.msk.f32.gmra.mxu1 %vm1107_vm0, %v1049_v46  ;;  %v692_v46 = vsel %vm628_vm7, 1.0, %v5172_v62  ;;  %v850_v52 = vpop.permute.xlu0 %849  ;;  %vm635_vm7 = vcmp.eq.s32.totalorder %v5356_v58, %v5570_v12 }
 0x1a7   : > { %4830 = vmatmul.msk.f32.gmra.mxu0 %vm1107_vm0, %v686_v63  ;;  %v844_v63 = vpop.permute.xlu1 %843  ;;  %vm994_vm12 = vcmp.eq.s32.totalorder %v5356_v58, %v850_v52 }
 0x1a8   : > { %v5794_v50 = vpop.f32.mrf.mxu3  ;;  %vm992_vm8 = vcmp.eq.s32.totalorder %v5356_v58, %v844_v63 }
 0x1ac   : > { %v1377_v53 = vpop.f32.mrf.mxu0 }
 0x1ad   : > { %5007 = vmatmul.msk.f32.gmra.mxu3 %vm1918_vm2, %v1377_v53 }
 0x1ae   : > { %4874 = vmatmul.msk.f32.gmra.mxu1 %vm1107_vm0, %v1050_v57  ;;  %v1056_v57 = vsel %vm992_vm8, 1.0, %v5172_v62 }
 0x1af   : > { %4831 = vmatmul.msk.f32.gmra.mxu0 %vm1107_vm0, %v687_v43  ;;  %v693_v43 = vsel %vm629_vm9, 1.0, %v5172_v62  ;;  %vm636_vm9 = vcmp.eq.s32.totalorder %v5356_v58, %v5568_v32 }
 0x1b0   : > { %v5807_v4 = vpop.f32.mrf.mxu3 }
 0x1b3   : > { %v1718_v29 = vpop.f32.mrf.mxu1 }
 0x1b4   : > { %v1380_v5 = vpop.f32.mrf.mxu0  ;;  %4923 = vmatmul.msk.f32.vlgmr.msra.gmra.mxu2 %vm1918_vm2, %v1718_v29 }
 0x1b5   : > { %5008 = vmatmul.msk.f32.gmra.mxu3 %vm1918_vm2, %v1380_v5 }
 0x1b6   : > { %4875 = vmatmul.msk.f32.gmra.mxu1 %vm1107_vm0, %v1051_v7  ;;  %v1057_v7 = vsel %vm993_vm10, 1.0, %v5172_v62 }
 0x1b7   : > { %4832 = vmatmul.msk.f32.gmra.mxu0 %vm1107_vm0, %v688_v9  ;;  %v694_v9 = vsel %vm630_vm11, 1.0, %v5172_v62  ;;  %vm637_vm11 = vcmp.eq.s32.totalorder %v5356_v58, %v5559_v1 }
 0x1b8   : > { %v5819_v6 = vpop.f32.mrf.mxu3 }
 0x1bb   : > { %v1721_v28 = vpop.f32.mrf.mxu1 }
 0x1bc   : > { %v1383_v11 = vpop.f32.mrf.mxu0  ;;  %4924 = vmatmul.msk.f32.gmra.mxu2 %vm1918_vm2, %v1721_v28 }
 0x1bd   : > { %5009 = vmatmul.msk.f32.gmra.mxu3 %vm1918_vm2, %v1383_v11  ;;  %v1058_v11 = vsel %vm994_vm12, 1.0, %v5172_v62 }
 0x1be   : > { %4876 = vmatmul.msk.f32.gmra.mxu1 %vm1107_vm0, %v1052_v45  ;;  %v695_v45 = vsel %vm631_vm13, 1.0, %v5172_v62  ;;  %vm638_vm13 = vcmp.eq.s32.totalorder %v5356_v58, %v5584_v22 }
 0x1bf   : > { %4833 = vmatmul.msk.f32.gmra.mxu0 %vm1107_vm0, %v689_v18  ;;  %v853_v18 = vpop.permute.xlu1 %852 }
 0x1c0   : > { %v5834_v27 = vpop.f32.mrf.mxu3  ;;  %vm995_vm14 = vcmp.eq.s32.totalorder %v5356_v58, %v853_v18 }
 0x1c3   : > { %v1724_v8 = vpop.f32.mrf.mxu1 }
 0x1c4   : > { %v1386_v51 = vpop.f32.mrf.mxu0  ;;  %4925 = vmatmul.msk.f32.gmra.mxu2 %vm1918_vm2, %v1724_v8 }
 0x1c5   : > { %5010 = vmatmul.msk.f32.gmra.mxu3 %vm1918_vm2, %v1386_v51  ;;  %v1059_v51 = vsel %vm995_vm14, 1.0, %v5172_v62 }
 0x1c6   : > { %4877 = vmatmul.msk.f32.gmra.mxu1 %vm1107_vm0, %v1053_v23  ;;  %v696_v23 = vsel %vm632_vm15, 1.0, %v5172_v62  ;;  %vm639_vm15 = vcmp.eq.s32.totalorder %v5356_v58, %v5582_v31 }
 0x1c7   : > { %4834 = vmatmul.msk.f32.gmra.mxu0 %vm1107_vm0, %v690_v33  ;;  %v856_v33 = vpop.permute.xlu2 %855 }
 0x1c8   : > { %v5846_v42 = vpop.f32.mrf.mxu3  ;;  %vm996_vm1 = vcmp.eq.s32.totalorder %v5356_v58, %v856_v33 }
 0x1cb   : > { %v1727_v40 = vpop.f32.mrf.mxu1 }
 0x1cc   : > { %v1389_v24 = vpop.f32.mrf.mxu0  ;;  %4926 = vmatmul.msk.f32.gmra.mxu2 %vm1918_vm2, %v1727_v40 }
 0x1cd   : > { %5011 = vmatmul.msk.f32.gmra.mxu3 %vm1918_vm2, %v1389_v24  ;;  %v1060_v24 = vsel %vm996_vm1, 1.0, %v5172_v62 }
 0x1ce   : > { %4878 = vmatmul.msk.f32.gmra.mxu1 %vm1107_vm0, %v1054_v34  ;;  %v697_v34 = vsel %vm633_vm3, 1.0, %v5172_v62  ;;  %vm640_vm3 = vcmp.eq.s32.totalorder %v5356_v58, %v5576_v19 }
 0x1cf   : > { %4835 = vmatmul.msk.f32.gmra.mxu0 %vm1107_vm0, %v691_v15  ;;  %v859_v15 = vpop.permute.xlu0 %858 }
 0x1d0   : > { %v5860_v21 = vpop.f32.mrf.mxu3  ;;  %vm997_vm4 = vcmp.eq.s32.totalorder %v5356_v58, %v859_v15 }
 0x1d3   : > { %v1730_v26 = vpop.f32.mrf.mxu1 }
 0x1d4   : > { %v1392_v44 = vpop.f32.mrf.mxu0  ;;  %4927 = vmatmul.msk.f32.gmra.mxu2 %vm1918_vm2, %v1730_v26 }
 0x1d5   : > { %5012 = vmatmul.msk.f32.gmra.mxu3 %vm1918_vm2, %v1392_v44  ;;  %v1061_v44 = vsel %vm997_vm4, 1.0, %v5172_v62 }
 0x1d6   : > { %4879 = vmatmul.msk.f32.gmra.mxu1 %vm1107_vm0, %v1055_v14  ;;  %v698_v14 = vsel %vm634_vm5, 1.0, %v5172_v62  ;;  %vm641_vm5 = vcmp.eq.s32.totalorder %v5356_v58, %v5598_v41 }
 0x1d7   : > { %4836 = vmatmul.msk.f32.gmra.mxu0 %vm1107_vm0, %v692_v46  ;;  %v862_v46 = vpop.permute.xlu1 %861 }
 0x1d8   : > { %v5872_v5 = vpop.f32.mrf.mxu3  ;;  %vm998_vm6 = vcmp.eq.s32.totalorder %v5356_v58, %v862_v46 }
 0x1db   : > { %v1733_v55 = vpop.f32.mrf.mxu1 }
 0x1dc   : > { %v1395_v53 = vpop.f32.mrf.mxu0  ;;  %4928 = vmatmul.msk.f32.gmra.mxu2 %vm1918_vm2, %v1733_v55  ;;  %v1062_v55 = vsel %vm998_vm6, 1.0, %v5172_v62 }
 0x1dd   : > { %5013 = vmatmul.msk.f32.gmra.mxu3 %vm1918_vm2, %v1395_v53 }
 0x1de   : > { %4880 = vmatmul.msk.f32.gmra.mxu1 %vm1107_vm0, %v1056_v57  ;;  %v699_v57 = vsel %vm635_vm7, 1.0, %v5172_v62  ;;  %vm642_vm7 = vcmp.eq.s32.totalorder %v5356_v58, %v5596_v10 }
 0x1df   : > { %4837 = vmatmul.msk.f32.gmra.mxu0 %vm1107_vm0, %v693_v43  ;;  %v865_v43 = vpop.permute.xlu2 %864 }
 0x1e0   : > { %v5887_v20 = vpop.f32.mrf.mxu3  ;;  %vm999_vm8 = vcmp.eq.s32.totalorder %v5356_v58, %v865_v43 }
 0x1e3   : > { %v1736_v49 = vpop.f32.mrf.mxu1 }
 0x1e4   : > { %v1398_v29 = vpop.f32.mrf.mxu0  ;;  %4929 = vmatmul.msk.f32.gmra.mxu2 %vm1918_vm2, %v1736_v49  ;;  %v1063_v49 = vsel %vm999_vm8, 1.0, %v5172_v62 }
 0x1e5   : > { %5014 = vmatmul.msk.f32.gmra.mxu3 %vm1918_vm2, %v1398_v29  ;;  %v700_v29 = vsel %vm636_vm9, 1.0, %v5172_v62  ;;  %vm643_vm9 = vcmp.eq.s32.totalorder %v5356_v58, %v5592_v35 }
 0x1e6   : > { %4881 = vmatmul.msk.f32.gmra.mxu1 %vm1107_vm0, %v1057_v7  ;;  %v868_v7 = vpop.permute.xlu0 %867 }
 0x1e7   : > { %4838 = vmatmul.msk.f32.gmra.mxu0 %vm1107_vm0, %v694_v9  ;;  %vm1000_vm10 = vcmp.eq.s32.totalorder %v5356_v58, %v868_v7 }
 0x1e8   : > { %v5899_v17 = vpop.f32.mrf.mxu3 }
 0x1eb   : > { %v1739_v48 = vpop.f32.mrf.mxu1 }
 0x1ec   : > { %v1401_v28 = vpop.f32.mrf.mxu0  ;;  %4930 = vmatmul.msk.f32.gmra.mxu2 %vm1918_vm2, %v1739_v48  ;;  %v1064_v48 = vsel %vm1000_vm10, 1.0, %v5172_v62 }
 0x1ed   : > { %5015 = vmatmul.msk.f32.gmra.mxu3 %vm1918_vm2, %v1401_v28  ;;  %v701_v28 = vsel %vm637_vm11, 1.0, %v5172_v62  ;;  %vm644_vm11 = vcmp.eq.s32.totalorder %v5356_v58, %v5612_v60 }
 0x1ee   : > { %4882 = vmatmul.msk.f32.gmra.mxu1 %vm1107_vm0, %v1058_v11  ;;  %v871_v11 = vpop.permute.xlu1 %870 }
 0x1ef   : > { %4839 = vmatmul.msk.f32.gmra.mxu0 %vm1107_vm0, %v695_v45  ;;  %vm1001_vm12 = vcmp.eq.s32.totalorder %v5356_v58, %v871_v11 }
 0x1f0   : > { %v5913_v3 = vpop.f32.mrf.mxu3 }
 0x1f3   : > { %v1742_v37 = vpop.f32.mrf.mxu1 }
 0x1f4   : > { %v1404_v8 = vpop.f32.mrf.mxu0  ;;  %4931 = vmatmul.msk.f32.gmra.mxu2 %vm1918_vm2, %v1742_v37  ;;  %v1065_v37 = vsel %vm1001_vm12, 1.0, %v5172_v62 }
 0x1f5   : > { %5016 = vmatmul.msk.f32.gmra.mxu3 %vm1918_vm2, %v1404_v8  ;;  %v702_v8 = vsel %vm638_vm13, 1.0, %v5172_v62  ;;  %vm645_vm13 = vcmp.eq.s32.totalorder %v5356_v58, %v5610_v56 }
 0x1f6   : > { %4883 = vmatmul.msk.f32.gmra.mxu1 %vm1107_vm0, %v1059_v51  ;;  %v874_v51 = vpop.permute.xlu2 %873  ;;  %v880_v19 = vpop.permute.xlu1 %879 }
 0x1f7   : > { %4840 = vmatmul.msk.f32.gmra.mxu0 %vm1107_vm0, %v696_v23  ;;  %vm1002_vm14 = vcmp.eq.s32.totalorder %v5356_v58, %v874_v51  ;;  %vm1004_vm4 = vcmp.eq.s32.totalorder %v5356_v58, %v880_v19 }
 0x1f8   : > { %v5926_v53 = vpop.f32.mrf.mxu3 }
 0x1fb   : > { %v1745_v61 = vpop.f32.mrf.mxu1 }
 0x1fc   : > { %v1407_v40 = vpop.f32.mrf.mxu0  ;;  %4932 = vmatmul.msk.f32.gmra.mxu2 %vm1918_vm2, %v1745_v61  ;;  %v1066_v61 = vsel %vm1002_vm14, 1.0, %v5172_v62 }
 0x1fd   : > { %5017 = vmatmul.msk.f32.gmra.mxu3 %vm1918_vm2, %v1407_v40  ;;  %v703_v40 = vsel %vm639_vm15, 1.0, %v5172_v62  ;;  %vm646_vm15 = vcmp.eq.s32.totalorder %v5356_v58, %v5608_v39 }
 0x1fe   : > { %4884 = vmatmul.msk.f32.gmra.mxu1 %vm1107_vm0, %v1060_v24  ;;  %v877_v24 = vpop.permute.xlu0 %876 }
 0x1ff   : > { %4841 = vmatmul.msk.f32.gmra.mxu0 %vm1107_vm0, %v697_v34  ;;  %vm1003_vm1 = vcmp.eq.s32.totalorder %v5356_v58, %v877_v24 }
 0x200   : > { %v5940_v9 = vpop.f32.mrf.mxu3  ;;  %v1067_v15 = vsel %vm1003_vm1, 1.0, %v5172_v62 }
 0x203   : > { %v1748_v0 = vpop.f32.mrf.mxu1 }
 0x204   : > { %v1410_v26 = vpop.f32.mrf.mxu0  ;;  %4933 = vmatmul.msk.f32.gmra.mxu2 %vm1918_vm2, %v1748_v0 }
 0x205   : > { %5018 = vmatmul.msk.f32.gmra.mxu3 %vm1918_vm2, %v1410_v26  ;;  %v704_v26 = vsel %vm640_vm3, 1.0, %v5172_v62  ;;  %vm647_vm3 = vcmp.eq.s32.totalorder %v5356_v58, %v5624_v13 }
 0x206   : > { %4885 = vmatmul.msk.f32.gmra.mxu1 %vm1107_vm0, %v1061_v44  ;;  %v5987_v44 = vld [vmem:[%s7057_s5] ss:$0 sm:$0xff] }
 0x207   : > { %4842 = vmatmul.msk.f32.gmra.mxu0 %vm1107_vm0, %v698_v14 }
 0x208   : > { %v5952_v45 = vpop.f32.mrf.mxu3 }
 0x20b   : > { %v1751_v25 = vpop.f32.mrf.mxu1 }
 0x20c   : > { %v1413_v63 = vpop.f32.mrf.mxu0  ;;  %4934 = vmatmul.msk.f32.gmra.mxu2 %vm1918_vm2, %v1751_v25 }
 0x20d   : > { %5019 = vmatmul.msk.f32.gmra.mxu3 %vm1918_vm2, %v1413_v63  ;;  %v5996_v63 = vld [vmem:[%s7058_s6] ss:$0 sm:$0xff] }
 0x20e   : > { %4886 = vmatmul.msk.f32.gmra.mxu1 %vm1107_vm0, %v1062_v55 }
 0x20f   : > { %4843 = vmatmul.msk.f32.gmra.mxu0 %vm1107_vm0, %v699_v57 }
 0x210   : > { %v5966_v22 = vpop.f32.mrf.mxu3 }
 0x213   : > { %v1754_v12 = vpop.f32.mrf.mxu1 }
 0x214   : > { %v1416_v2 = vpop.f32.mrf.mxu0  ;;  %4935 = vmatmul.msk.f32.gmra.mxu2 %vm1918_vm2, %v1754_v12  ;;  %v1068_v12 = vsel %vm1004_vm4, 1.0, %v5172_v62 }
 0x215   : > { %5020 = vmatmul.msk.f32.gmra.mxu3 %vm1918_vm2, %v1416_v2  ;;  %v883_v2 = vpop.permute.xlu2 %882 }
 0x216   : > { %4887 = vmatmul.msk.f32.gmra.mxu1 %vm1107_vm0, %v1063_v49  ;;  %vm1005_vm6 = vcmp.eq.s32.totalorder %v5356_v58, %v883_v2 }
 0x217   : > { %4844 = vmatmul.msk.f32.gmra.mxu0 %vm1107_vm0, %v700_v29 }
 0x218   : > { %v5979_v0 = vpop.f32.mrf.mxu3 }
 0x21b   : > { %v1757_v32 = vpop.f32.mrf.mxu1 }
 0x21c   : > { %v1419_v52 = vpop.f32.mrf.mxu0  ;;  %4936 = vmatmul.msk.f32.gmra.mxu2 %vm1918_vm2, %v1757_v32 }
 0x21d   : > { %5021 = vmatmul.msk.f32.gmra.mxu3 %vm1918_vm2, %v1419_v52 }
 0x21e   : > { %4888 = vmatmul.msk.f32.gmra.mxu1 %vm1107_vm0, %v1064_v48 }
 0x21f   : > { %4845 = vmatmul.msk.f32.gmra.mxu0 %vm1107_vm0, %v701_v28 }
 0x220   : > { %v6006_v29 = vpop.f32.mrf.mxu3 }
 0x223   : > { %v1760_v1 = vpop.f32.mrf.mxu1 }
 0x224   : > { %v1422_v18 = vpop.f32.mrf.mxu0  ;;  %4937 = vmatmul.msk.f32.gmra.mxu2 %vm1918_vm2, %v1760_v1  ;;  %v1069_v1 = vsel %vm1005_vm6, 1.0, %v5172_v62 }
 0x225   : > { %5022 = vmatmul.msk.f32.gmra.mxu3 %vm1918_vm2, %v1422_v18 }
 0x226   : > { %4889 = vmatmul.msk.f32.gmra.mxu1 %vm1107_vm0, %v1065_v37  ;;  %v886_v37 = vpop.permute.xlu0 %885 }
 0x227   : > { %4846 = vmatmul.msk.f32.gmra.mxu0 %vm1107_vm0, %v702_v8  ;;  %vm1006_vm8 = vcmp.eq.s32.totalorder %v5356_v58, %v886_v37 }
 0x22b   : > { %v1763_v23 = vpop.f32.mrf.mxu1 }
 0x22c   : > { %v1425_v33 = vpop.f32.mrf.mxu0  ;;  %4938 = vmatmul.msk.f32.gmra.mxu2 %vm1918_vm2, %v1763_v23  ;;  %v6024_v23 = vpop.f32.mrf.mxu3 }
 0x22d   : > { %5023 = vmatmul.msk.f32.gmra.mxu3 %vm1918_vm2, %v1425_v33 }
 0x22e   : > { %4890 = vmatmul.msk.f32.gmra.mxu1 %vm1107_vm0, %v1066_v61 }
 0x22f   : > { %4847 = vmatmul.msk.f32.gmra.mxu0 %vm1107_vm0, %v703_v40 }
 0x233   : > { %v1766_v31 = vpop.f32.mrf.mxu1 }
 0x234   : > { %v1428_v34 = vpop.f32.mrf.mxu0  ;;  %4939 = vmatmul.msk.f32.gmra.mxu2 %vm1918_vm2, %v1766_v31  ;;  %v1070_v31 = vsel %vm1006_vm8, 1.0, %v5172_v62 }
 0x235   : > { %5024 = vmatmul.msk.f32.gmra.mxu3 %vm1918_vm2, %v1428_v34 }
 0x236   : > { %4891 = vmatmul.msk.f32.gmra.mxu1 %vm1107_vm0, %v1067_v15  ;;  %v889_v15 = vpop.permute.xlu1 %888 }
 0x237   : > { %4848 = vmatmul.msk.f32.gmra.mxu0 %vm1107_vm0, %v704_v26  ;;  %v2128_v14 = vpop.f32.mrf.mxu2  ;;  %vm1007_vm10 = vcmp.eq.s32.totalorder %v5356_v58, %v889_v15 }
 0x238   : > { %v2530_v46 = vadd.f32 %v5758_v59, %v2128_v14  ;;  %v705_v59 = vsel %vm641_vm5, 1.0, %v5172_v62  ;;  %vm648_vm5 = vcmp.eq.s32.totalorder %v5356_v58, %v5622_v38 }
 0x23a   : > { %v2725_v25 = vadd.f32 %v5987_v44, %v2530_v46  ;;  %v6043_v46 = vpop.f32.mrf.mxu3 }
 0x23b   : > { %v1769_v55 = vpop.f32.mrf.mxu1 }
 0x23c   : > { %v2789_v57 = vmax.f32 %v2725_v25, 0.0  ;;  %v1431_v43 = vpop.f32.mrf.mxu0  ;;  %4940 = vmatmul.msk.f32.gmra.mxu2 %vm1918_vm2, %v1769_v55 }
 0x23d   : > { %5025 = vmatmul.msk.f32.gmra.mxu3 %vm1918_vm2, %v1431_v43  ;;  %v1071_v43 = vsel %vm1007_vm10, 1.0, %v5172_v62 }
 0x23e   : > { %4892 = vmatmul.msk.f32.gmra.mxu1 %vm1107_vm0, %v1068_v12  ;;  %v2857_v49 = vmul.f32 %v5996_v63, %v2789_v57 }
 0x23f   : > { %4849 = vmatmul.msk.f32.gmra.mxu0 %vm1107_vm0, %v705_v59  ;;  %v2131_v41 = vpop.f32.mrf.mxu2  ;;  %v892_v59 = vpop.permute.xlu2 %891 }
 0x240   : > { %v2533_v7 = vadd.f32 %v5774_v36, %v2131_v41  ;;  %v2921_v32 = vsel %vm1918_vm2, %v2857_v49, 0.0  ;;  %v706_v36 = vsel %vm642_vm7, 1.0, %v5172_v62  ;;  %vm1008_vm12 = vcmp.eq.s32.totalorder %v5356_v58, %v892_v59 }
 0x241   : > { %2922 = vadd.xlane.f32.xlu1 %v2921_v32  ;;  %vm649_vm7 = vcmp.eq.s32.totalorder %v5356_v58, %v5626_v16 }
 0x242   : > { %v2726_v52 = vadd.f32 %v5987_v44, %v2533_v7 }
 0x243   : > { %v1772_v48 = vpop.f32.mrf.mxu1 }
 0x244   : > { %v2790_v28 = vmax.f32 %v2726_v52, 0.0  ;;  %v1434_v11 = vpop.f32.mrf.mxu0  ;;  %4941 = vmatmul.msk.f32.gmra.mxu2 %vm1918_vm2, %v1772_v48  ;;  %v1072_v48 = vsel %vm1008_vm12, 1.0, %v5172_v62 }
 0x245   : > { %5026 = vmatmul.msk.f32.gmra.mxu3 %vm1918_vm2, %v1434_v11 }
 0x246   : > { %4893 = vmatmul.msk.f32.gmra.mxu1 %vm1107_vm0, %v1069_v1  ;;  %v2858_v18 = vmul.f32 %v5996_v63, %v2790_v28  ;;  %v6060_v28 = vpop.f32.mrf.mxu3  ;;  %v895_v1 = vpop.permute.xlu0 %894 }
 0x247   : > { %4850 = vmatmul.msk.f32.gmra.mxu0 %vm1107_vm0, %v706_v36  ;;  %v2134_v8 = vpop.f32.mrf.mxu2  ;;  %vm1009_vm14 = vcmp.eq.s32.totalorder %v5356_v58, %v895_v1 }
 0x248   : > { %v2536_v10 = vadd.f32 %v5784_v47, %v2134_v8  ;;  %v2924_v51 = vsel %vm1918_vm2, %v2858_v18, 0.0  ;;  %v707_v47 = vsel %vm643_vm9, 1.0, %v5172_v62  ;;  %vm650_vm9 = vcmp.eq.s32.totalorder %v5356_v58, %v5637_v30 }
 0x249   : > { %2925 = vadd.xlane.f32.xlu2 %v2924_v51 }
 0x24a   : > { %v2727_v33 = vadd.f32 %v5987_v44, %v2536_v10 }
 0x24b   : > { %v1775_v61 = vpop.f32.mrf.mxu1 }
 0x24c   : > { %v2791_v40 = vmax.f32 %v2727_v33, 0.0  ;;  %v1437_v24 = vpop.f32.mrf.mxu0  ;;  %4942 = vmatmul.msk.f32.gmra.mxu2 %vm1918_vm2, %v1775_v61  ;;  %v901_v33 = vpop.permute.xlu2 %900  ;;  %v1073_v61 = vsel %vm1009_vm14, 1.0, %v5172_v62 }
 0x24d   : > { %5027 = vmatmul.msk.f32.gmra.mxu3 %vm1918_vm2, %v1437_v24  ;;  %vm1011_vm4 = vcmp.eq.s32.totalorder %v5356_v58, %v901_v33 }
 0x24e   : > { %4894 = vmatmul.msk.f32.gmra.mxu1 %vm1107_vm0, %v1070_v31  ;;  %v2859_v34 = vmul.f32 %v5996_v63, %v2791_v40  ;;  %v898_v40 = vpop.permute.xlu1 %897  ;;  %v6079_v31 = vpop.f32.mrf.mxu3 }
 0x24f   : > { %4851 = vmatmul.msk.f32.gmra.mxu0 %vm1107_vm0, %v707_v47  ;;  %v2137_v26 = vpop.f32.mrf.mxu2  ;;  %vm1010_vm1 = vcmp.eq.s32.totalorder %v5356_v58, %v898_v40 }
 0x250   : > { %v2539_v35 = vadd.f32 %v5794_v50, %v2137_v26  ;;  %v2927_v19 = vsel %vm1918_vm2, %v2859_v34, 0.0  ;;  %v708_v50 = vsel %vm644_vm11, 1.0, %v5172_v62 }
 0x251   : > { %2928 = vadd.xlane.f32.xlu0 %v2927_v19 }
 0x252   : > { %v2728_v14 = vadd.f32 %v5987_v44, %v2539_v35 }
 0x253   : > { %v1778_v25 = vpop.f32.mrf.mxu1 }
 0x254   : > { %v2792_v55 = vmax.f32 %v2728_v14, 0.0  ;;  %v1440_v57 = vpop.f32.mrf.mxu0  ;;  %4943 = vmatmul.msk.f32.gmra.mxu2 %vm1918_vm2, %v1778_v25  ;;  %v1074_v14 = vsel %vm1010_vm1, 1.0, %v5172_v62 }
 0x255   : > { %5028 = vmatmul.msk.f32.gmra.mxu3 %vm1918_vm2, %v1440_v57 }
 0x256   : > { %4895 = vmatmul.msk.f32.gmra.mxu1 %vm1107_vm0, %v1071_v43  ;;  %v2860_v12 = vmul.f32 %v5996_v63, %v2792_v55  ;;  %v6094_v55 = vpop.permute.xlu2 %909  ;;  %v907_v57 = vpop.permute.xlu1 %906 }
 0x257   : > { %4852 = vmatmul.msk.f32.gmra.mxu0 %vm1107_vm0, %v708_v50  ;;  %v2140_v60 = vpop.f32.mrf.mxu2  ;;  %vm1013_vm8 = vcmp.eq.s32.totalorder %v5356_v58, %v907_v57  ;;  %vm1014_vm10 = vcmp.eq.s32.totalorder %v5356_v58, %v6094_v55 }
 0x258   : > { %v2542_v2 = vadd.f32 %v5807_v4, %v2140_v60  ;;  %v2930_v49 = vsel %vm1918_vm2, %v2860_v12, 0.0  ;;  %v709_v4 = vsel %vm645_vm13, 1.0, %v5172_v62  ;;  %v6099_v12 = vpop.f32.mrf.mxu3 }
 0x259   : > { %2931 = vadd.xlane.f32.xlu1 %v2930_v49 }
 0x25a   : > { %v2729_v41 = vadd.f32 %v5987_v44, %v2542_v2 }
 0x25b   : > { %v1781_v7 = vpop.f32.mrf.mxu1 }
 0x25c   : > { %v2793_v32 = vmax.f32 %v2729_v41, 0.0  ;;  %v1443_v52 = vpop.f32.mrf.mxu0  ;;  %4944 = vmatmul.msk.f32.gmra.mxu2 %vm1918_vm2, %v1781_v7  ;;  %v1075_v41 = vsel %vm1011_vm4, 1.0, %v5172_v62 }
 0x25d   : > { %5029 = vmatmul.msk.f32.gmra.mxu3 %vm1918_vm2, %v1443_v52 }
 0x25e   : > { %4896 = vmatmul.msk.f32.gmra.mxu1 %vm1107_vm0, %v1072_v48  ;;  %v2861_v11 = vmul.f32 %v5996_v63, %v2793_v32  ;;  %v904_v32 = vpop.permute.xlu0 %903 }
 0x25f   : > { %4853 = vmatmul.msk.f32.gmra.mxu0 %vm1107_vm0, %v709_v4  ;;  %v2143_v56 = vpop.f32.mrf.mxu2  ;;  %v6114_v4 = vpop.permute.xlu2 %918  ;;  %vm1012_vm6 = vcmp.eq.s32.totalorder %v5356_v58, %v904_v32 }
 0x260   : > { %v2545_v36 = vadd.f32 %v5819_v6, %v2143_v56  ;;  %v2933_v18 = vsel %vm1918_vm2, %v2861_v11, 0.0  ;;  %v710_v6 = vsel %vm646_vm15, 1.0, %v5172_v62  ;;  %v6117_v11 = vpop.permute.xlu1 %915  ;;  %v6122_v56 = vpop.f32.mrf.mxu3  ;;  %vm1017_vm13 = vcmp.eq.s32.totalorder %v5356_v58, %v6114_v4 }
 0x261   : > { %2934 = vadd.xlane.f32.xlu0 %v2933_v18  ;;  %vm1016_vm12 = vcmp.eq.s32.totalorder %v5356_v58, %v6117_v11 }
 0x262   : > { %v2730_v37 = vadd.f32 %v5987_v44, %v2545_v36 }
 0x263   : > { %v1784_v8 = vpop.f32.mrf.mxu1 }
 0x264   : > { %v2794_v10 = vmax.f32 %v2730_v37, 0.0  ;;  %v1446_v51 = vpop.f32.mrf.mxu0  ;;  %4945 = vmatmul.msk.f32.gmra.mxu2 %vm1918_vm2, %v1784_v8  ;;  %v713_v8 = vsel %vm649_vm7, 1.0, %v5172_v62 }
 0x265   : > { %5030 = vmatmul.msk.f32.gmra.mxu3 %vm1918_vm2, %v1446_v51 }
 0x266   : > { %4897 = vmatmul.msk.f32.gmra.mxu1 %vm1107_vm0, %v1073_v61  ;;  %v2862_v24 = vmul.f32 %v5996_v63, %v2794_v10 }
 0x267   : > { %4854 = vmatmul.msk.f32.gmra.mxu0 %vm1107_vm0, %v710_v6  ;;  %v2146_v39 = vpop.f32.mrf.mxu2  ;;  %v6137_v6 = vpop.permute.xlu2 %927 }
 0x268   : > { %v2548_v47 = vadd.f32 %v5834_v27, %v2146_v39  ;;  %v2936_v34 = vsel %vm1918_vm2, %v2862_v24, 0.0  ;;  %v711_v27 = vsel %vm647_vm3, 1.0, %v5172_v62  ;;  %v6139_v24 = vpop.permute.xlu1 %924  ;;  %vm1020_vm1 = vcmp.eq.s32.totalorder %v5356_v58, %v6137_v6 }
 0x269   : > { %2937 = vadd.xlane.f32.xlu1 %v2936_v34  ;;  %v6143_v34 = vpop.f32.mrf.mxu3  ;;  %vm1019_vm15 = vcmp.eq.s32.totalorder %v5356_v58, %v6139_v24 }
 0x26a   : > { %v2731_v15 = vadd.f32 %v5987_v44, %v2548_v47 }
 0x26b   : > { %v1787_v26 = vpop.f32.mrf.mxu1 }
 0x26c   : > { %v2795_v35 = vmax.f32 %v2731_v15, 0.0  ;;  %v1449_v19 = vpop.f32.mrf.mxu0  ;;  %4946 = vmatmul.msk.f32.gmra.mxu2 %vm1918_vm2, %v1787_v26  ;;  %v714_v15 = vsel %vm650_vm9, 1.0, %v5172_v62 }
 0x26d   : > { %5031 = vmatmul.msk.f32.gmra.mxu3 %vm1918_vm2, %v1449_v19 }
 0x26e   : > { %4898 = vmatmul.msk.f32.gmra.mxu1 %vm1107_vm0, %v1074_v14  ;;  %v2863_v25 = vmul.f32 %v5996_v63, %v2795_v35  ;;  %v913_v35 = vpop.permute.xlu0 %912 }
 0x26f   : > { %4855 = vmatmul.msk.f32.gmra.mxu0 %vm1107_vm0, %v711_v27  ;;  %v2149_v13 = vpop.f32.mrf.mxu2  ;;  %vm1015_vm11 = vcmp.eq.s32.totalorder %v5356_v58, %v913_v35 }
 0x270   : > { %v2551_v43 = vadd.f32 %v5846_v42, %v2149_v13  ;;  %v2939_v50 = vsel %vm1918_vm2, %v2863_v25, 0.0  ;;  %v712_v42 = vsel %vm648_vm5, 1.0, %v5172_v62 }
 0x271   : > { %2940 = vadd.xlane.f32.xlu0 %v2939_v50  ;;  %v6157_v50 = vpop.permute.xlu2 %936  ;;  %v6164_v55 = vpop.f32.mrf.mxu3 }
 0x272   : > { %v2732_v59 = vadd.f32 %v5987_v44, %v2551_v43  ;;  %v1078_v43 = vsel %vm1014_vm10, 1.0, %v5172_v62  ;;  %vm1023_vm5 = vcmp.eq.s32.totalorder %v5356_v58, %v6157_v50 }
 0x273   : > { %v1790_v60 = vpop.f32.mrf.mxu1 }
 0x274   : > { %v2796_v2 = vmax.f32 %v2732_v59, 0.0  ;;  %v1452_v49 = vpop.f32.mrf.mxu0  ;;  %4947 = vmatmul.msk.f32.gmra.mxu2 %vm1918_vm2, %v1790_v60 }
 0x275   : > { %5032 = vmatmul.msk.f32.gmra.mxu3 %vm1918_vm2, %v1452_v49 }
 0x276   : > { %4899 = vmatmul.msk.f32.gmra.mxu1 %vm1107_vm0, %v1075_v41  ;;  %v2864_v7 = vmul.f32 %v5996_v63, %v2796_v2  ;;  %v922_v41 = vpop.permute.xlu0 %921 }
 0x277   : > { %4856 = vmatmul.msk.f32.gmra.mxu0 %vm1107_vm0, %v712_v42  ;;  %v2152_v52 = vpop.f32.mrf.mxu2  ;;  %vm1018_vm14 = vcmp.eq.s32.totalorder %v5356_v58, %v922_v41 }
 0x278   : > { %v2554_v38 = vadd.f32 %v5860_v21, %v2152_v52  ;;  %v2942_v48 = vsel %vm1918_vm2, %v2864_v7, 0.0  ;;  %v1076_v21 = vsel %vm1012_vm6, 1.0, %v5172_v62 }
 0x279   : > { %2943 = vadd.xlane.f32.xlu1 %v2942_v48  ;;  %v6175_v48 = vpop.permute.xlu2 %945 }
 0x27a   : > { %v2733_v1 = vadd.f32 %v5987_v44, %v2554_v38  ;;  %v1079_v38 = vsel %vm1015_vm11, 1.0, %v5172_v62 }
 0x27b   : > { %v1793_v36 = vpop.f32.mrf.mxu1 }
 0x27c   : > { %v2797_v18 = vmax.f32 %v2733_v1, 0.0  ;;  %v1455_v37 = vpop.f32.mrf.mxu0  ;;  %4948 = vmatmul.msk.f32.gmra.mxu2 %vm1918_vm2, %v1793_v36 }
 0x27d   : > { %5033 = vmatmul.msk.f32.gmra.mxu3 %vm1918_vm2, %v1455_v37 }
 0x27e   : > { %4900 = vmatmul.msk.f32.gmra.mxu1 %vm1107_vm0, %v1076_v21  ;;  %v2865_v10 = vmul.f32 %v5996_v63, %v2797_v18  ;;  %v6181_v21 = vpop.f32.mrf.mxu3 }
 0x27f   : > { %4857 = vmatmul.msk.f32.gmra.mxu0 %vm1107_vm0, %v713_v8  ;;  %v2155_v16 = vpop.f32.mrf.mxu2 }
 0x280   : > { %v2557_v51 = vadd.f32 %v5872_v5, %v2155_v16  ;;  %v2945_v33 = vsel %vm1918_vm2, %v2865_v10, 0.0  ;;  %v1077_v5 = vsel %vm1013_vm8, 1.0, %v5172_v62  ;;  %v6186_v16 = vpop.permute.xlu0 %930  ;;  %vm1026_vm8 = vcmp.eq.s32.totalorder %v5356_v58, %v6175_v48 }
 0x281   : > { %2946 = vadd.xlane.f32.xlu2 %v2945_v33  ;;  %vm1021_vm3 = vcmp.eq.s32.totalorder %v5356_v58, %v6186_v16 }
 0x282   : > { %v2734_v61 = vadd.f32 %v5987_v44, %v2557_v51 }
 0x283   : > { %v1796_v40 = vpop.f32.mrf.mxu1 }
 0x284   : > { %v2798_v39 = vmax.f32 %v2734_v61, 0.0  ;;  %v1458_v47 = vpop.f32.mrf.mxu0  ;;  %4949 = vmatmul.msk.f32.gmra.mxu2 %vm1918_vm2, %v1796_v40  ;;  %v1080_v61 = vsel %vm1016_vm12, 1.0, %v5172_v62 }
 0x285   : > { %5034 = vmatmul.msk.f32.gmra.mxu3 %vm1918_vm2, %v1458_v47  ;;  %v6195_v47 = vpop.permute.xlu2 %954 }
 0x286   : > { %4901 = vmatmul.msk.f32.gmra.mxu1 %vm1107_vm0, %v1077_v5  ;;  %v2866_v30 = vmul.f32 %v5996_v63, %v2798_v39  ;;  %vm1029_vm11 = vcmp.eq.s32.totalorder %v5356_v58, %v6195_v47 }
 0x287   : > { %4858 = vmatmul.msk.f32.gmra.mxu0 %vm1107_vm0, %v714_v15  ;;  %v2158_v26 = vpop.f32.mrf.mxu2 }
 0x288   : > { %v2560_v19 = vadd.f32 %v5887_v20, %v2158_v26  ;;  %v2948_v14 = vsel %vm1918_vm2, %v2866_v30, 0.0  ;;  %v6160_v20 = vpop.permute.xlu1 %933  ;;  %v6202_v30 = vpop.f32.mrf.mxu3 }
 0x289   : > { %2949 = vadd.xlane.f32.xlu0 %v2948_v14  ;;  %v6207_v14 = vpop.permute.xlu0 %939  ;;  %vm1022_vm4 = vcmp.eq.s32.totalorder %v5356_v58, %v6160_v20 }
 0x28a   : > { %v2735_v27 = vadd.f32 %v5987_v44, %v2560_v19  ;;  %vm1024_vm6 = vcmp.eq.s32.totalorder %v5356_v58, %v6207_v14 }
 0x28b   : > { %v1799_v25 = vpop.f32.mrf.mxu1 }
 0x28c   : > { %v2799_v13 = vmax.f32 %v2735_v27, 0.0  ;;  %v1461_v57 = vpop.f32.mrf.mxu0  ;;  %4950 = vmatmul.msk.f32.gmra.mxu2 %vm1918_vm2, %v1799_v25 }
 0x28d   : > { %5035 = vmatmul.msk.f32.gmra.mxu3 %vm1918_vm2, %v1461_v57 }
 0x28e   : > { %4902 = vmatmul.msk.f32.gmra.mxu1 %vm1107_vm0, %v1078_v43  ;;  %v2867_v59 = vmul.f32 %v5996_v63, %v2799_v13  ;;  %v6215_v43 = vpop.permute.xlu2 %963 }
 0x28f   : > { %v2161_v60 = vpop.f32.mrf.mxu2 }
 0x290   : > { %v2563_v2 = vadd.f32 %v5899_v17, %v2161_v60  ;;  %v2951_v49 = vsel %vm1918_vm2, %v2867_v59, 0.0  ;;  %v6177_v36 = vpop.permute.xlu1 %942 }
 0x291   : > { %2952 = vadd.xlane.f32.xlu1 %v2951_v49  ;;  %vm1025_vm7 = vcmp.eq.s32.totalorder %v5356_v58, %v6177_v36 }
 0x292   : > { %v2736_v42 = vadd.f32 %v5987_v44, %v2563_v2 }
 0x293   : > { %v1802_v7 = vpop.f32.mrf.mxu1 }
 0x294   : > { %v2800_v32 = vmax.f32 %v2736_v42, 0.0  ;;  %v1464_v52 = vpop.f32.mrf.mxu0  ;;  %4951 = vmatmul.msk.f32.gmra.mxu2 %vm1918_vm2, %v1802_v7  ;;  %v1082_v42 = vsel %vm1018_vm14, 1.0, %v5172_v62  ;;  %vm1032_vm14 = vcmp.eq.s32.totalorder %v5356_v58, %v6215_v43 }
 0x295   : > { %5036 = vmatmul.msk.f32.gmra.mxu3 %vm1918_vm2, %v1464_v52 }
 0x296   : > { %4903 = vmatmul.msk.f32.gmra.mxu1 %vm1107_vm0, %v1079_v38  ;;  %v2868_v17 = vmul.f32 %v5996_v63, %v2800_v32  ;;  %v6226_v32 = vpop.permute.xlu0 %948 }
 0x297   : > { %v2164_v1 = vpop.f32.mrf.mxu2  ;;  %vm1027_vm9 = vcmp.eq.s32.totalorder %v5356_v58, %v6226_v32 }
 0x298   : > { %v2566_v18 = vadd.f32 %v5913_v3, %v2164_v1  ;;  %v2954_v37 = vsel %vm1918_vm2, %v2868_v17, 0.0  ;;  %v6199_v5 = vpop.permute.xlu1 %951  ;;  %v6233_v1 = vstv %s3113_s23  ;;  %s4790_s23 = sshll.u32 %s314_s21, 2 }
 0x299   : > { %2955 = vadd.xlane.f32.xlu0 %v2954_v37  ;;  %vm1028_vm10 = vcmp.eq.s32.totalorder %v5356_v58, %v6199_v5  ;;  %s316_s7 = scalar_lea.vmem [#allocation3], %s4790_s23 }
 0x29a   : > { %v2737_v8 = vadd.f32 %v5987_v44, %v2566_v18  ;;  %s4712_s28 = sshll.u32 %s316_s7, 4  ;;  %s4713_s28 = int_to_ptr.vmem [resolvable:$true] %s4712_s28 }
 0x29b   : > { %v1805_v10 = vpop.f32.mrf.mxu1 }
 0x29c   : > { %v2801_v51 = vmax.f32 %v2737_v8, 0.0  ;;  %v1467_v33 = vpop.f32.mrf.mxu0  ;;  %4952 = vmatmul.msk.f32.gmra.mxu2 %vm1918_vm2, %v1805_v10 }
 0x29d   : > { %5037 = vmatmul.msk.f32.gmra.mxu3 %vm1918_vm2, %v1467_v33  ;;  %v6237_v33 = vpop.permute.xlu2 %969 }
 0x29e   : > { %4904 = vmatmul.msk.f32.gmra.mxu1 %vm1107_vm0, %v1080_v61  ;;  %v2869_v3 = vmul.f32 %v5996_v63, %v2801_v51  ;;  %v1083_v51 = vsel %vm1019_vm15, 1.0, %v5172_v62 }
 0x29f   : > { %v2167_v40 = vpop.f32.mrf.mxu2 }
 0x2a0   : > { %v2569_v11 = vadd.f32 %v5926_v53, %v2167_v40  ;;  %v2957_v39 = vsel %vm1918_vm2, %v2869_v3, 0.0  ;;  %v1081_v53 = vsel %vm1017_vm13, 1.0, %v5172_v62  ;;  %v6217_v60 = vpop.permute.xlu1 %960 }
 0x2a1   : > { %2958 = vadd.xlane.f32.xlu1 %v2957_v39  ;;  %vm1031_vm13 = vcmp.eq.s32.totalorder %v5356_v58, %v6217_v60 }
 0x2a2   : > { %v2738_v15 = vadd.f32 %v5987_v44, %v2569_v11 }
 0x2a3   : > { %v1808_v26 = vpop.f32.mrf.mxu1 }
 0x2a4   : > { %v2802_v35 = vmax.f32 %v2738_v15, 0.0  ;;  %v1470_v19 = vpop.f32.mrf.mxu0  ;;  %4953 = vmatmul.msk.f32.gmra.mxu2 %vm1918_vm2, %v1808_v26 }
 0x2a5   : > { %5038 = vmatmul.msk.f32.gmra.mxu3 %vm1918_vm2, %v1470_v19 }
 0x2a6   : > { %4905 = vmatmul.msk.f32.gmra.mxu1 %vm1107_vm0, %v1081_v53  ;;  %v2870_v4 = vmul.f32 %v5996_v63, %v2802_v35  ;;  %v6249_v53 = vpop.permute.xlu0 %957 }
 0x2a7   : > { %v2170_v27 = vpop.f32.mrf.mxu2  ;;  %vm1030_vm12 = vcmp.eq.s32.totalorder %v5356_v58, %v6249_v53 }
 0x2a8   : > { %v2572_v25 = vadd.f32 %v5940_v9, %v2170_v27  ;;  %v2960_v13 = vsel %vm1918_vm2, %v2870_v4, 0.0  ;;  %v6221_v9 = vpop.f32.mrf.mxu3  ;;  %v1094_v53 = vsel %vm1030_vm12, 1.0, %v5172_v62  ;;  %vm4573_vm12 = vcmask 786112  }
 0x2a9   : > { %2961 = vadd.xlane.f32.xlu0 %v2960_v13 }
 0x2aa   : > { %v2739_v57 = vadd.f32 %v5987_v44, %v2572_v25 }
 0x2ab   : > { %v1811_v59 = vpop.f32.mrf.mxu1 }
 0x2ac   : > { %v2803_v2 = vmax.f32 %v2739_v57, 0.0  ;;  %v1473_v49 = vpop.f32.mrf.mxu0  ;;  %4954 = vmatmul.msk.f32.gmra.mxu2 %vm1918_vm2, %v1811_v59 }
 0x2ad   : > { %5039 = vmatmul.msk.f32.gmra.mxu3 %vm1918_vm2, %v1473_v49 }
 0x2ae   : > { %4906 = vmatmul.msk.f32.gmra.mxu1 %vm1107_vm0, %v1082_v42  ;;  %v2871_v41 = vmul.f32 %v5996_v63, %v2803_v2 }
 0x2af   : > { %v2173_v7 = vpop.f32.mrf.mxu2 }
 0x2b0   : > { %v2575_v52 = vadd.f32 %v5952_v45, %v2173_v7  ;;  %v2963_v38 = vsel %vm1918_vm2, %v2871_v41, 0.0  ;;  %v6243_v61 = vpop.f32.mrf.mxu3 }
 0x2b1   : > { %2964 = vadd.xlane.f32.xlu1 %v2963_v38  ;;  %v6263_v38 = vpop.permute.xlu0 %966 }
 0x2b2   : > { %v2740_v17 = vadd.f32 %v5987_v44, %v2575_v52  ;;  %vm1033_vm15 = vcmp.eq.s32.totalorder %v5356_v58, %v6263_v38 }
 0x2b3   : > { %v1814_v18 = vpop.f32.mrf.mxu1 }
 0x2b4   : > { %v2804_v37 = vmax.f32 %v2740_v17, 0.0  ;;  %v1476_v8 = vpop.f32.mrf.mxu0  ;;  %v2923_v10 = vpop.xlane.xlu1 %2922  ;;  %4955 = vmatmul.msk.f32.gmra.mxu2 %vm1918_vm2, %v1814_v18 }
 0x2b5   : > { %v3115_v45 = vadd.f32 %v6233_v1, %v2923_v10  ;;  %5040 = vmatmul.msk.f32.gmra.mxu3 %vm1918_vm2, %v1476_v8 }
 0x2b6   : > { %4907 = vmatmul.msk.f32.gmra.mxu1 %vm1107_vm0, %v1083_v51  ;;  %v2872_v24 = vmul.f32 %v5996_v63, %v2804_v37  ;;  %v1085_v37 = vsel %vm1021_vm3, 1.0, %v5172_v62  ;;  %vm4537_vm3 = vcmask 195712  }
 0x2b7   : > { %v3243_v3 = vperm.slane %v3115_v45, 0  ;;  %v3244_v40 = vperm.slane %v3115_v45, 1  ;;  %v3245_v11 = vperm.slane %v3115_v45, 2  ;;  %v2176_v39 = vpop.f32.mrf.mxu2  ;;  %v3246_v15 = vperm.slane %v3115_v45, 3 }
 0x2b8   : > { %v3247_v26 = vperm.slane %v3115_v45, 4  ;;  %v2578_v35 = vadd.f32 %v5966_v22, %v2176_v39  ;;  %v2966_v19 = vsel %vm1918_vm2, %v2872_v24, 0.0  ;;  %v3248_v4 = vperm.slane %v3115_v45, 5  ;;  %v6257_v42 = vpop.f32.mrf.mxu3 }
 0x2b9   : > { %3755 = vst [vmem:[#allocation1] ss:$9 sm:$0xff] %v3243_v3  ;;  %2967 = vadd.xlane.f32.xlu0 %v2966_v19  ;;  %v3249_v27 = vperm.slane %v3115_v45, 6  ;;  %v3250_v57 = vperm.slane %v3115_v45, 7  ;;  %v1084_v22 = vsel %vm1020_vm1, 1.0, %v5172_v62  ;;  %vm1034_vm1 = vcmp.eq.s32.totalorder %v5356_v58, %v6237_v33 }
 0x2ba   : > { %3757 = vst [vmem:[#allocation1 + $0x1] ss:$9 sm:$0xff] %v3244_v40  ;;  %v2741_v25 = vadd.f32 %v5987_v44, %v2578_v35  ;;  %v1086_v35 = vsel %vm1022_vm4, 1.0, %v5172_v62  ;;  %vm4541_vm4 = vcmask 261312  }
 0x2bb   : > { %3759 = vst [vmem:[#allocation1 + $0x2] ss:$9 sm:$0xff] %v3245_v11  ;;  %v1817_v13 = vpop.f32.mrf.mxu1 }
 0x2bc   : > { %3761 = vst [vmem:[#allocation1 + $0x3] ss:$9 sm:$0xff] %v3246_v15  ;;  %v1479_v59 = vpop.f32.mrf.mxu0  ;;  %4956 = vmatmul.msk.f32.gmra.mxu2 %vm1918_vm2, %v1817_v13  ;;  %v2805_v2 = vmax.f32 %v2741_v25, 0.0  ;;  %v2926_v6 = vpop.xlane.xlu2 %2925  ;;  %v1087_v13 = vsel %vm1023_vm5, 1.0, %v5172_v62  ;;  %vm4545_vm5 = vcmask 326912  }
 0x2bd   : > { %3763 = vst [vmem:[#allocation1 + $0x4] ss:$9 sm:$0xff] %v3247_v26  ;;  %5041 = vmatmul.msk.f32.gmra.mxu3 %vm1918_vm2, %v1479_v59  ;;  %v3116_v49 = vadd.f32 %v6233_v1, %v2926_v6 }
 0x2be   : > { %3765 = vst [vmem:[#allocation1 + $0x5] ss:$9 sm:$0xff] %v3248_v4  ;;  %4908 = vmatmul.msk.f32.gmra.mxu1 %vm1107_vm0, %v1084_v22  ;;  %v2873_v41 = vmul.f32 %v5996_v63, %v2805_v2 }
 0x2bf   : > { %3767 = vst [vmem:[#allocation1 + $0x6] ss:$9 sm:$0xff] %v3249_v27  ;;  %v3251_v17 = vperm.slane %v3116_v49, 0  ;;  %v3252_v8 = vperm.slane %v3116_v49, 1  ;;  %v3253_v10 = vperm.slane %v3116_v49, 2  ;;  %v3254_v16 = vperm.slane %v3116_v49, 3  ;;  %v2179_v50 = vpop.f32.mrf.mxu2 }
 0x2c0   : > { %3769 = vst [vmem:[#allocation1 + $0x7] ss:$9 sm:$0xff] %v3250_v57  ;;  %v2969_v7 = vsel %vm1918_vm2, %v2873_v41, 0.0  ;;  %v3255_v45 = vperm.slane %v3116_v49, 4  ;;  %v3256_v24 = vperm.slane %v3116_v49, 5  ;;  %v3257_v3 = vperm.slane %v3116_v49, 6  ;;  %v6271_v40 = vpop.f32.mrf.mxu3 }
 0x2c1   : > { %2970 = vadd.xlane.f32.xlu1 %v2969_v7  ;;  %v3258_v11 = vperm.slane %v3116_v49, 7 }
 0x2c3   : > { %v1820_v52 = vpop.f32.mrf.mxu1 }
 0x2c4   : > { %v1482_v18 = vpop.f32.mrf.mxu0  ;;  %4957 = vmatmul.msk.f32.gmra.mxu2 %vm1918_vm2, %v1820_v52  ;;  %v2929_v15 = vpop.xlane.xlu0 %2928 }
 0x2c5   : > { %5042 = vmatmul.msk.f32.gmra.mxu3 %vm1918_vm2, %v1482_v18  ;;  %v3117_v20 = vadd.f32 %v6233_v1, %v2929_v15  ;;  %v2581_v15 = vadd.f32 %v5979_v0, %v2179_v50 }
 0x2c6   : > { %4909 = vmatmul.msk.f32.gmra.mxu1 %vm1107_vm0, %v1085_v37 }
 0x2c7   : > { %v3770_v51 = vld [vmem:[#allocation1] sm:$0xff]  ;;  %v3259_v19 = vperm.slane %v3117_v20, 0  ;;  %v3260_v27 = vperm.slane %v3117_v20, 1  ;;  %v3261_v59 = vperm.slane %v3117_v20, 2  ;;  %v3262_v2 = vperm.slane %v3117_v20, 3  ;;  %v2182_v14 = vpop.f32.mrf.mxu2 }
 0x2c8   : > { %3771 = vst [vmem:[#allocation1] ss:$9 sm:$0xff] %v3251_v17  ;;  %v6282_v57 = vpop.f32.mrf.mxu3  ;;  %v3263_v6 = vperm.slane %v3117_v20, 4  ;;  %v3264_v49 = vperm.slane %v3117_v20, 5  ;;  %v3265_v41 = vperm.slane %v3117_v20, 6  ;;  %v3266_v7 = vperm.slane %v3117_v20, 7 }
 0x2c9   : > { %3772 = vst [vmem:[#allocation1 + $0x1] ss:$9 sm:$0xff] %v3252_v8  ;;  %v1088_v17 = vsel %vm1024_vm6, 1.0, %v5172_v62  ;;  %vm4549_vm6 = vcmask 392512  }
 0x2ca   : > { %3773 = vst [vmem:[#allocation1 + $0x2] ss:$9 sm:$0xff] %v3253_v10 }
 0x2cb   : > { %3774 = vst [vmem:[#allocation1 + $0x3] ss:$9 sm:$0xff] %v3254_v16  ;;  %v1823_v39 = vpop.f32.mrf.mxu1 }
 0x2cc   : > { %3775 = vst [vmem:[#allocation1 + $0x4] ss:$9 sm:$0xff] %v3255_v45  ;;  %v1485_v26 = vpop.f32.mrf.mxu0  ;;  %4958 = vmatmul.msk.f32.gmra.mxu2 %vm1918_vm2, %v1823_v39  ;;  %v2932_v52 = vpop.xlane.xlu1 %2931 }
 0x2cd   : > { %3776 = vst [vmem:[#allocation1 + $0x5] ss:$9 sm:$0xff] %v3256_v24  ;;  %5043 = vmatmul.msk.f32.gmra.mxu3 %vm1918_vm2, %v1485_v26  ;;  %4339 = vperm.xlu0 %5096, %v3770_v51   ;;  %v3118_v18 = vadd.f32 %v6233_v1, %v2932_v52  ;;  %v1089_v24 = vsel %vm1025_vm7, 1.0, %v5172_v62  ;;  %vm4553_vm7 = vcmask 458112  }
 0x2ce   : > { %3777 = vst [vmem:[#allocation1 + $0x6] ss:$9 sm:$0xff] %v3257_v3  ;;  %4910 = vmatmul.msk.f32.gmra.mxu1 %vm1107_vm0, %v1086_v35 }
 0x2cf   : > { %3778 = vst [vmem:[#allocation1 + $0x7] ss:$9 sm:$0xff] %v3258_v11  ;;  %v3267_v51 = vperm.slane %v3118_v18, 0  ;;  %v3268_v16 = vperm.slane %v3118_v18, 1  ;;  %v3269_v45 = vperm.slane %v3118_v18, 2  ;;  %v3270_v11 = vperm.slane %v3118_v18, 3 }
 0x2d0   : > { %v6291_v10 = vpop.f32.mrf.mxu3  ;;  %v3271_v39 = vperm.slane %v3118_v18, 4  ;;  %v3272_v26 = vperm.slane %v3118_v18, 5  ;;  %v3273_v35 = vperm.slane %v3118_v18, 6  ;;  %v3274_v36 = vperm.slane %v3118_v18, 7 }
 0x2d1   : > { %v1091_v18 = vsel %vm1027_vm9, 1.0, %v5172_v62  ;;  %vm4561_vm9 = vcmask 589312  }
 0x2d3   : > { %v1826_v4 = vpop.f32.mrf.mxu1 }
 0x2d4   : > { %v1488_v25 = vpop.f32.mrf.mxu0  ;;  %4959 = vmatmul.msk.f32.gmra.mxu2 %vm1918_vm2, %v1826_v4  ;;  %v2935_v20 = vpop.xlane.xlu0 %2934 }
 0x2d5   : > { %5044 = vmatmul.msk.f32.gmra.mxu3 %vm1918_vm2, %v1488_v25  ;;  %v2185_v4 = vpop.f32.mrf.mxu2 }
 0x2d6   : > { %v3779_v22 = vld [vmem:[#allocation1] sm:$0xff]  ;;  %4911 = vmatmul.msk.f32.gmra.mxu1 %vm1107_vm0, %v1087_v13  ;;  %v1090_v13 = vsel %vm1026_vm8, 1.0, %v5172_v62  ;;  %v2587_v48 = vadd.f32 %v6024_v23, %v2185_v4  ;;  %vm4557_vm8 = vcmask 523712  }
 0x2d7   : > { %3780 = vst [vmem:[#allocation1] ss:$9 sm:$0xff] %v3259_v19  ;;  %v2742_v19 = vadd.f32 %v5987_v44, %v2581_v15 }
 0x2d8   : > { %3781 = vst [vmem:[#allocation1 + $0x1] ss:$9 sm:$0xff] %v3260_v27  ;;  %v3119_v27 = vadd.f32 %v6233_v1, %v2935_v20 }
 0x2d9   : > { %3782 = vst [vmem:[#allocation1 + $0x2] ss:$9 sm:$0xff] %v3261_v59  ;;  %v6305_v59 = vpop.f32.mrf.mxu3 }
 0x2da   : > { %3783 = vst [vmem:[#allocation1 + $0x3] ss:$9 sm:$0xff] %v3262_v2  ;;  %4342 = vperm.xlu1 %5097, %v3779_v22   ;;  %v2806_v22 = vmax.f32 %v2742_v19, 0.0  ;;  %v3275_v2 = vperm.slane %v3119_v27, 0  ;;  %v3277_v50 = vperm.slane %v3119_v27, 2  ;;  %v3278_v52 = vperm.slane %v3119_v27, 3 }
 0x2db   : > { %3784 = vst [vmem:[#allocation1 + $0x4] ss:$9 sm:$0xff] %v3263_v6  ;;  %v1829_v8 = vpop.f32.mrf.mxu1  ;;  %v3276_v6 = vperm.slane %v3119_v27, 1  ;;  %v3280_v23 = vperm.slane %v3119_v27, 5 }
 0x2dc   : > { %3785 = vst [vmem:[#allocation1 + $0x5] ss:$9 sm:$0xff] %v3264_v49  ;;  %v1491_v37 = vpop.f32.mrf.mxu0  ;;  %4960 = vmatmul.msk.f32.gmra.mxu2 %vm1918_vm2, %v1829_v8  ;;  %v2874_v49 = vmul.f32 %v5996_v63, %v2806_v22  ;;  %v3281_v8 = vperm.slane %v3119_v27, 6 }
 0x2dd   : > { %3786 = vst [vmem:[#allocation1 + $0x6] ss:$9 sm:$0xff] %v3265_v41  ;;  %5045 = vmatmul.msk.f32.gmra.mxu3 %vm1918_vm2, %v1491_v37  ;;  %v2584_v37 = vadd.f32 %v6006_v29, %v2182_v14  ;;  %v2188_v29 = vpop.f32.mrf.mxu2 }
 0x2de   : > { %3787 = vst [vmem:[#allocation1 + $0x7] ss:$9 sm:$0xff] %v3266_v7  ;;  %4912 = vmatmul.msk.f32.gmra.mxu1 %vm1107_vm0, %v1088_v17  ;;  %v2744_v7 = vadd.f32 %v5987_v44, %v2587_v48  ;;  %v3279_v17 = vperm.slane %v3119_v27, 4  ;;  %v2972_v32 = vsel %vm1918_vm2, %v2874_v49, 0.0  ;;  %v2590_v5 = vadd.f32 %v6043_v46, %v2188_v29 }
 0x2df   : > { %v1093_v48 = vsel %vm1029_vm11, 1.0, %v5172_v62  ;;  %vm4569_vm11 = vcmask 720512  }
 0x2e1   : > { %v6326_v15 = vpop.f32.mrf.mxu3 }
 0x2e3   : > { %v1832_v25 = vpop.f32.mrf.mxu1 }
 0x2e4   : > { %v1494_v0 = vpop.f32.mrf.mxu0  ;;  %4961 = vmatmul.msk.f32.gmra.mxu2 %vm1918_vm2, %v1832_v25  ;;  %v2745_v25 = vadd.f32 %v5987_v44, %v2590_v5 }
 0x2e5   : > { %v3788_v3 = vld [vmem:[#allocation1] sm:$0xff]  ;;  %5046 = vmatmul.msk.f32.gmra.mxu3 %vm1918_vm2, %v1494_v0 }
 0x2e6   : > { %3789 = vst [vmem:[#allocation1] ss:$9 sm:$0xff] %v3267_v51  ;;  %4345 = vperm.xlu2 %5098, %v3788_v3   ;;  %4913 = vmatmul.msk.f32.gmra.mxu1 %vm1107_vm0, %v1089_v24  ;;  %v2808_v51 = vmax.f32 %v2744_v7, 0.0  ;;  %v2743_v24 = vadd.f32 %v5987_v44, %v2584_v37  ;;  %v2941_v44 = vpop.xlane.xlu0 %2940 }
 0x2e7   : > { %3790 = vst [vmem:[#allocation1 + $0x1] ss:$9 sm:$0xff] %v3268_v16  ;;  %v3282_v16 = vperm.slane %v3119_v27, 7  ;;  %v3121_v47 = vadd.f32 %v6233_v1, %v2941_v44 }
 0x2e8   : > { %3791 = vst [vmem:[#allocation1 + $0x2] ss:$9 sm:$0xff] %v3269_v45  ;;  %v2938_v45 = vpop.xlane.xlu1 %2937 }
 0x2e9   : > { %3792 = vst [vmem:[#allocation1 + $0x3] ss:$9 sm:$0xff] %v3270_v11  ;;  %v3120_v14 = vadd.f32 %v6233_v1, %v2938_v45  ;;  %v3295_v45 = vperm.slane %v3121_v47, 4  ;;  %v3297_v29 = vperm.slane %v3121_v47, 6 }
 0x2ea   : > { %3793 = vst [vmem:[#allocation1 + $0x4] ss:$9 sm:$0xff] %v3271_v39  ;;  %v2876_v39 = vmul.f32 %v5996_v63, %v2808_v51 }
 0x2eb   : > { %3794 = vst [vmem:[#allocation1 + $0x5] ss:$9 sm:$0xff] %v3272_v26  ;;  %v1835_v11 = vpop.f32.mrf.mxu1  ;;  %v1092_v26 = vsel %vm1028_vm10, 1.0, %v5172_v62  ;;  %v3283_v20 = vperm.slane %v3120_v14, 0  ;;  %v3284_v19 = vperm.slane %v3120_v14, 1  ;;  %v3285_v4 = vperm.slane %v3120_v14, 2 }
 0x2ec   : > { %3795 = vst [vmem:[#allocation1 + $0x6] ss:$9 sm:$0xff] %v3273_v35  ;;  %v1497_v3 = vpop.f32.mrf.mxu0  ;;  %4962 = vmatmul.msk.f32.gmra.mxu2 %vm1918_vm2, %v1835_v11  ;;  %v2807_v35 = vmax.f32 %v2743_v24, 0.0  ;;  %v3287_v22 = vperm.slane %v3120_v14, 4  ;;  %v3288_v46 = vperm.slane %v3120_v14, 5  ;;  %v3296_v24 = vperm.slane %v3121_v47, 5 }
 0x2ed   : > { %3796 = vst [vmem:[#allocation1 + $0x7] ss:$9 sm:$0xff] %v3274_v36  ;;  %5047 = vmatmul.msk.f32.gmra.mxu3 %vm1918_vm2, %v1497_v3  ;;  %v2978_v36 = vsel %vm1918_vm2, %v2876_v39, 0.0  ;;  %v3298_v3 = vperm.slane %v3121_v47, 7  ;;  %v2191_v39 = vpop.f32.mrf.mxu2  ;;  %vm4565_vm10 = vcmask 654912  }
 0x2ee   : > { %4914 = vmatmul.msk.f32.gmra.mxu1 %vm1107_vm0, %v1090_v13  ;;  %v2875_v27 = vmul.f32 %v5996_v63, %v2807_v35  ;;  %v3286_v13 = vperm.slane %v3120_v14, 3  ;;  %v3290_v63 = vperm.slane %v3120_v14, 7  ;;  %v2593_v5 = vadd.f32 %v6060_v28, %v2191_v39 }
 0x2f0   : > { %v2944_v11 = vpop.xlane.xlu1 %2943 }
 0x2f1   : > { %v3122_v60 = vadd.f32 %v6233_v1, %v2944_v11 }
 0x2f3   : > { %v1838_v7 = vpop.f32.mrf.mxu1  ;;  %v3304_v28 = vperm.slane %v3122_v60, 5 }
 0x2f4   : > { %v6314_v41 = vld [vmem:[#allocation1] sm:$0xff]  ;;  %v1500_v49 = vpop.f32.mrf.mxu0  ;;  %4963 = vmatmul.msk.f32.gmra.mxu2 %vm1918_vm2, %v1838_v7 }
 0x2f5   : > { %3798 = vst [vmem:[#allocation1] ss:$9 sm:$0xff] %v3275_v2  ;;  %v3289_v2 = vperm.slane %v3120_v14, 6  ;;  %v1095_v14 = vsel %vm1031_vm13, 1.0, %v5172_v62  ;;  %vm4577_vm13 = vcmask 851712  }
 0x2f6   : > { %3799 = vst [vmem:[#allocation1 + $0x1] ss:$9 sm:$0xff] %v3276_v6  ;;  %4915 = vmatmul.msk.f32.gmra.mxu1 %vm1107_vm0, %v1091_v18  ;;  %v2975_v6 = vsel %vm1918_vm2, %v2875_v27, 0.0  ;;  %v6350_v18 = vpop.f32.mrf.mxu3  ;;  %5048 = vmatmul.msk.f32.gmra.mxu3 %vm1918_vm2, %v1500_v49  ;;  %v3301_v27 = vperm.slane %v3122_v60, 2 }
 0x2f7   : > { %3800 = vst [vmem:[#allocation1 + $0x2] ss:$9 sm:$0xff] %v3277_v50  ;;  %2973 = vadd.xlane.f32.xlu0 %v2972_v32  ;;  %v2809_v50 = vmax.f32 %v2745_v25, 0.0  ;;  %v3293_v32 = vperm.slane %v3121_v47, 2  ;;  %v3302_v25 = vperm.slane %v3122_v60, 3 }
 0x2f8   : > { %3801 = vst [vmem:[#allocation1 + $0x3] ss:$9 sm:$0xff] %v3278_v52  ;;  %v6347_v52 = vld [vmem:[%s7058_s6] ss:$0 sm:$0xff] }
 0x2f9   : > { %3802 = vst [vmem:[#allocation1 + $0x4] ss:$9 sm:$0xff] %v3279_v17  ;;  %v2877_v17 = vmul.f32 %v6347_v52, %v2809_v50 }
 0x2fa   : > { %3803 = vst [vmem:[#allocation1 + $0x5] ss:$9 sm:$0xff] %v3280_v23  ;;  %v3291_v23 = vperm.slane %v3121_v47, 0 }
 0x2fb   : > { %3804 = vst [vmem:[#allocation1 + $0x6] ss:$9 sm:$0xff] %v3281_v8  ;;  %v2981_v37 = vsel %vm1918_vm2, %v2877_v17, 0.0  ;;  %v3292_v8 = vperm.slane %v3121_v47, 1  ;;  %v1841_v35 = vpop.f32.mrf.mxu1  ;;  %v1098_v17 = vsel %vm1034_vm1, 1.0, %v5172_v62  ;;  %vm7061_vm1 = vcmask 1048512  }
 0x2fc   : > { %3805 = vst [vmem:[#allocation1 + $0x7] ss:$9 sm:$0xff] %v3282_v16  ;;  %v3294_v16 = vperm.slane %v3121_v47, 3  ;;  %4964 = vmatmul.msk.f32.gmra.mxu2 %vm1918_vm2, %v1841_v35 }
 0x2fe   : > { %4916 = vmatmul.msk.f32.gmra.mxu1 %vm1107_vm0, %v1092_v26  ;;  %v1503_v26 = vpop.f32.mrf.mxu0 }
 0x2ff   : > { %2979 = vadd.xlane.f32.xlu0 %v2978_v36  ;;  %v1096_v36 = vsel %vm1032_vm14, 1.0, %v5172_v62  ;;  %vm4581_vm14 = vcmask 917312  }
 0x303   : > { %v3806_v0 = vld [vmem:[#allocation1] sm:$0xff]  ;;  %v1844_v44 = vpop.f32.mrf.mxu1 }
 0x304   : > { %3807 = vst [vmem:[#allocation1] ss:$9 sm:$0xff] %v3283_v20  ;;  %4351 = vperm.xlu2 %5098, %v3806_v0   ;;  %2976 = vadd.xlane.f32.xlu1 %v2975_v6  ;;  %v3299_v20 = vperm.slane %v3122_v60, 0  ;;  %v2947_v6 = vpop.xlane.xlu2 %2946 }
 0x305   : > { %3808 = vst [vmem:[#allocation1 + $0x1] ss:$9 sm:$0xff] %v3284_v19  ;;  %v3300_v19 = vperm.slane %v3122_v60, 1  ;;  %v3123_v38 = vadd.f32 %v6233_v1, %v2947_v6  ;;  %4965 = vmatmul.msk.f32.gmra.mxu2 %vm1918_vm2, %v1844_v44 }
 0x306   : > { %3809 = vst [vmem:[#allocation1 + $0x2] ss:$9 sm:$0xff] %v3285_v4  ;;  %4917 = vmatmul.msk.f32.gmra.mxu1 %vm1107_vm0, %v1093_v48  ;;  %v6375_v4 = vld [vmem:[%s7057_s5] ss:$0 sm:$0xff]  ;;  %v3306_v48 = vperm.slane %v3122_v60, 7 }
 0x307   : > { %3810 = vst [vmem:[#allocation1 + $0x3] ss:$9 sm:$0xff] %v3286_v13  ;;  %v2746_v43 = vadd.f32 %v6375_v4, %v2593_v5  ;;  %v3303_v13 = vperm.slane %v3122_v60, 4  ;;  %v3307_v7 = vperm.slane %v3123_v38, 0  ;;  %v3314_v33 = vperm.slane %v3123_v38, 7 }
 0x308   : > { %3811 = vst [vmem:[#allocation1 + $0x4] ss:$9 sm:$0xff] %v3287_v22 }
 0x309   : > { %3812 = vst [vmem:[#allocation1 + $0x5] ss:$9 sm:$0xff] %v3288_v46  ;;  %v2810_v22 = vmax.f32 %v2746_v43, 0.0  ;;  %v3305_v46 = vperm.slane %v3122_v60, 6 }
 0x30a   : > { %3813 = vst [vmem:[#allocation1 + $0x6] ss:$9 sm:$0xff] %v3289_v2  ;;  %v1097_v2 = vsel %vm1033_vm15, 1.0, %v5172_v62  ;;  %vm4585_vm15 = vcmask 982912  }
 0x30b   : > { %3814 = vst [vmem:[#allocation1 + $0x7] ss:$9 sm:$0xff] %v3290_v63  ;;  %v2878_v50 = vmul.f32 %v6347_v52, %v2810_v22  ;;  %v1506_v63 = vpop.f32.mrf.mxu0 }
 0x30c   : > { %2982 = vadd.xlane.f32.xlu1 %v2981_v37  ;;  %v3309_v37 = vperm.slane %v3123_v38, 2 }
 0x30d   : > { %v2984_v49 = vsel %vm1918_vm2, %v2878_v50, 0.0 }
 0x30e   : > { %4918 = vmatmul.msk.f32.gmra.mxu1 %vm1107_vm0, %v1094_v53  ;;  %v3308_v53 = vperm.slane %v3123_v38, 1 }
 0x312   : > { %v3815_v51 = vld [vmem:[#allocation1] sm:$0xff] }
 0x313   : > { %3816 = vst [vmem:[#allocation1] ss:$9 sm:$0xff] %v3291_v23  ;;  %4348 = vperm.xlu0 %5096, %v6314_v41   ;;  %v6365_v41 = vpop.f32.mrf.mxu3  ;;  %5049 = vmatmul.msk.f32.gmra.mxu3 %vm1918_vm2, %v1503_v26 }
 0x314   : > { %3817 = vst [vmem:[#allocation1 + $0x1] ss:$9 sm:$0xff] %v3292_v8  ;;  %v3310_v8 = vperm.slane %v3123_v38, 3 }
 0x315   : > { %3818 = vst [vmem:[#allocation1 + $0x2] ss:$9 sm:$0xff] %v3293_v32  ;;  %v3311_v32 = vperm.slane %v3123_v38, 4 }
 0x316   : > { %3819 = vst [vmem:[#allocation1 + $0x3] ss:$9 sm:$0xff] %v3294_v16  ;;  %4919 = vmatmul.msk.f32.gmra.mxu1 %vm1107_vm0, %v1095_v14  ;;  %v3313_v16 = vperm.slane %v3123_v38, 6 }
 0x317   : > { %3820 = vst [vmem:[#allocation1 + $0x4] ss:$9 sm:$0xff] %v3295_v45  ;;  %v2194_v45 = vpop.f32.mrf.mxu2 }
 0x318   : > { %3821 = vst [vmem:[#allocation1 + $0x5] ss:$9 sm:$0xff] %v3296_v24  ;;  %v2950_v24 = vpop.xlane.xlu0 %2949  ;;  %v2596_v14 = vadd.f32 %v6079_v31, %v2194_v45 }
 0x319   : > { %3822 = vst [vmem:[#allocation1 + $0x6] ss:$9 sm:$0xff] %v3297_v29  ;;  %v3124_v62 = vadd.f32 %v6233_v1, %v2950_v24  ;;  %v1847_v29 = vpop.f32.mrf.mxu1 }
 0x31a   : > { %3823 = vst [vmem:[#allocation1 + $0x7] ss:$9 sm:$0xff] %v3298_v3  ;;  %4966 = vmatmul.msk.f32.gmra.mxu2 %vm1918_vm2, %v1847_v29  ;;  %v2747_v11 = vadd.f32 %v6375_v4, %v2596_v14 }
 0x31b   : > { %v6386_v47 = vpop.f32.mrf.mxu3  ;;  %5050 = vmatmul.msk.f32.gmra.mxu3 %vm1918_vm2, %v1506_v63  ;;  %v3315_v3 = vperm.slane %v3124_v62, 0  ;;  %v3316_v39 = vperm.slane %v3124_v62, 1  ;;  %v3317_v26 = vperm.slane %v3124_v62, 2  ;;  %v3318_v5 = vperm.slane %v3124_v62, 3 }
 0x31c   : > { %v3320_v43 = vperm.slane %v3124_v62, 5  ;;  %v3322_v31 = vperm.slane %v3124_v62, 7 }
 0x31e   : > { %4920 = vmatmul.msk.f32.gmra.mxu1 %vm1107_vm0, %v1096_v36  ;;  %v3319_v36 = vperm.slane %v3124_v62, 4 }
 0x31f   : > { %v2197_v60 = vpop.f32.mrf.mxu2 }
 0x321   : > { %v6378_v0 = vld [vmem:[#allocation1] sm:$0xff] }
 0x322   : > { %3825 = vst [vmem:[#allocation1] ss:$9 sm:$0xff] %v3299_v20  ;;  %v2811_v20 = vmax.f32 %v2747_v11, 0.0 }
 0x323   : > { %3826 = vst [vmem:[#allocation1 + $0x1] ss:$9 sm:$0xff] %v3300_v19  ;;  %v2599_v19 = vadd.f32 %v6099_v12, %v2197_v60 }
 0x324   : > { %3827 = vst [vmem:[#allocation1 + $0x2] ss:$9 sm:$0xff] %v3301_v27  ;;  %v3321_v27 = vperm.slane %v3124_v62, 6 }
 0x325   : > { %3828 = vst [vmem:[#allocation1 + $0x3] ss:$9 sm:$0xff] %v3302_v25  ;;  %4354 = vperm.xlu1 %5097, %v3815_v51   ;;  %v3312_v51 = vperm.slane %v3123_v38, 5  ;;  %v2953_v25 = vpop.xlane.xlu1 %2952 }
 0x326   : > { %3829 = vst [vmem:[#allocation1 + $0x4] ss:$9 sm:$0xff] %v3303_v13  ;;  %4921 = vmatmul.msk.f32.gmra.mxu1 %vm1107_vm0, %v1097_v2  ;;  %v2748_v13 = vadd.f32 %v6375_v4, %v2599_v19  ;;  %v3125_v22 = vadd.f32 %v6233_v1, %v2953_v25 }
 0x327   : > { %3830 = vst [vmem:[#allocation1 + $0x5] ss:$9 sm:$0xff] %v3304_v28  ;;  %v2879_v28 = vmul.f32 %v6347_v52, %v2811_v20 }
 0x328   : > { %3831 = vst [vmem:[#allocation1 + $0x6] ss:$9 sm:$0xff] %v3305_v46  ;;  %v1850_v46 = vpop.f32.mrf.mxu1  ;;  %v3323_v2 = vperm.slane %v3125_v22, 0  ;;  %v3324_v6 = vperm.slane %v3125_v22, 1  ;;  %v3325_v50 = vperm.slane %v3125_v22, 2  ;;  %v3326_v44 = vperm.slane %v3125_v22, 3 }
 0x329   : > { %3832 = vst [vmem:[#allocation1 + $0x7] ss:$9 sm:$0xff] %v3306_v48  ;;  %v2987_v12 = vsel %vm1918_vm2, %v2879_v28, 0.0  ;;  %4967 = vmatmul.msk.f32.gmra.mxu2 %vm1918_vm2, %v1850_v46  ;;  %v2812_v48 = vmax.f32 %v2748_v13, 0.0 }
 0x32b   : > { %v2880_v38 = vmul.f32 %v6347_v52, %v2812_v48 }
 0x32d   : > { %2985 = vadd.xlane.f32.xlu2 %v2984_v49  ;;  %v3327_v49 = vperm.slane %v3125_v22, 4 }
 0x32e   : > { %4922 = vmatmul.msk.f32.gmra.mxu1 %vm1107_vm0, %v1098_v17  ;;  %v3329_v17 = vperm.slane %v3125_v22, 6  ;;  %vm4533_vm0 = vcmask 130112  }
 0x330   : > { %v3833_v23 = vld [vmem:[#allocation1] sm:$0xff] }
 0x331   : > { %3834 = vst [vmem:[#allocation1] ss:$9 sm:$0xff] %v3307_v7  ;;  %v3328_v7 = vperm.slane %v3125_v22, 5 }
 0x332   : > { %3835 = vst [vmem:[#allocation1 + $0x1] ss:$9 sm:$0xff] %v3308_v53  ;;  %v2990_v53 = vsel %vm1918_vm2, %v2880_v38, 0.0 }
 0x333   : > { %3836 = vst [vmem:[#allocation1 + $0x2] ss:$9 sm:$0xff] %v3309_v37  ;;  %v3330_v37 = vperm.slane %v3125_v22, 7 }
 0x334   : > { %3837 = vst [vmem:[#allocation1 + $0x3] ss:$9 sm:$0xff] %v3310_v8 }
 0x335   : > { %3838 = vst [vmem:[#allocation1 + $0x4] ss:$9 sm:$0xff] %v3311_v32  ;;  %v1853_v32 = vpop.f32.mrf.mxu1 }
 0x336   : > { %3839 = vst [vmem:[#allocation1 + $0x5] ss:$9 sm:$0xff] %v3312_v51  ;;  %4968 = vmatmul.msk.f32.gmra.mxu2 %vm1918_vm2, %v1853_v32  ;;  %v2200_v51 = vpop.f32.mrf.mxu2 }
 0x337   : > { %3840 = vst [vmem:[#allocation1 + $0x6] ss:$9 sm:$0xff] %v3313_v16  ;;  %v2602_v24 = vadd.f32 %v6122_v56, %v2200_v51 }
 0x338   : > { %3841 = vst [vmem:[#allocation1 + $0x7] ss:$9 sm:$0xff] %v3314_v33 }
 0x33d   : > { %2988 = vadd.xlane.f32.xlu0 %v2987_v12 }
 0x33e   : > { %v2203_v48 = vpop.f32.mrf.mxu2 }
 0x33f   : > { %v6399_v35 = vld [vmem:[#allocation1] sm:$0xff] }
 0x340   : > { %3843 = vst [vmem:[#allocation1] ss:$9 sm:$0xff] %v3315_v3 }
 0x341   : > { %3844 = vst [vmem:[#allocation1 + $0x1] ss:$9 sm:$0xff] %v3316_v39  ;;  %v2749_v39 = vadd.f32 %v6375_v4, %v2602_v24 }
 0x342   : > { %3845 = vst [vmem:[#allocation1 + $0x2] ss:$9 sm:$0xff] %v3317_v26  ;;  %v2959_v26 = vpop.xlane.xlu1 %2958 }
 0x343   : > { %3846 = vst [vmem:[#allocation1 + $0x3] ss:$9 sm:$0xff] %v3318_v5  ;;  %v3127_v56 = vadd.f32 %v6233_v1, %v2959_v26  ;;  %v1856_v5 = vpop.f32.mrf.mxu1 }
 0x344   : > { %3847 = vst [vmem:[#allocation1 + $0x4] ss:$9 sm:$0xff] %v3319_v36  ;;  %4969 = vmatmul.msk.f32.gmra.mxu2 %vm1918_vm2, %v1856_v5 }
 0x345   : > { %3848 = vst [vmem:[#allocation1 + $0x5] ss:$9 sm:$0xff] %v3320_v43  ;;  %4360 = vperm.xlu2 %5098, %v3833_v23   ;;  %v2956_v23 = vpop.xlane.xlu0 %2955  ;;  %v3339_v36 = vperm.slane %v3127_v56, 0  ;;  %v3340_v19 = vperm.slane %v3127_v56, 1  ;;  %v3341_v43 = vperm.slane %v3127_v56, 2  ;;  %v3343_v25 = vperm.slane %v3127_v56, 4 }
 0x346   : > { %3849 = vst [vmem:[#allocation1 + $0x6] ss:$9 sm:$0xff] %v3321_v27  ;;  %v3126_v8 = vadd.f32 %v6233_v1, %v2956_v23  ;;  %v3344_v28 = vperm.slane %v3127_v56, 5  ;;  %v3345_v22 = vperm.slane %v3127_v56, 6  ;;  %v3346_v46 = vperm.slane %v3127_v56, 7  ;;  %v2206_v51 = vpop.f32.mrf.mxu2 }
 0x347   : > { %3850 = vst [vmem:[#allocation1 + $0x7] ss:$9 sm:$0xff] %v3322_v31  ;;  %v3342_v31 = vperm.slane %v3127_v56, 3  ;;  %v2608_v24 = vadd.f32 %v6164_v55, %v2206_v51 }
 0x348   : > { %v3331_v16 = vperm.slane %v3126_v8, 0  ;;  %v3332_v45 = vperm.slane %v3126_v8, 1  ;;  %v3333_v33 = vperm.slane %v3126_v8, 2  ;;  %v3334_v29 = vperm.slane %v3126_v8, 3 }
 0x349   : > { %v3335_v14 = vperm.slane %v3126_v8, 4  ;;  %v3336_v3 = vperm.slane %v3126_v8, 5  ;;  %v3337_v11 = vperm.slane %v3126_v8, 6  ;;  %v3338_v60 = vperm.slane %v3126_v8, 7 }
 0x34d   : > { %v2962_v12 = vpop.xlane.xlu0 %2961 }
 0x34e   : > { %v6408_v63 = vld [vmem:[#allocation1] sm:$0xff] }
 0x34f   : > { %3852 = vst [vmem:[#allocation1] ss:$9 sm:$0xff] %v3323_v2  ;;  %2991 = vadd.xlane.f32.xlu1 %v2990_v53  ;;  %v1859_v2 = vpop.f32.mrf.mxu1 }
 0x350   : > { %3853 = vst [vmem:[#allocation1 + $0x1] ss:$9 sm:$0xff] %v3324_v6  ;;  %v2605_v6 = vadd.f32 %v6143_v34, %v2203_v48  ;;  %4970 = vmatmul.msk.f32.gmra.mxu2 %vm1918_vm2, %v1859_v2  ;;  %v2965_v34 = vpop.xlane.xlu1 %2964  ;;  %v6447_v48 = vadd.s32 4294967288, %v5356_v58 }
 0x351   : > { %3854 = vst [vmem:[#allocation1 + $0x2] ss:$9 sm:$0xff] %v3325_v50  ;;  %4357 = vperm.xlu0 %5096, %v6378_v0   ;;  %v2813_v0 = vmax.f32 %v2749_v39, 0.0 }
 0x352   : > { %3855 = vst [vmem:[#allocation1 + $0x3] ss:$9 sm:$0xff] %v3326_v44  ;;  %v2750_v38 = vadd.f32 %v6375_v4, %v2605_v6 }
 0x353   : > { %3856 = vst [vmem:[#allocation1 + $0x4] ss:$9 sm:$0xff] %v3327_v49  ;;  %v2881_v20 = vmul.f32 %v6347_v52, %v2813_v0  ;;  %v2209_v0 = vpop.f32.mrf.mxu2 }
 0x354   : > { %3857 = vst [vmem:[#allocation1 + $0x5] ss:$9 sm:$0xff] %v3328_v7 }
 0x355   : > { %3858 = vst [vmem:[#allocation1 + $0x6] ss:$9 sm:$0xff] %v3329_v17  ;;  %v2993_v13 = vsel %vm1918_vm2, %v2881_v20, 0.0 }
 0x356   : > { %3859 = vst [vmem:[#allocation1 + $0x7] ss:$9 sm:$0xff] %v3330_v37  ;;  %v2814_v37 = vmax.f32 %v2750_v38, 0.0 }
 0x35d   : > { %v6415_v62 = vld [vmem:[#allocation1] sm:$0xff] }
 0x35e   : > { %3861 = vst [vmem:[#allocation1] ss:$9 sm:$0xff] %v3331_v16  ;;  %v2882_v16 = vmul.f32 %v6347_v52, %v2814_v37 }
 0x35f   : > { %3862 = vst [vmem:[#allocation1 + $0x1] ss:$9 sm:$0xff] %v3332_v45  ;;  %v3129_v45 = vadd.f32 %v6233_v1, %v2965_v34 }
 0x360   : > { %3863 = vst [vmem:[#allocation1 + $0x2] ss:$9 sm:$0xff] %v3333_v33  ;;  %v1862_v33 = vpop.f32.mrf.mxu1 }
 0x361   : > { %3864 = vst [vmem:[#allocation1 + $0x3] ss:$9 sm:$0xff] %v3334_v29  ;;  %4971 = vmatmul.msk.f32.gmra.mxu2 %vm1918_vm2, %v1862_v33  ;;  %v2996_v29 = vsel %vm1918_vm2, %v2882_v16, 0.0  ;;  %v3357_v39 = vperm.slane %v3129_v45, 2  ;;  %v3358_v26 = vperm.slane %v3129_v45, 3  ;;  %v3359_v56 = vperm.slane %v3129_v45, 4  ;;  %v4346_v33 = vpop.permute.xlu2 %4345 }
 0x362   : > { %3865 = vst [vmem:[#allocation1 + $0x4] ss:$9 sm:$0xff] %v3335_v14  ;;  %v3355_v14 = vperm.slane %v3129_v45, 0  ;;  %v3360_v55 = vperm.slane %v3129_v45, 5  ;;  %v3362_v20 = vperm.slane %v3129_v45, 7 }
 0x363   : > { %3866 = vst [vmem:[#allocation1 + $0x5] ss:$9 sm:$0xff] %v3336_v3  ;;  %v2751_v3 = vadd.f32 %v6375_v4, %v2608_v24 }
 0x364   : > { %3867 = vst [vmem:[#allocation1 + $0x6] ss:$9 sm:$0xff] %v3337_v11  ;;  %v3356_v11 = vperm.slane %v3129_v45, 1 }
 0x365   : > { %3868 = vst [vmem:[#allocation1 + $0x7] ss:$9 sm:$0xff] %v3338_v60  ;;  %v2815_v5 = vmax.f32 %v2751_v3, 0.0 }
 0x368   : > { %4363 = vperm.xlu1 %5097, %v6399_v35   ;;  %v3128_v35 = vadd.f32 %v6233_v1, %v2962_v12 }
 0x36a   : > { %v3347_v50 = vperm.slane %v3128_v35, 0  ;;  %v3348_v44 = vperm.slane %v3128_v35, 1  ;;  %v3349_v49 = vperm.slane %v3128_v35, 2  ;;  %v3350_v17 = vperm.slane %v3128_v35, 3 }
 0x36b   : > { %v3351_v53 = vperm.slane %v3128_v35, 4  ;;  %v3352_v23 = vperm.slane %v3128_v35, 5  ;;  %v3353_v8 = vperm.slane %v3128_v35, 6  ;;  %v3354_v32 = vperm.slane %v3128_v35, 7 }
 0x36c   : > { %v6422_v27 = vld [vmem:[#allocation1] sm:$0xff] }
 0x36d   : > { %3870 = vst [vmem:[#allocation1] ss:$9 sm:$0xff] %v3339_v36  ;;  %v3361_v36 = vperm.slane %v3129_v45, 6  ;;  %v6462_v45 = vadd.s32 4294967280, %v5356_v58 }
 0x36e   : > { %3871 = vst [vmem:[#allocation1 + $0x1] ss:$9 sm:$0xff] %v3340_v19  ;;  %2994 = vadd.xlane.f32.xlu2 %v2993_v13  ;;  %v2971_v19 = vpop.xlane.xlu1 %2970 }
 0x36f   : > { %3872 = vst [vmem:[#allocation1 + $0x2] ss:$9 sm:$0xff] %v3341_v43  ;;  %v2883_v43 = vmul.f32 %v6347_v52, %v2815_v5 }
 0x370   : > { %3873 = vst [vmem:[#allocation1 + $0x3] ss:$9 sm:$0xff] %v3342_v31 }
 0x371   : > { %3874 = vst [vmem:[#allocation1 + $0x4] ss:$9 sm:$0xff] %v3343_v25  ;;  %v1865_v25 = vpop.f32.mrf.mxu1  ;;  %v2999_v13 = vsel %vm1918_vm2, %v2883_v43, 0.0 }
 0x372   : > { %3875 = vst [vmem:[#allocation1 + $0x5] ss:$9 sm:$0xff] %v3344_v28  ;;  %4972 = vmatmul.msk.f32.gmra.mxu2 %vm1918_vm2, %v1865_v25  ;;  %v6444_v28 = vpop.f32.mrf.mxu2 }
 0x373   : > { %3876 = vst [vmem:[#allocation1 + $0x6] ss:$9 sm:$0xff] %v3345_v22 }
 0x374   : > { %3877 = vst [vmem:[#allocation1 + $0x7] ss:$9 sm:$0xff] %v3346_v46 }
 0x376   : > { %v4343_v35 = vpop.permute.xlu1 %4342 }
 0x37a   : > { %v6457_v34 = vpop.f32.mrf.mxu2 }
 0x37b   : > { %v6429_v7 = vld [vmem:[#allocation1] sm:$0xff]  ;;  %2997 = vadd.xlane.f32.xlu0 %v2996_v29 }
 0x37c   : > { %3879 = vst [vmem:[#allocation1] ss:$9 sm:$0xff] %v3347_v50 }
 0x37d   : > { %3880 = vst [vmem:[#allocation1 + $0x1] ss:$9 sm:$0xff] %v3348_v44  ;;  %v4532_v44 = vperm.slane %v4343_v35, %v6447_v48 }
 0x37e   : > { %3881 = vst [vmem:[#allocation1 + $0x2] ss:$9 sm:$0xff] %v3349_v49 }
 0x37f   : > { %3882 = vst [vmem:[#allocation1 + $0x3] ss:$9 sm:$0xff] %v3350_v17  ;;  %v1868_v17 = vpop.f32.mrf.mxu1 }
 0x380   : > { %3883 = vst [vmem:[#allocation1 + $0x4] ss:$9 sm:$0xff] %v3351_v53  ;;  %4973 = vmatmul.msk.f32.gmra.mxu2 %vm1918_vm2, %v1868_v17 }
 0x381   : > { %3884 = vst [vmem:[#allocation1 + $0x5] ss:$9 sm:$0xff] %v3352_v23 }
 0x382   : > { %3885 = vst [vmem:[#allocation1 + $0x6] ss:$9 sm:$0xff] %v3353_v8 }
 0x383   : > { %3886 = vst [vmem:[#allocation1 + $0x7] ss:$9 sm:$0xff] %v3354_v32  ;;  %v2611_v32 = vadd.f32 %v6181_v21, %v2209_v0 }
 0x385   : > { %v2752_v51 = vadd.f32 %v6375_v4, %v2611_v32 }
 0x386   : > { %4369 = vperm.xlu2 %5098, %v6415_v62   ;;  %v2968_v62 = vpop.xlane.xlu0 %2967 }
 0x387   : > { %v3130_v31 = vadd.f32 %v6233_v1, %v2968_v62  ;;  %v1871_v16 = vpop.f32.mrf.mxu1  ;;  %v2816_v29 = vmax.f32 %v2752_v51, 0.0 }
 0x388   : > { %4974 = vmatmul.msk.f32.gmra.mxu2 %vm1918_vm2, %v1871_v16 }
 0x389   : > { %v3363_v22 = vperm.slane %v3130_v31, 0  ;;  %v3364_v46 = vperm.slane %v3130_v31, 1  ;;  %v3365_v2 = vperm.slane %v3130_v31, 2  ;;  %v3366_v50 = vperm.slane %v3130_v31, 3 }
 0x38a   : > { %v6438_v60 = vld [vmem:[#allocation1] sm:$0xff]  ;;  %v3367_v49 = vperm.slane %v3130_v31, 4  ;;  %v3368_v53 = vperm.slane %v3130_v31, 5  ;;  %v3369_v23 = vperm.slane %v3130_v31, 6  ;;  %v3370_v8 = vperm.slane %v3130_v31, 7 }
 0x38b   : > { %3888 = vst [vmem:[#allocation1] ss:$9 sm:$0xff] %v3355_v14  ;;  %v4536_v14 = vperm.slane %v4346_v33, %v6462_v45 }
 0x38c   : > { %3889 = vst [vmem:[#allocation1 + $0x1] ss:$9 sm:$0xff] %v3356_v11 }
 0x38d   : > { %3890 = vst [vmem:[#allocation1 + $0x2] ss:$9 sm:$0xff] %v3357_v39 }
 0x38e   : > { %3891 = vst [vmem:[#allocation1 + $0x3] ss:$9 sm:$0xff] %v3358_v26  ;;  %v4340_v12 = vpop.permute.xlu0 %4339  ;;  %v6468_v26 = vpop.f32.mrf.mxu2 }
 0x38f   : > { %3892 = vst [vmem:[#allocation1 + $0x4] ss:$9 sm:$0xff] %v3359_v56  ;;  %v4530_v38 = vperm.slane %v4340_v12, %v5356_v58  ;;  %4366 = vperm.xlu0 %5096, %v6408_v63   ;;  %v3131_v63 = vadd.f32 %v6233_v1, %v2971_v19 }
 0x390   : > { %3893 = vst [vmem:[#allocation1 + $0x5] ss:$9 sm:$0xff] %v3360_v55  ;;  %v1874_v55 = vpop.f32.mrf.mxu1 }
 0x391   : > { %3894 = vst [vmem:[#allocation1 + $0x6] ss:$9 sm:$0xff] %v3361_v36  ;;  %v4534_v37 = vsel %vm4533_vm0, %v4532_v44, %v4530_v38  ;;  %v3371_v24 = vperm.slane %v3131_v63, 0  ;;  %v3372_v21 = vperm.slane %v3131_v63, 1  ;;  %v3373_v3 = vperm.slane %v3131_v63, 2  ;;  %4975 = vmatmul.msk.f32.gmra.mxu2 %vm1918_vm2, %v1874_v55 }
 0x392   : > { %3895 = vst [vmem:[#allocation1 + $0x7] ss:$9 sm:$0xff] %v3362_v20  ;;  %3000 = vadd.xlane.f32.xlu1 %v2999_v13  ;;  %v3374_v39 = vperm.slane %v3131_v63, 3  ;;  %v3375_v0 = vperm.slane %v3131_v63, 4  ;;  %v6471_v56 = vsel %vm4537_vm3, %v4536_v14, %v4534_v37  ;;  %v3376_v5 = vperm.slane %v3131_v63, 5 }
 0x393   : > { %v2884_v36 = vmul.f32 %v6347_v52, %v2816_v29  ;;  %v3377_v20 = vperm.slane %v3131_v63, 6  ;;  %v3378_v62 = vperm.slane %v3131_v63, 7  ;;  %v2614_v13 = vadd.f32 %v6202_v30, %v6444_v28 }
 0x395   : > { %v3002_v43 = vsel %vm1918_vm2, %v2884_v36, 0.0 }
 0x396   : > { %v2974_v19 = vpop.xlane.xlu0 %2973 }
 0x397   : > { %v3132_v31 = vadd.f32 %v6233_v1, %v2974_v19 }
 0x398   : > { %v1877_v25 = vpop.f32.mrf.mxu1 }
 0x399   : > { %v6449_v6 = vld [vmem:[#allocation1] sm:$0xff]  ;;  %4976 = vmatmul.msk.f32.gmra.mxu2 %vm1918_vm2, %v1877_v25  ;;  %v3380_v12 = vperm.slane %v3132_v31, 1  ;;  %v3381_v35 = vperm.slane %v3132_v31, 2  ;;  %v3383_v38 = vperm.slane %v3132_v31, 4  ;;  %v3384_v44 = vperm.slane %v3132_v31, 5 }
 0x39a   : > { %3897 = vst [vmem:[#allocation1] ss:$9 sm:$0xff] %v3363_v22  ;;  %v6480_v22 = vpop.f32.mrf.mxu2  ;;  %v3385_v17 = vperm.slane %v3132_v31, 6  ;;  %v3386_v28 = vperm.slane %v3132_v31, 7 }
 0x39b   : > { %3898 = vst [vmem:[#allocation1 + $0x1] ss:$9 sm:$0xff] %v3364_v46  ;;  %v3379_v46 = vperm.slane %v3132_v31, 0 }
 0x39c   : > { %3899 = vst [vmem:[#allocation1 + $0x2] ss:$9 sm:$0xff] %v3365_v2  ;;  %v2753_v2 = vadd.f32 %v6375_v4, %v2614_v13 }
 0x39d   : > { %3900 = vst [vmem:[#allocation1 + $0x3] ss:$9 sm:$0xff] %v3366_v50 }
 0x39e   : > { %3901 = vst [vmem:[#allocation1 + $0x4] ss:$9 sm:$0xff] %v3367_v49  ;;  %v2817_v30 = vmax.f32 %v2753_v2, 0.0 }
 0x39f   : > { %3902 = vst [vmem:[#allocation1 + $0x5] ss:$9 sm:$0xff] %v3368_v53  ;;  %v2977_v53 = vpop.xlane.xlu1 %2976 }
 0x3a0   : > { %3903 = vst [vmem:[#allocation1 + $0x6] ss:$9 sm:$0xff] %v3369_v23  ;;  %v1880_v49 = vpop.f32.mrf.mxu1  ;;  %v3133_v23 = vadd.f32 %v6233_v1, %v2977_v53  ;;  %v6518_v53 = vadd.s32 4294967272, %v5356_v58 }
 0x3a1   : > { %3904 = vst [vmem:[#allocation1 + $0x7] ss:$9 sm:$0xff] %v3370_v8  ;;  %4977 = vmatmul.msk.f32.gmra.mxu2 %vm1918_vm2, %v1880_v49  ;;  %v2885_v8 = vmul.f32 %v6347_v52, %v2817_v30 }
 0x3a2   : > { %v6487_v37 = vpop.f32.mrf.mxu2  ;;  %v3387_v63 = vperm.slane %v3133_v23, 0  ;;  %v3388_v16 = vperm.slane %v3133_v23, 1  ;;  %v3389_v33 = vperm.slane %v3133_v23, 2  ;;  %v3390_v29 = vperm.slane %v3133_v23, 3 }
 0x3a3   : > { %v3005_v51 = vsel %vm1918_vm2, %v2885_v8, 0.0  ;;  %v3394_v55 = vperm.slane %v3133_v23, 7 }
 0x3a8   : > { %v6466_v11 = vld [vmem:[#allocation1] sm:$0xff]  ;;  %v1883_v32 = vpop.f32.mrf.mxu1 }
 0x3a9   : > { %3906 = vst [vmem:[#allocation1] ss:$9 sm:$0xff] %v3371_v24  ;;  %4978 = vmatmul.msk.f32.gmra.mxu2 %vm1918_vm2, %v1883_v32  ;;  %v2620_v32 = vadd.f32 %v6243_v61, %v6468_v26 }
 0x3aa   : > { %3907 = vst [vmem:[#allocation1 + $0x1] ss:$9 sm:$0xff] %v3372_v21  ;;  %v2617_v21 = vadd.f32 %v6221_v9, %v6457_v34  ;;  %v6497_v14 = vpop.f32.mrf.mxu2  ;;  %v2980_v9 = vpop.xlane.xlu0 %2979 }
 0x3ab   : > { %3908 = vst [vmem:[#allocation1 + $0x2] ss:$9 sm:$0xff] %v3373_v3  ;;  %4372 = vperm.xlu1 %5097, %v6422_v27   ;;  %v3382_v27 = vperm.slane %v3132_v31, 3  ;;  %v3391_v3 = vperm.slane %v3133_v23, 4 }
 0x3ac   : > { %3909 = vst [vmem:[#allocation1 + $0x3] ss:$9 sm:$0xff] %v3374_v39  ;;  %v3392_v39 = vperm.slane %v3133_v23, 5  ;;  %v2754_v36 = vadd.f32 %v6375_v4, %v2617_v21 }
 0x3ad   : > { %3910 = vst [vmem:[#allocation1 + $0x4] ss:$9 sm:$0xff] %v3375_v0  ;;  %v3393_v0 = vperm.slane %v3133_v23, 6 }
 0x3ae   : > { %3911 = vst [vmem:[#allocation1 + $0x5] ss:$9 sm:$0xff] %v3376_v5  ;;  %v2818_v34 = vmax.f32 %v2754_v36, 0.0 }
 0x3af   : > { %3912 = vst [vmem:[#allocation1 + $0x6] ss:$9 sm:$0xff] %v3377_v20  ;;  %3003 = vadd.xlane.f32.xlu2 %v3002_v43  ;;  %v3134_v20 = vadd.f32 %v6233_v1, %v2980_v9 }
 0x3b0   : > { %3913 = vst [vmem:[#allocation1 + $0x7] ss:$9 sm:$0xff] %v3378_v62  ;;  %v1886_v5 = vpop.f32.mrf.mxu1  ;;  %v2886_v19 = vmul.f32 %v6347_v52, %v2818_v34 }
 0x3b1   : > { %4979 = vmatmul.msk.f32.gmra.mxu2 %vm1918_vm2, %v1886_v5  ;;  %v3395_v43 = vperm.slane %v3134_v20, 0  ;;  %v3396_v31 = vperm.slane %v3134_v20, 1  ;;  %v3397_v13 = vperm.slane %v3134_v20, 2  ;;  %v3400_v2 = vperm.slane %v3134_v20, 5 }
 0x3b7   : > { %v6484_v50 = vld [vmem:[#allocation1] sm:$0xff] }
 0x3b8   : > { %3915 = vst [vmem:[#allocation1] ss:$9 sm:$0xff] %v3379_v46  ;;  %v1889_v62 = vpop.f32.mrf.mxu1  ;;  %v3398_v46 = vperm.slane %v3134_v20, 3 }
 0x3b9   : > { %3916 = vst [vmem:[#allocation1 + $0x1] ss:$9 sm:$0xff] %v3380_v12  ;;  %3006 = vadd.xlane.f32.xlu0 %v3005_v51  ;;  %4980 = vmatmul.msk.f32.gmra.mxu2 %vm1918_vm2, %v1889_v62  ;;  %v3008_v12 = vsel %vm1918_vm2, %v2886_v19, 0.0 }
 0x3ba   : > { %3917 = vst [vmem:[#allocation1 + $0x2] ss:$9 sm:$0xff] %v3381_v35  ;;  %v3399_v35 = vperm.slane %v3134_v20, 4 }
 0x3bb   : > { %3918 = vst [vmem:[#allocation1 + $0x3] ss:$9 sm:$0xff] %v3382_v27  ;;  %v6512_v27 = vadd.s32 4294967264, %v5356_v58 }
 0x3bc   : > { %3919 = vst [vmem:[#allocation1 + $0x4] ss:$9 sm:$0xff] %v3383_v38  ;;  %v3401_v38 = vperm.slane %v3134_v20, 6 }
 0x3bd   : > { %3920 = vst [vmem:[#allocation1 + $0x5] ss:$9 sm:$0xff] %v3384_v44  ;;  %v2983_v44 = vpop.xlane.xlu1 %2982 }
 0x3be   : > { %3921 = vst [vmem:[#allocation1 + $0x6] ss:$9 sm:$0xff] %v3385_v17  ;;  %v4352_v17 = vpop.permute.xlu2 %4351 }
 0x3bf   : > { %3922 = vst [vmem:[#allocation1 + $0x7] ss:$9 sm:$0xff] %v3386_v28  ;;  %v3402_v28 = vperm.slane %v3134_v20, 7  ;;  %v4544_v8 = vperm.slane %v4352_v17, %v6512_v27 }
 0x3c0   : > { %v1892_v49 = vpop.f32.mrf.mxu1 }
 0x3c5   : > { %v4355_v21 = vpop.permute.xlu1 %4354 }
 0x3c6   : > { %v6493_v24 = vld [vmem:[#allocation1] sm:$0xff] }
 0x3c7   : > { %3924 = vst [vmem:[#allocation1] ss:$9 sm:$0xff] %v3387_v63  ;;  %4378 = vperm.xlu2 %5098, %v6438_v60   ;;  %v6503_v60 = vpop.f32.mrf.mxu2  ;;  %4981 = vmatmul.msk.f32.gmra.mxu2 %vm1918_vm2, %v1892_v49  ;;  %v3135_v63 = vadd.f32 %v6233_v1, %v2983_v44 }
 0x3c8   : > { %3925 = vst [vmem:[#allocation1 + $0x1] ss:$9 sm:$0xff] %v3388_v16 }
 0x3c9   : > { %3926 = vst [vmem:[#allocation1 + $0x2] ss:$9 sm:$0xff] %v3389_v33  ;;  %v1895_v33 = vpop.f32.mrf.mxu1  ;;  %v3404_v26 = vperm.slane %v3135_v63, 1  ;;  %v3405_v5 = vperm.slane %v3135_v63, 2  ;;  %v3407_v34 = vperm.slane %v3135_v63, 4  ;;  %v3408_v20 = vperm.slane %v3135_v63, 5 }
 0x3ca   : > { %3927 = vst [vmem:[#allocation1 + $0x3] ss:$9 sm:$0xff] %v3390_v29  ;;  %v6529_v29 = vadd.s32 4294967256, %v5356_v58  ;;  %v3409_v62 = vperm.slane %v3135_v63, 6  ;;  %v3410_v19 = vperm.slane %v3135_v63, 7 }
 0x3cb   : > { %3928 = vst [vmem:[#allocation1 + $0x4] ss:$9 sm:$0xff] %v3391_v3  ;;  %v2755_v3 = vadd.f32 %v6375_v4, %v2620_v32 }
 0x3cc   : > { %3929 = vst [vmem:[#allocation1 + $0x5] ss:$9 sm:$0xff] %v3392_v39  ;;  %v3403_v39 = vperm.slane %v3135_v63, 0 }
 0x3cd   : > { %3930 = vst [vmem:[#allocation1 + $0x6] ss:$9 sm:$0xff] %v3393_v0  ;;  %4375 = vperm.xlu0 %5096, %v6429_v7   ;;  %v4349_v7 = vpop.permute.xlu0 %4348  ;;  %v4548_v0 = vperm.slane %v4355_v21, %v6529_v29  ;;  %v2819_v9 = vmax.f32 %v2755_v3, 0.0 }
 0x3ce   : > { %3931 = vst [vmem:[#allocation1 + $0x7] ss:$9 sm:$0xff] %v3394_v55  ;;  %v4540_v23 = vperm.slane %v4349_v7, %v6518_v53  ;;  %v3406_v55 = vperm.slane %v3135_v63, 3 }
 0x3cf   : > { %v6514_v30 = vpop.f32.mrf.mxu2  ;;  %4982 = vmatmul.msk.f32.gmra.mxu2 %vm1918_vm2, %v1895_v33 }
 0x3d0   : > { %v4542_v51 = vsel %vm4541_vm4, %v4540_v23, %v6471_v56 }
 0x3d1   : > { %v4546_v16 = vsel %vm4545_vm5, %v4544_v8, %v4542_v51 }
 0x3d2   : > { %v6539_v36 = vsel %vm4549_vm6, %v4548_v0, %v4546_v16 }
 0x3d5   : > { %v6507_v25 = vld [vmem:[#allocation1] sm:$0xff]  ;;  %3009 = vadd.xlane.f32.xlu1 %v3008_v12 }
 0x3d6   : > { %3933 = vst [vmem:[#allocation1] ss:$9 sm:$0xff] %v3395_v43  ;;  %v1898_v43 = vpop.f32.mrf.mxu1 }
 0x3d7   : > { %3934 = vst [vmem:[#allocation1 + $0x1] ss:$9 sm:$0xff] %v3396_v31  ;;  %v6536_v56 = vpop.f32.mrf.mxu2  ;;  %v2986_v31 = vpop.xlane.xlu2 %2985  ;;  %4983 = vmatmul.msk.f32.gmra.mxu2 %vm1918_vm2, %v1898_v43 }
 0x3d8   : > { %3935 = vst [vmem:[#allocation1 + $0x2] ss:$9 sm:$0xff] %v3397_v13  ;;  %v2887_v13 = vmul.f32 %v6347_v52, %v2819_v9  ;;  %v2992_v43 = vpop.xlane.xlu1 %2991 }
 0x3d9   : > { %3936 = vst [vmem:[#allocation1 + $0x3] ss:$9 sm:$0xff] %v3398_v46  ;;  %v3136_v46 = vadd.f32 %v6233_v1, %v2986_v31  ;;  %v2626_v31 = vadd.f32 %v6271_v40, %v6487_v37 }
 0x3da   : > { %3937 = vst [vmem:[#allocation1 + $0x4] ss:$9 sm:$0xff] %v3399_v35  ;;  %v3011_v35 = vsel %vm1918_vm2, %v2887_v13, 0.0  ;;  %v3138_v13 = vadd.f32 %v6233_v1, %v2992_v43 }
 0x3db   : > { %3938 = vst [vmem:[#allocation1 + $0x5] ss:$9 sm:$0xff] %v3400_v2  ;;  %v2623_v2 = vadd.f32 %v6257_v42, %v6480_v22  ;;  %v3412_v49 = vperm.slane %v3136_v46, 1  ;;  %v3414_v23 = vperm.slane %v3136_v46, 3  ;;  %v3415_v8 = vperm.slane %v3136_v46, 4 }
 0x3dc   : > { %3939 = vst [vmem:[#allocation1 + $0x6] ss:$9 sm:$0xff] %v3401_v38  ;;  %v3411_v38 = vperm.slane %v3136_v46, 0  ;;  %v3416_v32 = vperm.slane %v3136_v46, 5  ;;  %v3417_v42 = vperm.slane %v3136_v46, 6  ;;  %v3418_v51 = vperm.slane %v3136_v46, 7 }
 0x3dd   : > { %3940 = vst [vmem:[#allocation1 + $0x7] ss:$9 sm:$0xff] %v3402_v28  ;;  %v3413_v28 = vperm.slane %v3136_v46, 2  ;;  %v2756_v7 = vadd.f32 %v6375_v4, %v2623_v2  ;;  %v2757_v46 = vadd.f32 %v6375_v4, %v2626_v31  ;;  %v3427_v2 = vperm.slane %v3138_v13, 0  ;;  %v6606_v31 = vld [vmem:[%s7057_s5] ss:$0 sm:$0xff] }
 0x3de   : > { %v1901_v44 = vpop.f32.mrf.mxu1  ;;  %v3430_v40 = vperm.slane %v3138_v13, 3 }
 0x3df   : > { %v6544_v12 = vpop.f32.mrf.mxu2  ;;  %4984 = vmatmul.msk.f32.gmra.mxu2 %vm1918_vm2, %v1901_v44  ;;  %v2820_v22 = vmax.f32 %v2756_v7, 0.0  ;;  %v3428_v44 = vperm.slane %v3138_v13, 1 }
 0x3e1   : > { %v2888_v21 = vmul.f32 %v6347_v52, %v2820_v22  ;;  %v4364_v22 = vpop.permute.xlu1 %4363 }
 0x3e3   : > { %v3014_v0 = vsel %vm1918_vm2, %v2888_v21, 0.0 }
 0x3e4   : > { %v6533_v61 = vld [vmem:[#allocation1] sm:$0xff] }
 0x3e5   : > { %3942 = vst [vmem:[#allocation1] ss:$9 sm:$0xff] %v3403_v39 }
 0x3e6   : > { %3943 = vst [vmem:[#allocation1 + $0x1] ss:$9 sm:$0xff] %v3404_v26  ;;  %v1904_v16 = vpop.f32.mrf.mxu1 }
 0x3e7   : > { %3944 = vst [vmem:[#allocation1 + $0x2] ss:$9 sm:$0xff] %v3405_v5  ;;  %v6554_v63 = vpop.f32.mrf.mxu2  ;;  %4985 = vmatmul.msk.f32.gmra.mxu2 %vm1918_vm2, %v1904_v16 }
 0x3e8   : > { %3945 = vst [vmem:[#allocation1 + $0x3] ss:$9 sm:$0xff] %v3406_v55 }
 0x3e9   : > { %3946 = vst [vmem:[#allocation1 + $0x4] ss:$9 sm:$0xff] %v3407_v34 }
 0x3ea   : > { %3947 = vst [vmem:[#allocation1 + $0x5] ss:$9 sm:$0xff] %v3408_v20 }
 0x3eb   : > { %3948 = vst [vmem:[#allocation1 + $0x6] ss:$9 sm:$0xff] %v3409_v62 }
 0x3ec   : > { %3949 = vst [vmem:[#allocation1 + $0x7] ss:$9 sm:$0xff] %v3410_v19 }
 0x3ee   : > { %4381 = vperm.xlu1 %5097, %v6449_v6   ;;  %v2989_v6 = vpop.xlane.xlu0 %2988  ;;  %v1907_v55 = vpop.f32.mrf.mxu1 }
 0x3ef   : > { %v3137_v33 = vadd.f32 %v6233_v1, %v2989_v6  ;;  %v6562_v34 = vpop.f32.mrf.mxu2  ;;  %4986 = vmatmul.msk.f32.gmra.mxu2 %vm1918_vm2, %v1907_v55  ;;  %v6583_v6 = vadd.s32 4294967232, %v5356_v58 }
 0x3f0   : > { %3012 = vadd.xlane.f32.xlu2 %v3011_v35  ;;  %v6571_v35 = vadd.s32 4294967240, %v5356_v58 }
 0x3f1   : > { %v3419_v3 = vperm.slane %v3137_v33, 0  ;;  %v3420_v39 = vperm.slane %v3137_v33, 1  ;;  %v3421_v26 = vperm.slane %v3137_v33, 2  ;;  %v3422_v9 = vperm.slane %v3137_v33, 3 }
 0x3f2   : > { %v3423_v20 = vperm.slane %v3137_v33, 4  ;;  %v3424_v62 = vperm.slane %v3137_v33, 5  ;;  %v3425_v19 = vperm.slane %v3137_v33, 6  ;;  %v3426_v52 = vperm.slane %v3137_v33, 7 }
 0x3f3   : > { %v6550_v17 = vld [vmem:[#allocation1] sm:$0xff]  ;;  %v3434_v33 = vperm.slane %v3138_v13, 7  ;;  %v4560_v21 = vperm.slane %v4364_v22, %v6583_v6 }
 0x3f4   : > { %3951 = vst [vmem:[#allocation1] ss:$9 sm:$0xff] %v3411_v38  ;;  %v4361_v38 = vpop.permute.xlu2 %4360 }
 0x3f5   : > { %3952 = vst [vmem:[#allocation1 + $0x1] ss:$9 sm:$0xff] %v3412_v49  ;;  %v6574_v49 = vadd.s32 4294967248, %v5356_v58  ;;  %v4556_v4 = vperm.slane %v4361_v38, %v6571_v35 }
 0x3f6   : > { %3953 = vst [vmem:[#allocation1 + $0x2] ss:$9 sm:$0xff] %v3413_v28  ;;  %v4358_v28 = vpop.permute.xlu0 %4357 }
 0x3f7   : > { %3954 = vst [vmem:[#allocation1 + $0x3] ss:$9 sm:$0xff] %v3414_v23  ;;  %3015 = vadd.xlane.f32.xlu0 %v3014_v0  ;;  %v4552_v37 = vperm.slane %v4358_v28, %v6574_v49  ;;  %v2821_v23 = vmax.f32 %v2757_v46, 0.0 }
 0x3f8   : > { %3955 = vst [vmem:[#allocation1 + $0x4] ss:$9 sm:$0xff] %v3415_v8  ;;  %v3431_v8 = vperm.slane %v3138_v13, 4 }
 0x3f9   : > { %3956 = vst [vmem:[#allocation1 + $0x5] ss:$9 sm:$0xff] %v3416_v32  ;;  %v3432_v32 = vperm.slane %v3138_v13, 5 }
 0x3fa   : > { %3957 = vst [vmem:[#allocation1 + $0x6] ss:$9 sm:$0xff] %v3417_v42  ;;  %v4554_v42 = vsel %vm4553_vm7, %v4552_v37, %v6539_v36  ;;  %v6591_v36 = vld [vmem:[%s7058_s6] ss:$0 sm:$0xff] }
 0x3fb   : > { %3958 = vst [vmem:[#allocation1 + $0x7] ss:$9 sm:$0xff] %v3418_v51  ;;  %v3433_v51 = vperm.slane %v3138_v13, 6  ;;  %v4558_v16 = vsel %vm4557_vm8, %v4556_v4, %v4554_v42 }
 0x402   : > { %v6560_v5 = vld [vmem:[#allocation1] sm:$0xff] }
 0x403   : > { %3960 = vst [vmem:[#allocation1] ss:$9 sm:$0xff] %v3419_v3  ;;  %v2889_v3 = vmul.f32 %v6591_v36, %v2821_v23  ;;  %v2632_v23 = vadd.f32 %v6291_v10, %v6503_v60  ;;  %v6619_v60 = vadd.s32 4294967224, %v5356_v58 }
 0x404   : > { %3961 = vst [vmem:[#allocation1 + $0x1] ss:$9 sm:$0xff] %v3420_v39  ;;  %v6595_v39 = vsel %vm4561_vm9, %v4560_v21, %v4558_v16 }
 0x405   : > { %3962 = vst [vmem:[#allocation1 + $0x2] ss:$9 sm:$0xff] %v3421_v26  ;;  %v2995_v26 = vpop.xlane.xlu2 %2994  ;;  %v3017_v0 = vsel %vm1918_vm2, %v2889_v3, 0.0  ;;  %v2759_v16 = vadd.f32 %v6606_v31, %v2632_v23 }
 0x406   : > { %3963 = vst [vmem:[#allocation1 + $0x3] ss:$9 sm:$0xff] %v3422_v9  ;;  %v3139_v55 = vadd.f32 %v6233_v1, %v2995_v26  ;;  %v2629_v9 = vadd.f32 %v6282_v57, %v6497_v14  ;;  %v2998_v57 = vpop.xlane.xlu0 %2997  ;;  %v3001_v26 = vpop.xlane.xlu1 %3000 }
 0x407   : > { %3964 = vst [vmem:[#allocation1 + $0x4] ss:$9 sm:$0xff] %v3423_v20  ;;  %v2823_v10 = vmax.f32 %v2759_v16, 0.0 }
 0x408   : > { %3965 = vst [vmem:[#allocation1 + $0x5] ss:$9 sm:$0xff] %v3424_v62  ;;  %4387 = vperm.xlu2 %5098, %v6484_v50   ;;  %v3429_v50 = vperm.slane %v3138_v13, 2  ;;  %v3436_v20 = vperm.slane %v3139_v55, 1  ;;  %v3439_v43 = vperm.slane %v3139_v55, 4  ;;  %v2758_v13 = vadd.f32 %v6606_v31, %v2629_v9 }
 0x409   : > { %3966 = vst [vmem:[#allocation1 + $0x6] ss:$9 sm:$0xff] %v3425_v19  ;;  %v3437_v19 = vperm.slane %v3139_v55, 2  ;;  %v3440_v46 = vperm.slane %v3139_v55, 5  ;;  %v3442_v14 = vperm.slane %v3139_v55, 7  ;;  %v2891_v3 = vmul.f32 %v6591_v36, %v2823_v10 }
 0x40a   : > { %3967 = vst [vmem:[#allocation1 + $0x7] ss:$9 sm:$0xff] %v3426_v52  ;;  %v3438_v52 = vperm.slane %v3139_v55, 3  ;;  %v2822_v38 = vmax.f32 %v2758_v13, 0.0 }
 0x40b   : > { %4384 = vperm.xlu0 %5096, %v6466_v11   ;;  %v3435_v11 = vperm.slane %v3139_v55, 0 }
 0x40d   : > { %v4370_v9 = vpop.permute.xlu2 %4369 }
 0x40e   : > { %v4367_v21 = vpop.permute.xlu0 %4366 }
 0x411   : > { %v6576_v7 = vld [vmem:[#allocation1] sm:$0xff] }
 0x412   : > { %3969 = vst [vmem:[#allocation1] ss:$9 sm:$0xff] %v3427_v2  ;;  %v3441_v2 = vperm.slane %v3139_v55, 6  ;;  %v3141_v55 = vadd.f32 %v6233_v1, %v3001_v26 }
 0x413   : > { %3970 = vst [vmem:[#allocation1 + $0x1] ss:$9 sm:$0xff] %v3428_v44  ;;  %v3140_v44 = vadd.f32 %v6233_v1, %v2998_v57 }
 0x414   : > { %3971 = vst [vmem:[#allocation1 + $0x2] ss:$9 sm:$0xff] %v3429_v50  ;;  %v2890_v50 = vmul.f32 %v6591_v36, %v2822_v38  ;;  %v3454_v13 = vperm.slane %v3141_v55, 3  ;;  %v3457_v57 = vperm.slane %v3141_v55, 6 }
 0x415   : > { %3972 = vst [vmem:[#allocation1 + $0x3] ss:$9 sm:$0xff] %v3430_v40  ;;  %v3443_v28 = vperm.slane %v3140_v44, 0  ;;  %v3444_v40 = vperm.slane %v3140_v44, 1  ;;  %v3445_v37 = vperm.slane %v3140_v44, 2  ;;  %v3448_v22 = vperm.slane %v3140_v44, 5 }
 0x416   : > { %3973 = vst [vmem:[#allocation1 + $0x4] ss:$9 sm:$0xff] %v3431_v8  ;;  %v3446_v8 = vperm.slane %v3140_v44, 3  ;;  %v3020_v42 = vsel %vm1918_vm2, %v2890_v50, 0.0 }
 0x417   : > { %3974 = vst [vmem:[#allocation1 + $0x5] ss:$9 sm:$0xff] %v3432_v32  ;;  %v3447_v32 = vperm.slane %v3140_v44, 4 }
 0x418   : > { %3975 = vst [vmem:[#allocation1 + $0x6] ss:$9 sm:$0xff] %v3433_v51  ;;  %3018 = vadd.xlane.f32.xlu1 %v3017_v0  ;;  %v3449_v51 = vperm.slane %v3140_v44, 6  ;;  %v4564_v0 = vperm.slane %v4367_v21, %v6619_v60 }
 0x419   : > { %3976 = vst [vmem:[#allocation1 + $0x7] ss:$9 sm:$0xff] %v3434_v33  ;;  %v3450_v33 = vperm.slane %v3140_v44, 7  ;;  %v2635_v44 = vadd.f32 %v6305_v59, %v6514_v30  ;;  %v6641_v59 = vadd.s32 4294967208, %v5356_v58 }
 0x41b   : > { %v2760_v23 = vadd.f32 %v6606_v31, %v2635_v44  ;;  %v2641_v44 = vadd.f32 %v6350_v18, %v6544_v12 }
 0x41d   : > { %v4373_v30 = vpop.permute.xlu1 %4372  ;;  %v2824_v16 = vmax.f32 %v2760_v23, 0.0  ;;  %v6663_v23 = vadd.s32 4294967192, %v5356_v58 }
 0x41e   : > { %v4572_v10 = vperm.slane %v4373_v30, %v6641_v59 }
 0x41f   : > { %v2892_v26 = vmul.f32 %v6591_v36, %v2824_v16 }
 0x420   : > { %v6601_v62 = vld [vmem:[#allocation1] sm:$0xff] }
 0x421   : > { %3978 = vst [vmem:[#allocation1] ss:$9 sm:$0xff] %v3435_v11  ;;  %v3023_v11 = vsel %vm1918_vm2, %v2891_v3, 0.0 }
 0x422   : > { %3979 = vst [vmem:[#allocation1 + $0x1] ss:$9 sm:$0xff] %v3436_v20  ;;  %v3451_v20 = vperm.slane %v3141_v55, 0  ;;  %v3004_v38 = vpop.xlane.xlu2 %3003 }
 0x423   : > { %3980 = vst [vmem:[#allocation1 + $0x2] ss:$9 sm:$0xff] %v3437_v19  ;;  %v3452_v19 = vperm.slane %v3141_v55, 1 }
 0x424   : > { %3981 = vst [vmem:[#allocation1 + $0x3] ss:$9 sm:$0xff] %v3438_v52 }
 0x425   : > { %3982 = vst [vmem:[#allocation1 + $0x4] ss:$9 sm:$0xff] %v3439_v43  ;;  %v3453_v43 = vperm.slane %v3141_v55, 2 }
 0x426   : > { %3983 = vst [vmem:[#allocation1 + $0x5] ss:$9 sm:$0xff] %v3440_v46  ;;  %v3455_v46 = vperm.slane %v3141_v55, 4 }
 0x427   : > { %3984 = vst [vmem:[#allocation1 + $0x6] ss:$9 sm:$0xff] %v3441_v2  ;;  %v3456_v2 = vperm.slane %v3141_v55, 5 }
 0x428   : > { %3985 = vst [vmem:[#allocation1 + $0x7] ss:$9 sm:$0xff] %v3442_v14  ;;  %v3458_v14 = vperm.slane %v3141_v55, 7  ;;  %v2638_v55 = vadd.f32 %v6326_v15, %v6536_v56  ;;  %v6656_v15 = vadd.s32 4294967200, %v5356_v58 }
 0x42f   : > { %v6613_v4 = vld [vmem:[#allocation1] sm:$0xff] }
 0x430   : > { %3987 = vst [vmem:[#allocation1] ss:$9 sm:$0xff] %v3443_v28  ;;  %v6634_v28 = vadd.s32 4294967216, %v5356_v58 }
 0x431   : > { %3988 = vst [vmem:[#allocation1 + $0x1] ss:$9 sm:$0xff] %v3444_v40  ;;  %3021 = vadd.xlane.f32.xlu2 %v3020_v42  ;;  %4390 = vperm.xlu1 %5097, %v6493_v24   ;;  %v4566_v24 = vsel %vm4565_vm10, %v4564_v0, %v6595_v39  ;;  %v3142_v39 = vadd.f32 %v6233_v1, %v3004_v38  ;;  %v3026_v0 = vsel %vm1918_vm2, %v2892_v26, 0.0 }
 0x432   : > { %3989 = vst [vmem:[#allocation1 + $0x2] ss:$9 sm:$0xff] %v3445_v37 }
 0x433   : > { %3990 = vst [vmem:[#allocation1 + $0x3] ss:$9 sm:$0xff] %v3446_v8  ;;  %v3459_v50 = vperm.slane %v3142_v39, 0  ;;  %v3460_v40 = vperm.slane %v3142_v39, 1  ;;  %v3461_v8 = vperm.slane %v3142_v39, 2  ;;  %v3462_v42 = vperm.slane %v3142_v39, 3 }
 0x434   : > { %3991 = vst [vmem:[#allocation1 + $0x4] ss:$9 sm:$0xff] %v3447_v32  ;;  %v4568_v32 = vperm.slane %v4370_v9, %v6634_v28  ;;  %v3466_v21 = vperm.slane %v3142_v39, 7  ;;  %v2761_v9 = vadd.f32 %v6606_v31, %v2638_v55 }
 0x435   : > { %3992 = vst [vmem:[#allocation1 + $0x5] ss:$9 sm:$0xff] %v3448_v22  ;;  %3024 = vadd.xlane.f32.xlu0 %v3023_v11  ;;  %v3464_v22 = vperm.slane %v3142_v39, 5 }
 0x436   : > { %3993 = vst [vmem:[#allocation1 + $0x6] ss:$9 sm:$0xff] %v3449_v51  ;;  %v4570_v51 = vsel %vm4569_vm11, %v4568_v32, %v4566_v24 }
 0x437   : > { %3994 = vst [vmem:[#allocation1 + $0x7] ss:$9 sm:$0xff] %v3450_v33  ;;  %v3465_v33 = vperm.slane %v3142_v39, 6  ;;  %v4574_v3 = vsel %vm4573_vm12, %v4572_v10, %v4570_v51  ;;  %v6671_v51 = vadd.s32 4294967184, %v5356_v58 }
 0x43e   : > { %v6627_v52 = vld [vmem:[#allocation1] sm:$0xff] }
 0x43f   : > { %3996 = vst [vmem:[#allocation1] ss:$9 sm:$0xff] %v3451_v20 }
 0x440   : > { %3997 = vst [vmem:[#allocation1 + $0x1] ss:$9 sm:$0xff] %v3452_v19 }
 0x441   : > { %3998 = vst [vmem:[#allocation1 + $0x2] ss:$9 sm:$0xff] %v3453_v43 }
 0x442   : > { %3999 = vst [vmem:[#allocation1 + $0x3] ss:$9 sm:$0xff] %v3454_v13 }
 0x443   : > { %4000 = vst [vmem:[#allocation1 + $0x4] ss:$9 sm:$0xff] %v3455_v46 }
 0x444   : > { %4001 = vst [vmem:[#allocation1 + $0x5] ss:$9 sm:$0xff] %v3456_v2  ;;  %v2825_v2 = vmax.f32 %v2761_v9, 0.0 }
 0x445   : > { %4002 = vst [vmem:[#allocation1 + $0x6] ss:$9 sm:$0xff] %v3457_v57 }
 0x446   : > { %4003 = vst [vmem:[#allocation1 + $0x7] ss:$9 sm:$0xff] %v3458_v14 }
 0x449   : > { %4396 = vperm.xlu2 %5098, %v6533_v61   ;;  %v3463_v61 = vperm.slane %v3142_v39, 4  ;;  %4393 = vperm.xlu0 %5096, %v6507_v25   ;;  %v3007_v25 = vpop.xlane.xlu0 %3006  ;;  %v3010_v39 = vpop.xlane.xlu1 %3009 }
 0x44a   : > { %v3143_v11 = vadd.f32 %v6233_v1, %v3007_v25  ;;  %v3144_v32 = vadd.f32 %v6233_v1, %v3010_v39 }
 0x44c   : > { %v3467_v24 = vperm.slane %v3143_v11, 0  ;;  %v3468_v20 = vperm.slane %v3143_v11, 1  ;;  %v3469_v19 = vperm.slane %v3143_v11, 2  ;;  %v3470_v13 = vperm.slane %v3143_v11, 3 }
 0x44d   : > { %v6636_v37 = vld [vmem:[#allocation1] sm:$0xff]  ;;  %v3471_v46 = vperm.slane %v3143_v11, 4  ;;  %v3472_v57 = vperm.slane %v3143_v11, 5  ;;  %v3473_v14 = vperm.slane %v3143_v11, 6  ;;  %v3474_v38 = vperm.slane %v3143_v11, 7 }
 0x44e   : > { %4005 = vst [vmem:[#allocation1] ss:$9 sm:$0xff] %v3459_v50  ;;  %v3475_v12 = vperm.slane %v3144_v32, 0  ;;  %v3477_v10 = vperm.slane %v3144_v32, 2  ;;  %v3478_v26 = vperm.slane %v3144_v32, 3  ;;  %v3479_v55 = vperm.slane %v3144_v32, 4 }
 0x44f   : > { %4006 = vst [vmem:[#allocation1 + $0x1] ss:$9 sm:$0xff] %v3460_v40  ;;  %v2893_v40 = vmul.f32 %v6591_v36, %v2825_v2  ;;  %v3480_v25 = vperm.slane %v3144_v32, 5  ;;  %v3481_v9 = vperm.slane %v3144_v32, 6 }
 0x450   : > { %4007 = vst [vmem:[#allocation1 + $0x2] ss:$9 sm:$0xff] %v3461_v8 }
 0x451   : > { %4008 = vst [vmem:[#allocation1 + $0x3] ss:$9 sm:$0xff] %v3462_v42  ;;  %v4376_v56 = vpop.permute.xlu0 %4375  ;;  %v4379_v42 = vpop.permute.xlu2 %4378  ;;  %v3029_v30 = vsel %vm1918_vm2, %v2893_v40, 0.0 }
 0x452   : > { %4009 = vst [vmem:[#allocation1 + $0x4] ss:$9 sm:$0xff] %v3463_v61  ;;  %v4576_v50 = vperm.slane %v4376_v56, %v6656_v15  ;;  %v2762_v61 = vadd.f32 %v6606_v31, %v2641_v44  ;;  %v4580_v18 = vperm.slane %v4379_v42, %v6663_v23 }
 0x453   : > { %4010 = vst [vmem:[#allocation1 + $0x5] ss:$9 sm:$0xff] %v3464_v22  ;;  %v3476_v22 = vperm.slane %v3144_v32, 1 }
 0x454   : > { %4011 = vst [vmem:[#allocation1 + $0x6] ss:$9 sm:$0xff] %v3465_v33  ;;  %v4578_v8 = vsel %vm4577_vm13, %v4576_v50, %v4574_v3  ;;  %v2826_v33 = vmax.f32 %v2762_v61, 0.0 }
 0x455   : > { %4012 = vst [vmem:[#allocation1 + $0x7] ss:$9 sm:$0xff] %v3466_v21  ;;  %v4582_v21 = vsel %vm4581_vm14, %v4580_v18, %v4578_v8  ;;  %v2644_v18 = vadd.f32 %v6365_v41, %v6554_v63 }
 0x45b   : > { %3027 = vadd.xlane.f32.xlu1 %v3026_v0 }
 0x45c   : > { %v6653_v43 = vld [vmem:[#allocation1] sm:$0xff] }
 0x45d   : > { %4014 = vst [vmem:[#allocation1] ss:$9 sm:$0xff] %v3467_v24  ;;  %v2894_v24 = vmul.f32 %v6591_v36, %v2826_v33  ;;  %v2763_v33 = vadd.f32 %v6606_v31, %v2644_v18 }
 0x45e   : > { %4015 = vst [vmem:[#allocation1 + $0x1] ss:$9 sm:$0xff] %v3468_v20  ;;  %v3482_v20 = vperm.slane %v3144_v32, 7 }
 0x45f   : > { %4016 = vst [vmem:[#allocation1 + $0x2] ss:$9 sm:$0xff] %v3469_v19 }
 0x460   : > { %4017 = vst [vmem:[#allocation1 + $0x3] ss:$9 sm:$0xff] %v3470_v13  ;;  %v4382_v16 = vpop.permute.xlu1 %4381  ;;  %v3032_v13 = vsel %vm1918_vm2, %v2894_v24, 0.0 }
 0x461   : > { %4018 = vst [vmem:[#allocation1 + $0x4] ss:$9 sm:$0xff] %v3471_v46  ;;  %v4584_v0 = vperm.slane %v4382_v16, %v6671_v51 }
 0x462   : > { %4019 = vst [vmem:[#allocation1 + $0x5] ss:$9 sm:$0xff] %v3472_v57 }
 0x463   : > { %4020 = vst [vmem:[#allocation1 + $0x6] ss:$9 sm:$0xff] %v3473_v14  ;;  %v4586_v11 = vsel %vm4585_vm15, %v4584_v0, %v4582_v21  ;;  %v3013_v19 = vpop.xlane.xlu2 %3012 }
 0x464   : > { %4021 = vst [vmem:[#allocation1 + $0x7] ss:$9 sm:$0xff] %v3474_v38  ;;  %v6685_v38 = vadd.s32 4294967176, %v5356_v58 }
 0x46a   : > { %v3016_v46 = vpop.xlane.xlu0 %3015 }
 0x46b   : > { %v6674_v3 = vld [vmem:[#allocation1] sm:$0xff] }
 0x46c   : > { %4023 = vst [vmem:[#allocation1] ss:$9 sm:$0xff] %v3475_v12 }
 0x46d   : > { %4024 = vst [vmem:[#allocation1 + $0x1] ss:$9 sm:$0xff] %v3476_v22 }
 0x46e   : > { %4025 = vst [vmem:[#allocation1 + $0x2] ss:$9 sm:$0xff] %v3477_v10 }
 0x46f   : > { %4026 = vst [vmem:[#allocation1 + $0x3] ss:$9 sm:$0xff] %v3478_v26 }
 0x470   : > { %4027 = vst [vmem:[#allocation1 + $0x4] ss:$9 sm:$0xff] %v3479_v55  ;;  %v2827_v55 = vmax.f32 %v2763_v33, 0.0 }
 0x471   : > { %4028 = vst [vmem:[#allocation1 + $0x5] ss:$9 sm:$0xff] %v3480_v25 }
 0x472   : > { %3030 = vadd.xlane.f32.xlu2 %v3029_v30  ;;  %4029 = vst [vmem:[#allocation1 + $0x6] ss:$9 sm:$0xff] %v3481_v9  ;;  %v3146_v30 = vadd.f32 %v6233_v1, %v3016_v46 }
 0x473   : > { %4030 = vst [vmem:[#allocation1 + $0x7] ss:$9 sm:$0xff] %v3482_v20  ;;  %3033 = vadd.xlane.f32.xlu0 %v3032_v13  ;;  %v2647_v20 = vadd.f32 %v6386_v47, %v6562_v34 }
 0x474   : > { %4399 = vperm.xlu1 %5097, %v6550_v17   ;;  %v3145_v17 = vadd.f32 %v6233_v1, %v3013_v19  ;;  %v3491_v12 = vperm.slane %v3146_v30, 0  ;;  %v3492_v22 = vperm.slane %v3146_v30, 1  ;;  %v3493_v16 = vperm.slane %v3146_v30, 2  ;;  %v4388_v19 = vpop.permute.xlu2 %4387 }
 0x475   : > { %v3494_v10 = vperm.slane %v3146_v30, 3  ;;  %v3495_v21 = vperm.slane %v3146_v30, 4  ;;  %v3496_v26 = vperm.slane %v3146_v30, 5  ;;  %v3497_v0 = vperm.slane %v3146_v30, 6 }
 0x476   : > { %v3483_v2 = vperm.slane %v3145_v17, 0  ;;  %v3484_v57 = vperm.slane %v3145_v17, 1  ;;  %v3485_v56 = vperm.slane %v3145_v17, 2  ;;  %v3486_v39 = vperm.slane %v3145_v17, 3 }
 0x477   : > { %v3487_v44 = vperm.slane %v3145_v17, 4  ;;  %v3488_v40 = vperm.slane %v3145_v17, 5  ;;  %v3489_v32 = vperm.slane %v3145_v17, 6  ;;  %v3490_v42 = vperm.slane %v3145_v17, 7 }
 0x478   : > { %v3498_v25 = vperm.slane %v3146_v30, 7  ;;  %v4591_v47 = vperm.slane %v4388_v19, %v5356_v58 }
 0x47a   : > { %v6682_v14 = vld [vmem:[#allocation1] sm:$0xff] }
 0x47b   : > { %4032 = vst [vmem:[#allocation1] ss:$9 sm:$0xff] %v3483_v2 }
 0x47c   : > { %4033 = vst [vmem:[#allocation1 + $0x1] ss:$9 sm:$0xff] %v3484_v57 }
 0x47d   : > { %4034 = vst [vmem:[#allocation1 + $0x2] ss:$9 sm:$0xff] %v3485_v56  ;;  %v4385_v50 = vpop.permute.xlu0 %4384  ;;  %v2764_v56 = vadd.f32 %v6606_v31, %v2647_v20 }
 0x47e   : > { %4035 = vst [vmem:[#allocation1 + $0x3] ss:$9 sm:$0xff] %v3486_v39  ;;  %v4588_v8 = vperm.slane %v4385_v50, %v6685_v38 }
 0x47f   : > { %4036 = vst [vmem:[#allocation1 + $0x4] ss:$9 sm:$0xff] %v3487_v44 }
 0x480   : > { %4037 = vst [vmem:[#allocation1 + $0x5] ss:$9 sm:$0xff] %v3488_v40  ;;  %v6690_v61 = vsel %vm7061_vm1, %v4588_v8, %v4586_v11  ;;  %v2248_v40 = vpop.f32.mrf.mxu2  ;;  %v2649_v8 = vpop.f32.mrf.mxu3 }
 0x481   : > { %4038 = vst [vmem:[#allocation1 + $0x6] ss:$9 sm:$0xff] %v3489_v32  ;;  %v2828_v32 = vmax.f32 %v2764_v56, 0.0  ;;  %v2650_v30 = vadd.f32 %v2649_v8, %v2248_v40 }
 0x482   : > { %4039 = vst [vmem:[#allocation1 + $0x7] ss:$9 sm:$0xff] %v3490_v42 }
 0x487   : > { %4402 = vperm.xlu0 %5096, %v6560_v5   ;;  %v2895_v5 = vmul.f32 %v6591_v36, %v2827_v55 }
 0x488   : > { %v2251_v8 = vpop.f32.mrf.mxu2 }
 0x489   : > { %v3035_v9 = vsel %vm1918_vm2, %v2895_v5, 0.0 }
 0x48a   : > { %4405 = vperm.xlu2 %5098, %v6576_v7   ;;  %v6697_v7 = vld [vmem:[#allocation1] sm:$0xff] }
 0x48b   : > { %4041 = vst [vmem:[#allocation1] ss:$9 sm:$0xff] %v3491_v12  ;;  %v3019_v41 = vpop.xlane.xlu1 %3018 }
 0x48c   : > { %4042 = vst [vmem:[#allocation1 + $0x1] ss:$9 sm:$0xff] %v3492_v22  ;;  %v3147_v63 = vadd.f32 %v6233_v1, %v3019_v41  ;;  %v2896_v22 = vmul.f32 %v6591_v36, %v2828_v32 }
 0x48d   : > { %4043 = vst [vmem:[#allocation1 + $0x2] ss:$9 sm:$0xff] %v3493_v16  ;;  %v2765_v16 = vadd.f32 %v6606_v31, %v2650_v30 }
 0x48e   : > { %4044 = vst [vmem:[#allocation1 + $0x3] ss:$9 sm:$0xff] %v3494_v10  ;;  %v3499_v11 = vperm.slane %v3147_v63, 0  ;;  %v3500_v24 = vperm.slane %v3147_v63, 1  ;;  %v3501_v13 = vperm.slane %v3147_v63, 2  ;;  %v3502_v46 = vperm.slane %v3147_v63, 3 }
 0x48f   : > { %4045 = vst [vmem:[#allocation1 + $0x4] ss:$9 sm:$0xff] %v3495_v21  ;;  %v3503_v2 = vperm.slane %v3147_v63, 4  ;;  %v3504_v57 = vperm.slane %v3147_v63, 5  ;;  %v3505_v39 = vperm.slane %v3147_v63, 6  ;;  %v3506_v50 = vperm.slane %v3147_v63, 7 }
 0x490   : > { %4046 = vst [vmem:[#allocation1 + $0x5] ss:$9 sm:$0xff] %v3496_v26  ;;  %v3038_v26 = vsel %vm1918_vm2, %v2896_v22, 0.0 }
 0x491   : > { %4047 = vst [vmem:[#allocation1 + $0x6] ss:$9 sm:$0xff] %v3497_v0  ;;  %v2829_v0 = vmax.f32 %v2765_v16, 0.0 }
 0x492   : > { %4048 = vst [vmem:[#allocation1 + $0x7] ss:$9 sm:$0xff] %v3498_v25 }
 0x499   : > { %v6704_v17 = vld [vmem:[#allocation1] sm:$0xff] }
 0x49a   : > { %4050 = vst [vmem:[#allocation1] ss:$9 sm:$0xff] %v3499_v11 }
 0x49b   : > { %4051 = vst [vmem:[#allocation1 + $0x1] ss:$9 sm:$0xff] %v3500_v24 }
 0x49c   : > { %4052 = vst [vmem:[#allocation1 + $0x2] ss:$9 sm:$0xff] %v3501_v13 }
 0x49d   : > { %4053 = vst [vmem:[#allocation1 + $0x3] ss:$9 sm:$0xff] %v3502_v46 }
 0x49e   : > { %3036 = vadd.xlane.f32.xlu1 %v3035_v9  ;;  %4054 = vst [vmem:[#allocation1 + $0x4] ss:$9 sm:$0xff] %v3503_v2  ;;  %v2897_v9 = vmul.f32 %v6591_v36, %v2829_v0 }
 0x49f   : > { %4055 = vst [vmem:[#allocation1 + $0x5] ss:$9 sm:$0xff] %v3504_v57 }
 0x4a0   : > { %4056 = vst [vmem:[#allocation1 + $0x6] ss:$9 sm:$0xff] %v3505_v39  ;;  %v3041_v19 = vsel %vm1918_vm2, %v2897_v9, 0.0 }
 0x4a1   : > { %4057 = vst [vmem:[#allocation1 + $0x7] ss:$9 sm:$0xff] %v3506_v50 }
 0x4a3   : > { %v4391_v44 = vpop.permute.xlu1 %4390 }
 0x4a4   : > { %v4592_v34 = vperm.slane %v4391_v44, %v6447_v48  ;;  %v3022_v42 = vpop.xlane.xlu2 %3021 }
 0x4a5   : > { %v3148_v12 = vadd.f32 %v6233_v1, %v3022_v42  ;;  %v2652_v42 = vpop.f32.mrf.mxu3 }
 0x4a6   : > { %v4593_v18 = vsel %vm4533_vm0, %v4592_v34, %v4591_v47 }
 0x4a7   : > { %v3507_v33 = vperm.slane %v3148_v12, 0  ;;  %v3508_v10 = vperm.slane %v3148_v12, 1  ;;  %v3509_v55 = vperm.slane %v3148_v12, 2  ;;  %v3510_v25 = vperm.slane %v3148_v12, 3 }
 0x4a8   : > { %v6713_v21 = vld [vmem:[#allocation1] sm:$0xff]  ;;  %v3511_v41 = vperm.slane %v3148_v12, 4  ;;  %v3512_v63 = vperm.slane %v3148_v12, 5  ;;  %v3513_v5 = vperm.slane %v3148_v12, 6  ;;  %v3025_v11 = vpop.xlane.xlu0 %3024  ;;  %v3514_v24 = vperm.slane %v3148_v12, 7 }
 0x4a9   : > { %4059 = vst [vmem:[#allocation1] ss:$9 sm:$0xff] %v3507_v33  ;;  %v3149_v20 = vadd.f32 %v6233_v1, %v3025_v11  ;;  %v2653_v12 = vadd.f32 %v2652_v42, %v2251_v8  ;;  %v2254_v11 = vpop.f32.mrf.mxu2 }
 0x4aa   : > { %4060 = vst [vmem:[#allocation1 + $0x1] ss:$9 sm:$0xff] %v3508_v10 }
 0x4ab   : > { %4061 = vst [vmem:[#allocation1 + $0x2] ss:$9 sm:$0xff] %v3509_v55  ;;  %v3515_v13 = vperm.slane %v3149_v20, 0  ;;  %v3516_v46 = vperm.slane %v3149_v20, 1  ;;  %v3517_v2 = vperm.slane %v3149_v20, 2  ;;  %v3518_v56 = vperm.slane %v3149_v20, 3 }
 0x4ac   : > { %4062 = vst [vmem:[#allocation1 + $0x3] ss:$9 sm:$0xff] %v3510_v25  ;;  %v3519_v39 = vperm.slane %v3149_v20, 4  ;;  %v3520_v44 = vperm.slane %v3149_v20, 5  ;;  %v3521_v50 = vperm.slane %v3149_v20, 6  ;;  %v3522_v40 = vperm.slane %v3149_v20, 7  ;;  %v4397_v22 = vpop.permute.xlu2 %4396 }
 0x4ad   : > { %4063 = vst [vmem:[#allocation1 + $0x4] ss:$9 sm:$0xff] %v3511_v41  ;;  %v4596_v55 = vperm.slane %v4397_v22, %v6518_v53  ;;  %v2655_v9 = vpop.f32.mrf.mxu3 }
 0x4ae   : > { %4064 = vst [vmem:[#allocation1 + $0x5] ss:$9 sm:$0xff] %v3512_v63  ;;  %v2656_v20 = vadd.f32 %v2655_v9, %v2254_v11 }
 0x4af   : > { %4065 = vst [vmem:[#allocation1 + $0x6] ss:$9 sm:$0xff] %v3513_v5 }
 0x4b0   : > { %4066 = vst [vmem:[#allocation1 + $0x7] ss:$9 sm:$0xff] %v3514_v24 }
 0x4b1   : > { %3042 = vadd.xlane.f32.xlu0 %v3041_v19 }
 0x4b3   : > { %3039 = vadd.xlane.f32.xlu2 %v3038_v26 }
 0x4b7   : > { %4408 = vperm.xlu1 %5097, %v6601_v62   ;;  %v6720_v57 = vld [vmem:[#allocation1] sm:$0xff] }
 0x4b8   : > { %4068 = vst [vmem:[#allocation1] ss:$9 sm:$0xff] %v3515_v13 }
 0x4b9   : > { %4069 = vst [vmem:[#allocation1 + $0x1] ss:$9 sm:$0xff] %v3516_v46  ;;  %v2257_v46 = vpop.f32.mrf.mxu2 }
 0x4ba   : > { %4070 = vst [vmem:[#allocation1 + $0x2] ss:$9 sm:$0xff] %v3517_v2 }
 0x4bb   : > { %4071 = vst [vmem:[#allocation1 + $0x3] ss:$9 sm:$0xff] %v3518_v56  ;;  %v4394_v47 = vpop.permute.xlu0 %4393  ;;  %v2767_v56 = vadd.f32 %v6606_v31, %v2656_v20 }
 0x4bc   : > { %4072 = vst [vmem:[#allocation1 + $0x4] ss:$9 sm:$0xff] %v3519_v39  ;;  %v4594_v62 = vperm.slane %v4394_v47, %v6462_v45 }
 0x4bd   : > { %4073 = vst [vmem:[#allocation1 + $0x5] ss:$9 sm:$0xff] %v3520_v44  ;;  %v2658_v44 = vpop.f32.mrf.mxu3 }
 0x4be   : > { %4074 = vst [vmem:[#allocation1 + $0x6] ss:$9 sm:$0xff] %v3521_v50  ;;  %v4595_v34 = vsel %vm4537_vm3, %v4594_v62, %v4593_v18 }
 0x4bf   : > { %4075 = vst [vmem:[#allocation1 + $0x7] ss:$9 sm:$0xff] %v3522_v40  ;;  %v4597_v41 = vsel %vm4541_vm4, %v4596_v55, %v4595_v34  ;;  %v2659_v40 = vadd.f32 %v2658_v44, %v2257_v46 }
 0x4c1   : > { %v2768_v22 = vadd.f32 %v6606_v31, %v2659_v40 }
 0x4c3   : > { %v2832_v55 = vmax.f32 %v2768_v22, 0.0 }
 0x4c5   : > { %4411 = vperm.xlu0 %5096, %v6613_v4   ;;  %v2661_v40 = vpop.f32.mrf.mxu3 }
 0x4c6   : > { %v6727_v26 = vld [vmem:[#allocation1] sm:$0xff] }
 0x4cb   : > { %4414 = vperm.xlu2 %5098, %v6627_v52   ;;  %v2766_v52 = vadd.f32 %v6606_v31, %v2653_v12 }
 0x4cd   : > { %v2830_v5 = vmax.f32 %v2766_v52, 0.0 }
 0x4ce   : > { %v3028_v32 = vpop.xlane.xlu1 %3027 }
 0x4cf   : > { %v3150_v30 = vadd.f32 %v6233_v1, %v3028_v32  ;;  %v2898_v24 = vmul.f32 %v6591_v36, %v2830_v5  ;;  %v2831_v32 = vmax.f32 %v2767_v56, 0.0 }
 0x4d1   : > { %v3523_v16 = vperm.slane %v3150_v30, 0  ;;  %v3524_v33 = vperm.slane %v3150_v30, 1  ;;  %v3525_v10 = vperm.slane %v3150_v30, 2  ;;  %v3526_v0 = vperm.slane %v3150_v30, 3 }
 0x4d2   : > { %v3527_v18 = vperm.slane %v3150_v30, 4  ;;  %v3528_v25 = vperm.slane %v3150_v30, 5  ;;  %v3529_v4 = vperm.slane %v3150_v30, 6  ;;  %v3530_v63 = vperm.slane %v3150_v30, 7 }
 0x4d3   : > { %4077 = vst [vmem:[#allocation1] ss:$9 sm:$0xff] %v3523_v16  ;;  %v3044_v19 = vsel %vm1918_vm2, %v2898_v24, 0.0 }
 0x4d4   : > { %4078 = vst [vmem:[#allocation1 + $0x1] ss:$9 sm:$0xff] %v3524_v33 }
 0x4d5   : > { %4079 = vst [vmem:[#allocation1 + $0x2] ss:$9 sm:$0xff] %v3525_v10 }
 0x4d6   : > { %4080 = vst [vmem:[#allocation1 + $0x3] ss:$9 sm:$0xff] %v3526_v0  ;;  %v2899_v0 = vmul.f32 %v6591_v36, %v2831_v32 }
 0x4d7   : > { %4081 = vst [vmem:[#allocation1 + $0x4] ss:$9 sm:$0xff] %v3527_v18 }
 0x4d8   : > { %4082 = vst [vmem:[#allocation1 + $0x5] ss:$9 sm:$0xff] %v3528_v25  ;;  %v3047_v25 = vsel %vm1918_vm2, %v2899_v0, 0.0 }
 0x4d9   : > { %4083 = vst [vmem:[#allocation1 + $0x6] ss:$9 sm:$0xff] %v3529_v4 }
 0x4da   : > { %4084 = vst [vmem:[#allocation1 + $0x7] ss:$9 sm:$0xff] %v3530_v63 }
 0x4e1   : > { %3045 = vadd.xlane.f32.xlu1 %v3044_v19  ;;  %v6736_v39 = vld [vmem:[#allocation1] sm:$0xff] }
 0x4e5   : > { %v3031_v13 = vpop.xlane.xlu2 %3030 }
 0x4e6   : > { %v3151_v2 = vadd.f32 %v6233_v1, %v3031_v13  ;;  %v4400_v62 = vpop.permute.xlu1 %4399  ;;  %v3034_v18 = vpop.xlane.xlu0 %3033 }
 0x4e7   : > { %v4598_v8 = vperm.slane %v4400_v62, %v6512_v27  ;;  %v3152_v52 = vadd.f32 %v6233_v1, %v3034_v18 }
 0x4e8   : > { %v3531_v50 = vperm.slane %v3151_v2, 0  ;;  %v3532_v47 = vperm.slane %v3151_v2, 1  ;;  %v3533_v34 = vperm.slane %v3151_v2, 2  ;;  %v3534_v42 = vperm.slane %v3151_v2, 3 }
 0x4e9   : > { %v3535_v30 = vperm.slane %v3151_v2, 4  ;;  %v4599_v12 = vsel %vm4545_vm5, %v4598_v8, %v4597_v41  ;;  %v3536_v16 = vperm.slane %v3151_v2, 5  ;;  %v3537_v33 = vperm.slane %v3151_v2, 6 }
 0x4ea   : > { %4086 = vst [vmem:[#allocation1] ss:$9 sm:$0xff] %v3531_v50  ;;  %v3538_v10 = vperm.slane %v3151_v2, 7  ;;  %v3539_v4 = vperm.slane %v3152_v52, 0  ;;  %v2900_v41 = vmul.f32 %v6591_v36, %v2832_v55  ;;  %v3540_v63 = vperm.slane %v3152_v52, 1  ;;  %v2260_v50 = vpop.f32.mrf.mxu2 }
 0x4eb   : > { %4087 = vst [vmem:[#allocation1 + $0x1] ss:$9 sm:$0xff] %v3532_v47  ;;  %v3541_v5 = vperm.slane %v3152_v52, 2  ;;  %v3542_v9 = vperm.slane %v3152_v52, 3  ;;  %v3543_v24 = vperm.slane %v3152_v52, 4  ;;  %v3544_v19 = vperm.slane %v3152_v52, 5 }
 0x4ec   : > { %4088 = vst [vmem:[#allocation1 + $0x2] ss:$9 sm:$0xff] %v3533_v34  ;;  %v3050_v20 = vsel %vm1918_vm2, %v2900_v41, 0.0  ;;  %v3545_v13 = vperm.slane %v3152_v52, 6  ;;  %v3546_v46 = vperm.slane %v3152_v52, 7  ;;  %v2662_v34 = vadd.f32 %v2661_v40, %v2260_v50 }
 0x4ed   : > { %4089 = vst [vmem:[#allocation1 + $0x3] ss:$9 sm:$0xff] %v3534_v42  ;;  %v4406_v55 = vpop.permute.xlu2 %4405 }
 0x4ee   : > { %4090 = vst [vmem:[#allocation1 + $0x4] ss:$9 sm:$0xff] %v3535_v30  ;;  %v4602_v41 = vperm.slane %v4406_v55, %v6574_v49 }
 0x4ef   : > { %4091 = vst [vmem:[#allocation1 + $0x5] ss:$9 sm:$0xff] %v3536_v16  ;;  %3051 = vadd.xlane.f32.xlu0 %v3050_v20 }
 0x4f0   : > { %4092 = vst [vmem:[#allocation1 + $0x6] ss:$9 sm:$0xff] %v3537_v33  ;;  %v2664_v33 = vpop.f32.mrf.mxu3 }
 0x4f1   : > { %4093 = vst [vmem:[#allocation1 + $0x7] ss:$9 sm:$0xff] %v3538_v10 }
 0x4f2   : > { %v2263_v16 = vpop.f32.mrf.mxu2 }
 0x4f3   : > { %v2665_v52 = vadd.f32 %v2664_v33, %v2263_v16 }
 0x4f4   : > { %3048 = vadd.xlane.f32.xlu2 %v3047_v25 }
 0x4f5   : > { %v2770_v20 = vadd.f32 %v6606_v31, %v2665_v52 }
 0x4f7   : > { %v2834_v40 = vmax.f32 %v2770_v20, 0.0 }
 0x4f8   : > { %v6745_v11 = vld [vmem:[#allocation1] sm:$0xff] }
 0x4f9   : > { %4095 = vst [vmem:[#allocation1] ss:$9 sm:$0xff] %v3539_v4  ;;  %v4403_v2 = vpop.permute.xlu0 %4402  ;;  %v2667_v4 = vpop.f32.mrf.mxu3  ;;  %v2902_v16 = vmul.f32 %v6591_v36, %v2834_v40 }
 0x4fa   : > { %4096 = vst [vmem:[#allocation1 + $0x1] ss:$9 sm:$0xff] %v3540_v63  ;;  %4417 = vperm.xlu1 %5097, %v6636_v37   ;;  %v4600_v56 = vperm.slane %v4403_v2, %v6529_v29  ;;  %v2266_v25 = vpop.f32.mrf.mxu2 }
 0x4fb   : > { %4097 = vst [vmem:[#allocation1 + $0x2] ss:$9 sm:$0xff] %v3541_v5  ;;  %v3056_v33 = vsel %vm1918_vm2, %v2902_v16, 0.0 }
 0x4fc   : > { %4098 = vst [vmem:[#allocation1 + $0x3] ss:$9 sm:$0xff] %v3542_v9  ;;  %v4601_v44 = vsel %vm4549_vm6, %v4600_v56, %v4599_v12  ;;  %v2769_v12 = vadd.f32 %v6606_v31, %v2662_v34  ;;  %v2668_v9 = vadd.f32 %v2667_v4, %v2266_v25 }
 0x4fd   : > { %4099 = vst [vmem:[#allocation1 + $0x4] ss:$9 sm:$0xff] %v3543_v24 }
 0x4fe   : > { %4100 = vst [vmem:[#allocation1 + $0x5] ss:$9 sm:$0xff] %v3544_v19  ;;  %v2833_v0 = vmax.f32 %v2769_v12, 0.0  ;;  %v2771_v56 = vadd.f32 %v6606_v31, %v2668_v9 }
 0x4ff   : > { %4101 = vst [vmem:[#allocation1 + $0x6] ss:$9 sm:$0xff] %v3545_v13  ;;  %v4603_v13 = vsel %vm4553_vm7, %v4602_v41, %v4601_v44 }
 0x500   : > { %4102 = vst [vmem:[#allocation1 + $0x7] ss:$9 sm:$0xff] %v3546_v46  ;;  %v2901_v18 = vmul.f32 %v6591_v36, %v2833_v0 }
 0x502   : > { %v3053_v5 = vsel %vm1918_vm2, %v2901_v18, 0.0  ;;  %v2269_v20 = vpop.f32.mrf.mxu2 }
 0x503   : > { %4420 = vperm.xlu0 %5096, %v6653_v43  }
 0x507   : > { %v6754_v42 = vld [vmem:[#allocation1] sm:$0xff] }
 0x50c   : > { %4423 = vperm.xlu2 %5098, %v6674_v3  }
 0x511   : > { %v3037_v47 = vpop.xlane.xlu1 %3036 }
 0x512   : > { %v3153_v62 = vadd.f32 %v6233_v1, %v3037_v47 }
 0x514   : > { %v3547_v8 = vperm.slane %v3153_v62, 0  ;;  %v3548_v37 = vperm.slane %v3153_v62, 1  ;;  %v3549_v32 = vperm.slane %v3153_v62, 2  ;;  %v3550_v30 = vperm.slane %v3153_v62, 3 }
 0x515   : > { %v3551_v22 = vperm.slane %v3153_v62, 4  ;;  %v3552_v3 = vperm.slane %v3153_v62, 5  ;;  %v3553_v43 = vperm.slane %v3153_v62, 6  ;;  %v3554_v10 = vperm.slane %v3153_v62, 7 }
 0x516   : > { %4104 = vst [vmem:[#allocation1] ss:$9 sm:$0xff] %v3547_v8 }
 0x517   : > { %4105 = vst [vmem:[#allocation1 + $0x1] ss:$9 sm:$0xff] %v3548_v37 }
 0x518   : > { %4106 = vst [vmem:[#allocation1 + $0x2] ss:$9 sm:$0xff] %v3549_v32  ;;  %v2835_v32 = vmax.f32 %v2771_v56, 0.0 }
 0x519   : > { %4107 = vst [vmem:[#allocation1 + $0x3] ss:$9 sm:$0xff] %v3550_v30 }
 0x51a   : > { %4108 = vst [vmem:[#allocation1 + $0x4] ss:$9 sm:$0xff] %v3551_v22 }
 0x51b   : > { %4109 = vst [vmem:[#allocation1 + $0x5] ss:$9 sm:$0xff] %v3552_v3 }
 0x51c   : > { %4110 = vst [vmem:[#allocation1 + $0x6] ss:$9 sm:$0xff] %v3553_v43  ;;  %v2903_v43 = vmul.f32 %v6591_v36, %v2835_v32 }
 0x51d   : > { %4111 = vst [vmem:[#allocation1 + $0x7] ss:$9 sm:$0xff] %v3554_v10 }
 0x51e   : > { %v3059_v55 = vsel %vm1918_vm2, %v2903_v43, 0.0 }
 0x524   : > { %3054 = vadd.xlane.f32.xlu1 %v3053_v5  ;;  %v6762_v19 = vld [vmem:[#allocation1] sm:$0xff]  ;;  %v3043_v44 = vpop.xlane.xlu0 %3042 }
 0x525   : > { %v3155_v3 = vadd.f32 %v6233_v1, %v3043_v44 }
 0x526   : > { %v3040_v63 = vpop.xlane.xlu2 %3039 }
 0x527   : > { %v3154_v24 = vadd.f32 %v6233_v1, %v3040_v63  ;;  %v3563_v10 = vperm.slane %v3155_v3, 0  ;;  %v3564_v0 = vperm.slane %v3155_v3, 1  ;;  %v3565_v18 = vperm.slane %v3155_v3, 2 }
 0x528   : > { %v3566_v25 = vperm.slane %v3155_v3, 3  ;;  %v3567_v4 = vperm.slane %v3155_v3, 4  ;;  %v3568_v41 = vperm.slane %v3155_v3, 5  ;;  %v3569_v63 = vperm.slane %v3155_v3, 6 }
 0x529   : > { %v3555_v46 = vperm.slane %v3154_v24, 0  ;;  %v3556_v2 = vperm.slane %v3154_v24, 1  ;;  %v3557_v50 = vperm.slane %v3154_v24, 2  ;;  %v3558_v47 = vperm.slane %v3154_v24, 3  ;;  %v4409_v62 = vpop.permute.xlu1 %4408 }
 0x52a   : > { %v3559_v34 = vperm.slane %v3154_v24, 4  ;;  %v4604_v8 = vperm.slane %v4409_v62, %v6571_v35  ;;  %v3560_v37 = vperm.slane %v3154_v24, 5  ;;  %v3561_v30 = vperm.slane %v3154_v24, 6 }
 0x52b   : > { %4113 = vst [vmem:[#allocation1] ss:$9 sm:$0xff] %v3555_v46  ;;  %v3562_v12 = vperm.slane %v3154_v24, 7  ;;  %v3570_v5 = vperm.slane %v3155_v3, 7 }
 0x52c   : > { %4114 = vst [vmem:[#allocation1 + $0x1] ss:$9 sm:$0xff] %v3556_v2  ;;  %v4605_v22 = vsel %vm4557_vm8, %v4604_v8, %v4603_v13  ;;  %v2670_v13 = vpop.f32.mrf.mxu3  ;;  %v2272_v2 = vpop.f32.mrf.mxu2 }
 0x52d   : > { %4115 = vst [vmem:[#allocation1 + $0x2] ss:$9 sm:$0xff] %v3557_v50  ;;  %3060 = vadd.xlane.f32.xlu0 %v3059_v55  ;;  %v2671_v50 = vadd.f32 %v2670_v13, %v2269_v20  ;;  %v6794_v55 = vld [vmem:[%s7057_s5] ss:$0 sm:$0xff] }
 0x52e   : > { %4116 = vst [vmem:[#allocation1 + $0x3] ss:$9 sm:$0xff] %v3558_v47 }
 0x52f   : > { %4117 = vst [vmem:[#allocation1 + $0x4] ss:$9 sm:$0xff] %v3559_v34 }
 0x530   : > { %4118 = vst [vmem:[#allocation1 + $0x5] ss:$9 sm:$0xff] %v3560_v37 }
 0x531   : > { %4119 = vst [vmem:[#allocation1 + $0x6] ss:$9 sm:$0xff] %v3561_v30  ;;  %v4415_v30 = vpop.permute.xlu2 %4414 }
 0x532   : > { %4120 = vst [vmem:[#allocation1 + $0x7] ss:$9 sm:$0xff] %v3562_v12 }
 0x534   : > { %v2673_v40 = vpop.f32.mrf.mxu3  ;;  %v2275_v12 = vpop.f32.mrf.mxu2 }
 0x535   : > { %3057 = vadd.xlane.f32.xlu2 %v3056_v33  ;;  %v2674_v3 = vadd.f32 %v2673_v40, %v2272_v2 }
 0x537   : > { %v4412_v36 = vpop.permute.xlu0 %4411 }
 0x538   : > { %v4606_v9 = vperm.slane %v4412_v36, %v6583_v6  ;;  %v4608_v36 = vperm.slane %v4415_v30, %v6619_v60 }
 0x539   : > { %v6773_v52 = vld [vmem:[#allocation1] sm:$0xff] }
 0x53a   : > { %4122 = vst [vmem:[#allocation1] ss:$9 sm:$0xff] %v3563_v10  ;;  %v4607_v24 = vsel %vm4561_vm9, %v4606_v9, %v4605_v22 }
 0x53b   : > { %4123 = vst [vmem:[#allocation1 + $0x1] ss:$9 sm:$0xff] %v3564_v0 }
 0x53c   : > { %4124 = vst [vmem:[#allocation1 + $0x2] ss:$9 sm:$0xff] %v3565_v18  ;;  %v2676_v16 = vpop.f32.mrf.mxu3  ;;  %v2773_v18 = vadd.f32 %v6794_v55, %v2674_v3 }
 0x53d   : > { %4125 = vst [vmem:[#allocation1 + $0x3] ss:$9 sm:$0xff] %v3566_v25  ;;  %4426 = vperm.xlu1 %5097, %v6682_v14   ;;  %v2677_v43 = vadd.f32 %v2676_v16, %v2275_v12 }
 0x53e   : > { %4126 = vst [vmem:[#allocation1 + $0x4] ss:$9 sm:$0xff] %v3567_v4  ;;  %v2837_v20 = vmax.f32 %v2773_v18, 0.0 }
 0x53f   : > { %4127 = vst [vmem:[#allocation1 + $0x5] ss:$9 sm:$0xff] %v3568_v41  ;;  %v2774_v25 = vadd.f32 %v6794_v55, %v2677_v43 }
 0x540   : > { %4128 = vst [vmem:[#allocation1 + $0x6] ss:$9 sm:$0xff] %v3569_v63 }
 0x541   : > { %4129 = vst [vmem:[#allocation1 + $0x7] ss:$9 sm:$0xff] %v3570_v5  ;;  %4429 = vperm.xlu0 %5096, %v6697_v7   ;;  %v2772_v7 = vadd.f32 %v6606_v31, %v2671_v50  ;;  %v6787_v31 = vld [vmem:[%s7058_s6] ss:$0 sm:$0xff]  ;;  %v2838_v13 = vmax.f32 %v2774_v25, 0.0 }
 0x543   : > { %v2836_v22 = vmax.f32 %v2772_v7, 0.0 }
 0x545   : > { %v2904_v33 = vmul.f32 %v6787_v31, %v2836_v22 }
 0x547   : > { %v3062_v4 = vsel %vm1918_vm2, %v2904_v33, 0.0 }
 0x548   : > { %v6781_v34 = vld [vmem:[#allocation1] sm:$0xff] }
 0x54d   : > { %4432 = vperm.xlu2 %5098, %v6704_v17  }
 0x554   : > { %v3046_v46 = vpop.xlane.xlu1 %3045 }
 0x555   : > { %v3156_v56 = vadd.f32 %v6233_v1, %v3046_v46 }
 0x557   : > { %v3571_v47 = vperm.slane %v3156_v56, 0  ;;  %v3572_v14 = vperm.slane %v3156_v56, 1  ;;  %v3573_v62 = vperm.slane %v3156_v56, 2  ;;  %v3574_v8 = vperm.slane %v3156_v56, 3 }
 0x558   : > { %v3575_v37 = vperm.slane %v3156_v56, 4  ;;  %v3576_v32 = vperm.slane %v3156_v56, 5  ;;  %v3577_v17 = vperm.slane %v3156_v56, 6  ;;  %v3578_v44 = vperm.slane %v3156_v56, 7 }
 0x559   : > { %4131 = vst [vmem:[#allocation1] ss:$9 sm:$0xff] %v3571_v47  ;;  %v4609_v56 = vsel %vm4565_vm10, %v4608_v36, %v4607_v24 }
 0x55a   : > { %4132 = vst [vmem:[#allocation1 + $0x1] ss:$9 sm:$0xff] %v3572_v14 }
 0x55b   : > { %4133 = vst [vmem:[#allocation1 + $0x2] ss:$9 sm:$0xff] %v3573_v62  ;;  %v2905_v62 = vmul.f32 %v6787_v31, %v2837_v20 }
 0x55c   : > { %4134 = vst [vmem:[#allocation1 + $0x3] ss:$9 sm:$0xff] %v3574_v8  ;;  %v2906_v8 = vmul.f32 %v6787_v31, %v2838_v13 }
 0x55d   : > { %4135 = vst [vmem:[#allocation1 + $0x4] ss:$9 sm:$0xff] %v3575_v37  ;;  %v3065_v24 = vsel %vm1918_vm2, %v2905_v62, 0.0 }
 0x55e   : > { %4136 = vst [vmem:[#allocation1 + $0x5] ss:$9 sm:$0xff] %v3576_v32  ;;  %v3068_v30 = vsel %vm1918_vm2, %v2906_v8, 0.0 }
 0x55f   : > { %4137 = vst [vmem:[#allocation1 + $0x6] ss:$9 sm:$0xff] %v3577_v17 }
 0x560   : > { %4138 = vst [vmem:[#allocation1 + $0x7] ss:$9 sm:$0xff] %v3578_v44 }
 0x562   : > { %v3052_v37 = vpop.xlane.xlu0 %3051 }
 0x563   : > { %v3158_v17 = vadd.f32 %v6233_v1, %v3052_v37 }
 0x565   : > { %v3587_v44 = vperm.slane %v3158_v17, 0  ;;  %v3588_v12 = vperm.slane %v3158_v17, 1  ;;  %v3589_v16 = vperm.slane %v3158_v17, 2  ;;  %v3590_v3 = vperm.slane %v3158_v17, 3 }
 0x566   : > { %v3591_v43 = vperm.slane %v3158_v17, 4  ;;  %v3592_v33 = vperm.slane %v3158_v17, 5 }
 0x567   : > { %v3049_v10 = vpop.xlane.xlu2 %3048  ;;  %v6799_v63 = vld [vmem:[#allocation1] sm:$0xff]  ;;  %3063 = vadd.xlane.f32.xlu1 %v3062_v4 }
 0x568   : > { %v3157_v0 = vadd.f32 %v6233_v1, %v3049_v10  ;;  %v3593_v10 = vperm.slane %v3158_v17, 6 }
 0x56a   : > { %v3579_v41 = vperm.slane %v3157_v0, 0  ;;  %v3580_v5 = vperm.slane %v3157_v0, 1  ;;  %v3581_v9 = vperm.slane %v3157_v0, 2  ;;  %v3582_v46 = vperm.slane %v3157_v0, 3 }
 0x56b   : > { %v3583_v2 = vperm.slane %v3157_v0, 4  ;;  %v3584_v50 = vperm.slane %v3157_v0, 5  ;;  %v3585_v47 = vperm.slane %v3157_v0, 6  ;;  %v3586_v14 = vperm.slane %v3157_v0, 7  ;;  %3069 = vadd.xlane.f32.xlu0 %v3068_v30 }
 0x56c   : > { %4140 = vst [vmem:[#allocation1] ss:$9 sm:$0xff] %v3579_v41  ;;  %v4418_v40 = vpop.permute.xlu1 %4417  ;;  %v3594_v0 = vperm.slane %v3158_v17, 7  ;;  %v2278_v41 = vpop.f32.mrf.mxu2 }
 0x56d   : > { %4141 = vst [vmem:[#allocation1 + $0x1] ss:$9 sm:$0xff] %v3580_v5  ;;  %v4610_v7 = vperm.slane %v4418_v40, %v6634_v28  ;;  %v2679_v5 = vpop.f32.mrf.mxu3 }
 0x56e   : > { %4142 = vst [vmem:[#allocation1 + $0x2] ss:$9 sm:$0xff] %v3581_v9 }
 0x56f   : > { %4143 = vst [vmem:[#allocation1 + $0x3] ss:$9 sm:$0xff] %v3582_v46  ;;  %v4611_v32 = vsel %vm4569_vm11, %v4610_v7, %v4609_v56  ;;  %v2680_v46 = vadd.f32 %v2679_v5, %v2278_v41  ;;  %v4424_v62 = vpop.permute.xlu2 %4423 }
 0x570   : > { %4144 = vst [vmem:[#allocation1 + $0x4] ss:$9 sm:$0xff] %v3583_v2  ;;  %v4614_v5 = vperm.slane %v4424_v62, %v6656_v15 }
 0x571   : > { %4145 = vst [vmem:[#allocation1 + $0x5] ss:$9 sm:$0xff] %v3584_v50 }
 0x572   : > { %4146 = vst [vmem:[#allocation1 + $0x6] ss:$9 sm:$0xff] %v3585_v47 }
 0x573   : > { %4147 = vst [vmem:[#allocation1 + $0x7] ss:$9 sm:$0xff] %v3586_v14 }
 0x574   : > { %v2281_v36 = vpop.f32.mrf.mxu2 }
 0x575   : > { %v4421_v18 = vpop.permute.xlu0 %4420  ;;  %v2682_v9 = vpop.f32.mrf.mxu3 }
 0x576   : > { %3066 = vadd.xlane.f32.xlu2 %v3065_v24  ;;  %v4612_v25 = vperm.slane %v4421_v18, %v6641_v59  ;;  %v2683_v17 = vadd.f32 %v2682_v9, %v2281_v36 }
 0x578   : > { %v4613_v4 = vsel %vm4573_vm12, %v4612_v25, %v4611_v32 }
 0x57a   : > { %v6810_v22 = vld [vmem:[#allocation1] sm:$0xff] }
 0x57b   : > { %4149 = vst [vmem:[#allocation1] ss:$9 sm:$0xff] %v3587_v44 }
 0x57c   : > { %4150 = vst [vmem:[#allocation1 + $0x1] ss:$9 sm:$0xff] %v3588_v12 }
 0x57d   : > { %4151 = vst [vmem:[#allocation1 + $0x2] ss:$9 sm:$0xff] %v3589_v16  ;;  %v2685_v37 = vpop.f32.mrf.mxu3 }
 0x57e   : > { %4152 = vst [vmem:[#allocation1 + $0x3] ss:$9 sm:$0xff] %v3590_v3  ;;  %v2776_v3 = vadd.f32 %v6794_v55, %v2683_v17 }
 0x57f   : > { %4153 = vst [vmem:[#allocation1 + $0x4] ss:$9 sm:$0xff] %v3591_v43  ;;  %4438 = vperm.xlu0 %5096, %v6720_v57   ;;  %v2284_v57 = vpop.f32.mrf.mxu2 }
 0x580   : > { %4154 = vst [vmem:[#allocation1 + $0x5] ss:$9 sm:$0xff] %v3592_v33  ;;  %4435 = vperm.xlu1 %5097, %v6713_v21   ;;  %v2775_v21 = vadd.f32 %v6794_v55, %v2680_v46  ;;  %v2686_v32 = vadd.f32 %v2685_v37, %v2284_v57  ;;  %v2840_v25 = vmax.f32 %v2776_v3, 0.0  ;;  %v4615_v46 = vsel %vm4577_vm13, %v4614_v5, %v4613_v4 }
 0x581   : > { %4155 = vst [vmem:[#allocation1 + $0x6] ss:$9 sm:$0xff] %v3593_v10 }
 0x582   : > { %4156 = vst [vmem:[#allocation1 + $0x7] ss:$9 sm:$0xff] %v3594_v0  ;;  %v2839_v24 = vmax.f32 %v2775_v21, 0.0  ;;  %v2777_v30 = vadd.f32 %v6794_v55, %v2686_v32 }
 0x584   : > { %v2907_v12 = vmul.f32 %v6787_v31, %v2839_v24  ;;  %v2841_v43 = vmax.f32 %v2777_v30, 0.0 }
 0x586   : > { %v3071_v10 = vsel %vm1918_vm2, %v2907_v12, 0.0  ;;  %v2909_v9 = vmul.f32 %v6787_v31, %v2841_v43 }
 0x589   : > { %v6818_v40 = vld [vmem:[#allocation1] sm:$0xff] }
 0x58e   : > { %4441 = vperm.xlu2 %5098, %v6727_v26  }
 0x597   : > { %v3055_v20 = vpop.xlane.xlu1 %3054 }
 0x598   : > { %v3159_v13 = vadd.f32 %v6233_v1, %v3055_v20 }
 0x59a   : > { %v3595_v2 = vperm.slane %v3159_v13, 0  ;;  %v3596_v56 = vperm.slane %v3159_v13, 1  ;;  %v3597_v50 = vperm.slane %v3159_v13, 2  ;;  %v3598_v47 = vperm.slane %v3159_v13, 3 }
 0x59b   : > { %v3599_v14 = vperm.slane %v3159_v13, 4  ;;  %v3600_v8 = vperm.slane %v3159_v13, 5  ;;  %v3601_v26 = vperm.slane %v3159_v13, 6  ;;  %v3602_v7 = vperm.slane %v3159_v13, 7 }
 0x59c   : > { %4158 = vst [vmem:[#allocation1] ss:$9 sm:$0xff] %v3595_v2 }
 0x59d   : > { %4159 = vst [vmem:[#allocation1 + $0x1] ss:$9 sm:$0xff] %v3596_v56  ;;  %v2908_v56 = vmul.f32 %v6787_v31, %v2840_v25  ;;  %v2287_v25 = vpop.f32.mrf.mxu2 }
 0x59e   : > { %4160 = vst [vmem:[#allocation1 + $0x2] ss:$9 sm:$0xff] %v3597_v50 }
 0x59f   : > { %4161 = vst [vmem:[#allocation1 + $0x3] ss:$9 sm:$0xff] %v3598_v47 }
 0x5a0   : > { %4162 = vst [vmem:[#allocation1 + $0x4] ss:$9 sm:$0xff] %v3599_v14  ;;  %v3077_v14 = vsel %vm1918_vm2, %v2909_v9, 0.0  ;;  %v3061_v57 = vpop.xlane.xlu0 %3060 }
 0x5a1   : > { %4163 = vst [vmem:[#allocation1 + $0x5] ss:$9 sm:$0xff] %v3600_v8  ;;  %v3074_v8 = vsel %vm1918_vm2, %v2908_v56, 0.0  ;;  %v3161_v4 = vadd.f32 %v6233_v1, %v3061_v57 }
 0x5a2   : > { %4164 = vst [vmem:[#allocation1 + $0x6] ss:$9 sm:$0xff] %v3601_v26 }
 0x5a3   : > { %4165 = vst [vmem:[#allocation1 + $0x7] ss:$9 sm:$0xff] %v3602_v7  ;;  %v3611_v26 = vperm.slane %v3161_v4, 0  ;;  %v3612_v7 = vperm.slane %v3161_v4, 1  ;;  %v3613_v24 = vperm.slane %v3161_v4, 2  ;;  %v3614_v17 = vperm.slane %v3161_v4, 3 }
 0x5a4   : > { %v3616_v3 = vperm.slane %v3161_v4, 5  ;;  %v3617_v43 = vperm.slane %v3161_v4, 6 }
 0x5a5   : > { %v2290_v5 = vpop.f32.mrf.mxu2 }
 0x5a8   : > { %v3058_v44 = vpop.xlane.xlu2 %3057 }
 0x5a9   : > { %v3160_v16 = vadd.f32 %v6233_v1, %v3058_v44  ;;  %3078 = vadd.xlane.f32.xlu0 %v3077_v14  ;;  %v3615_v44 = vperm.slane %v3161_v4, 4 }
 0x5aa   : > { %v6826_v18 = vld [vmem:[#allocation1] sm:$0xff]  ;;  %3072 = vadd.xlane.f32.xlu1 %v3071_v10  ;;  %v3618_v10 = vperm.slane %v3161_v4, 7 }
 0x5ab   : > { %v3603_v33 = vperm.slane %v3160_v16, 0  ;;  %v3604_v0 = vperm.slane %v3160_v16, 1  ;;  %v3605_v41 = vperm.slane %v3160_v16, 2  ;;  %v3606_v36 = vperm.slane %v3160_v16, 3 }
 0x5ac   : > { %v3607_v20 = vperm.slane %v3160_v16, 4  ;;  %v3608_v13 = vperm.slane %v3160_v16, 5  ;;  %v3609_v2 = vperm.slane %v3160_v16, 6  ;;  %v3610_v47 = vperm.slane %v3160_v16, 7 }
 0x5ad   : > { %4167 = vst [vmem:[#allocation1] ss:$9 sm:$0xff] %v3603_v33 }
 0x5ae   : > { %4168 = vst [vmem:[#allocation1 + $0x1] ss:$9 sm:$0xff] %v3604_v0 }
 0x5af   : > { %4169 = vst [vmem:[#allocation1 + $0x2] ss:$9 sm:$0xff] %v3605_v41  ;;  %v4427_v50 = vpop.permute.xlu1 %4426  ;;  %v2688_v41 = vpop.f32.mrf.mxu3 }
 0x5b0   : > { %4170 = vst [vmem:[#allocation1 + $0x3] ss:$9 sm:$0xff] %v3606_v36  ;;  %v4616_v21 = vperm.slane %v4427_v50, %v6663_v23  ;;  %v4433_v32 = vpop.permute.xlu2 %4432 }
 0x5b1   : > { %4171 = vst [vmem:[#allocation1 + $0x4] ss:$9 sm:$0xff] %v3607_v20  ;;  %v4620_v16 = vperm.slane %v4433_v32, %v6685_v38  ;;  %v2293_v20 = vpop.f32.mrf.mxu2 }
 0x5b2   : > { %4172 = vst [vmem:[#allocation1 + $0x5] ss:$9 sm:$0xff] %v3608_v13  ;;  %v4617_v62 = vsel %vm4581_vm14, %v4616_v21, %v4615_v46  ;;  %v2689_v46 = vadd.f32 %v2688_v41, %v2287_v25 }
 0x5b3   : > { %4173 = vst [vmem:[#allocation1 + $0x6] ss:$9 sm:$0xff] %v3609_v2  ;;  %v4430_v30 = vpop.permute.xlu0 %4429 }
 0x5b4   : > { %4174 = vst [vmem:[#allocation1 + $0x7] ss:$9 sm:$0xff] %v3610_v47  ;;  %v4618_v12 = vperm.slane %v4430_v30, %v6671_v51  ;;  %v2778_v57 = vadd.f32 %v6794_v55, %v2689_v46 }
 0x5b6   : > { %v4619_v33 = vsel %vm4585_vm15, %v4618_v12, %v4617_v62 }
 0x5b7   : > { %3075 = vadd.xlane.f32.xlu2 %v3074_v8  ;;  %v6843_v0 = vsel %vm7061_vm1, %v4620_v16, %v4619_v33  ;;  %v2691_v36 = vpop.f32.mrf.mxu3  ;;  %vm4687_vm1 = vcmask 1040384  }
 0x5bb   : > { %v6837_v37 = vld [vmem:[#allocation1] sm:$0xff] }
 0x5bc   : > { %4176 = vst [vmem:[#allocation1] ss:$9 sm:$0xff] %v3611_v26  ;;  %v2842_v26 = vmax.f32 %v2778_v57, 0.0 }
 0x5bd   : > { %4177 = vst [vmem:[#allocation1 + $0x1] ss:$9 sm:$0xff] %v3612_v7  ;;  %4447 = vperm.xlu0 %5096, %v6745_v11   ;;  %v2692_v7 = vadd.f32 %v2691_v36, %v2290_v5 }
 0x5be   : > { %4178 = vst [vmem:[#allocation1 + $0x2] ss:$9 sm:$0xff] %v3613_v24 }
 0x5bf   : > { %4179 = vst [vmem:[#allocation1 + $0x3] ss:$9 sm:$0xff] %v3614_v17  ;;  %v2694_v2 = vpop.f32.mrf.mxu3  ;;  %v2779_v17 = vadd.f32 %v6794_v55, %v2692_v7 }
 0x5c0   : > { %4180 = vst [vmem:[#allocation1 + $0x4] ss:$9 sm:$0xff] %v3615_v44  ;;  %v2695_v14 = vadd.f32 %v2694_v2, %v2293_v20  ;;  %v2910_v44 = vmul.f32 %v6787_v31, %v2842_v26 }
 0x5c1   : > { %4181 = vst [vmem:[#allocation1 + $0x5] ss:$9 sm:$0xff] %v3616_v3  ;;  %v2843_v16 = vmax.f32 %v2779_v17, 0.0 }
 0x5c2   : > { %4182 = vst [vmem:[#allocation1 + $0x6] ss:$9 sm:$0xff] %v3617_v43  ;;  %v2780_v8 = vadd.f32 %v6794_v55, %v2695_v14  ;;  %v3080_v43 = vsel %vm1918_vm2, %v2910_v44, 0.0 }
 0x5c3   : > { %4183 = vst [vmem:[#allocation1 + $0x7] ss:$9 sm:$0xff] %v3618_v10  ;;  %4444 = vperm.xlu1 %5097, %v6736_v39  }
 0x5c4   : > { %v2844_v32 = vmax.f32 %v2780_v8, 0.0 }
 0x5c6   : > { %v2912_v12 = vmul.f32 %v6787_v31, %v2844_v32 }
 0x5c7   : > { %v2697_v44 = vpop.f32.mrf.mxu3 }
 0x5c8   : > { %v3086_v41 = vsel %vm1918_vm2, %v2912_v12, 0.0  ;;  %v4684_v12 = vrot.slane %v6843_v0, 7 }
 0x5ca   : > { %v6849_v21 = vld [vmem:[#allocation1] sm:$0xff] }
 0x5cf   : > { %4450 = vperm.xlu2 %5098, %v6754_v42  }
 0x5da   : > { %v3064_v9 = vpop.xlane.xlu1 %3063 }
 0x5db   : > { %v3162_v13 = vadd.f32 %v6233_v1, %v3064_v9  ;;  %v2911_v9 = vmul.f32 %v6787_v31, %v2843_v16  ;;  %v6876_v16 = vsel %vm4687_vm1, %v6690_v61, %v4684_v12 }
 0x5dd   : > { %v3619_v56 = vperm.slane %v3162_v13, 0  ;;  %v3620_v50 = vperm.slane %v3162_v13, 1  ;;  %v3621_v47 = vperm.slane %v3162_v13, 2  ;;  %v3622_v39 = vperm.slane %v3162_v13, 3 }
 0x5de   : > { %v3623_v11 = vperm.slane %v3162_v13, 4  ;;  %v3624_v42 = vperm.slane %v3162_v13, 5  ;;  %v3625_v62 = vperm.slane %v3162_v13, 6  ;;  %v3626_v4 = vperm.slane %v3162_v13, 7  ;;  %v3070_v13 = vpop.xlane.xlu0 %3069 }
 0x5df   : > { %4185 = vst [vmem:[#allocation1] ss:$9 sm:$0xff] %v3619_v56  ;;  %v3083_v56 = vsel %vm1918_vm2, %v2911_v9, 0.0 }
 0x5e0   : > { %4186 = vst [vmem:[#allocation1 + $0x1] ss:$9 sm:$0xff] %v3620_v50 }
 0x5e1   : > { %4187 = vst [vmem:[#allocation1 + $0x2] ss:$9 sm:$0xff] %v3621_v47  ;;  %v3164_v47 = vadd.f32 %v6233_v1, %v3070_v13 }
 0x5e2   : > { %4188 = vst [vmem:[#allocation1 + $0x3] ss:$9 sm:$0xff] %v3622_v39 }
 0x5e3   : > { %4189 = vst [vmem:[#allocation1 + $0x4] ss:$9 sm:$0xff] %v3623_v11  ;;  %v3635_v57 = vperm.slane %v3164_v47, 0  ;;  %v3638_v26 = vperm.slane %v3164_v47, 3  ;;  %v3639_v7 = vperm.slane %v3164_v47, 4  ;;  %v3640_v32 = vperm.slane %v3164_v47, 5 }
 0x5e4   : > { %4190 = vst [vmem:[#allocation1 + $0x5] ss:$9 sm:$0xff] %v3624_v42  ;;  %v3642_v17 = vperm.slane %v3164_v47, 7 }
 0x5e5   : > { %4191 = vst [vmem:[#allocation1 + $0x6] ss:$9 sm:$0xff] %v3625_v62  ;;  %v3636_v62 = vperm.slane %v3164_v47, 1 }
 0x5e6   : > { %4192 = vst [vmem:[#allocation1 + $0x7] ss:$9 sm:$0xff] %v3626_v4  ;;  %v3637_v4 = vperm.slane %v3164_v47, 2 }
 0x5e7   : > { %3087 = vadd.xlane.f32.xlu0 %v3086_v41 }
 0x5e9   : > { %v3067_v24 = vpop.xlane.xlu2 %3066 }
 0x5ea   : > { %v3163_v30 = vadd.f32 %v6233_v1, %v3067_v24  ;;  %v3641_v24 = vperm.slane %v3164_v47, 6 }
 0x5ec   : > { %v3627_v3 = vperm.slane %v3163_v30, 0  ;;  %v3628_v33 = vperm.slane %v3163_v30, 1  ;;  %v3629_v25 = vperm.slane %v3163_v30, 2  ;;  %v3630_v5 = vperm.slane %v3163_v30, 3 }
 0x5ed   : > { %v6858_v10 = vld [vmem:[#allocation1] sm:$0xff]  ;;  %3081 = vadd.xlane.f32.xlu1 %v3080_v43  ;;  %v3631_v36 = vperm.slane %v3163_v30, 4  ;;  %v3632_v20 = vperm.slane %v3163_v30, 5  ;;  %v3633_v46 = vperm.slane %v3163_v30, 6  ;;  %v3634_v2 = vperm.slane %v3163_v30, 7  ;;  %v2296_v30 = vpop.f32.mrf.mxu2  ;;  %v2700_v43 = vpop.f32.mrf.mxu3 }
 0x5ee   : > { %4194 = vst [vmem:[#allocation1] ss:$9 sm:$0xff] %v3627_v3 }
 0x5ef   : > { %4195 = vst [vmem:[#allocation1 + $0x1] ss:$9 sm:$0xff] %v3628_v33 }
 0x5f0   : > { %4196 = vst [vmem:[#allocation1 + $0x2] ss:$9 sm:$0xff] %v3629_v25 }
 0x5f1   : > { %4197 = vst [vmem:[#allocation1 + $0x3] ss:$9 sm:$0xff] %v3630_v5  ;;  %v4439_v39 = vpop.permute.xlu0 %4438  ;;  %v4442_v9 = vpop.permute.xlu2 %4441 }
 0x5f2   : > { %4198 = vst [vmem:[#allocation1 + $0x4] ss:$9 sm:$0xff] %v3631_v36  ;;  %v4436_v50 = vpop.permute.xlu1 %4435  ;;  %v4623_v11 = vperm.slane %v4439_v39, %v6447_v48  ;;  %v2698_v36 = vadd.f32 %v2697_v44, %v2296_v30 }
 0x5f3   : > { %4199 = vst [vmem:[#allocation1 + $0x5] ss:$9 sm:$0xff] %v3632_v20  ;;  %v4622_v14 = vperm.slane %v4436_v50, %v5356_v58 }
 0x5f4   : > { %4200 = vst [vmem:[#allocation1 + $0x6] ss:$9 sm:$0xff] %v3633_v46 }
 0x5f5   : > { %4201 = vst [vmem:[#allocation1 + $0x7] ss:$9 sm:$0xff] %v3634_v2  ;;  %v6869_v8 = vsel %vm4533_vm0, %v4623_v11, %v4622_v14  ;;  %v2299_v3 = vpop.f32.mrf.mxu2  ;;  %v2703_v25 = vpop.f32.mrf.mxu3  ;;  %v2781_v2 = vadd.f32 %v6794_v55, %v2698_v36 }
 0x5f6   : > { %v2701_v14 = vadd.f32 %v2700_v43, %v2299_v3 }
 0x5f7   : > { %v2845_v11 = vmax.f32 %v2781_v2, 0.0 }
 0x5f8   : > { %3084 = vadd.xlane.f32.xlu2 %v3083_v56 }
 0x5fb   : > { %4456 = vperm.xlu0 %5096, %v6773_v52  }
 0x5fc   : > { %v6866_v42 = vld [vmem:[#allocation1] sm:$0xff] }
 0x5fd   : > { %4203 = vst [vmem:[#allocation1] ss:$9 sm:$0xff] %v3635_v57  ;;  %v2302_v33 = vpop.f32.mrf.mxu2 }
 0x5fe   : > { %4204 = vst [vmem:[#allocation1 + $0x1] ss:$9 sm:$0xff] %v3636_v62  ;;  %v2704_v41 = vadd.f32 %v2703_v25, %v2302_v33 }
 0x5ff   : > { %4205 = vst [vmem:[#allocation1 + $0x2] ss:$9 sm:$0xff] %v3637_v4  ;;  %v2782_v4 = vadd.f32 %v6794_v55, %v2701_v14 }
 0x600   : > { %4206 = vst [vmem:[#allocation1 + $0x3] ss:$9 sm:$0xff] %v3638_v26 }
 0x601   : > { %4207 = vst [vmem:[#allocation1 + $0x4] ss:$9 sm:$0xff] %v3639_v7  ;;  %v2913_v7 = vmul.f32 %v6787_v31, %v2845_v11 }
 0x602   : > { %4208 = vst [vmem:[#allocation1 + $0x5] ss:$9 sm:$0xff] %v3640_v32  ;;  %v4625_v32 = vperm.slane %v4442_v9, %v6462_v45 }
 0x603   : > { %4209 = vst [vmem:[#allocation1 + $0x6] ss:$9 sm:$0xff] %v3641_v24  ;;  %v3089_v3 = vsel %vm1918_vm2, %v2913_v7, 0.0  ;;  %v2706_v7 = vpop.f32.mrf.mxu3 }
 0x604   : > { %4210 = vst [vmem:[#allocation1 + $0x7] ss:$9 sm:$0xff] %v3642_v17  ;;  %v2846_v17 = vmax.f32 %v2782_v4, 0.0  ;;  %v4626_v30 = vsel %vm4537_vm3, %v4625_v32, %v6869_v8 }
 0x606   : > { %4453 = vperm.xlu1 %5097, %v6762_v19   ;;  %v2783_v19 = vadd.f32 %v6794_v55, %v2704_v41  ;;  %v2914_v41 = vmul.f32 %v6787_v31, %v2846_v17 }
 0x608   : > { %v2847_v50 = vmax.f32 %v2783_v19, 0.0  ;;  %v3092_v8 = vsel %vm1918_vm2, %v2914_v41, 0.0 }
 0x60a   : > { %v2915_v62 = vmul.f32 %v6787_v31, %v2847_v50 }
 0x60b   : > { %v2709_v17 = vpop.f32.mrf.mxu3 }
 0x60c   : > { %v3095_v24 = vsel %vm1918_vm2, %v2915_v62, 0.0  ;;  %v2305_v62 = vpop.f32.mrf.mxu2 }
 0x610   : > { %4459 = vperm.xlu2 %5098, %v6781_v34   ;;  %v6880_v34 = vld [vmem:[#allocation1] sm:$0xff] }
 0x61c   : > { %v3079_v12 = vpop.xlane.xlu0 %3078 }
 0x61d   : > { %v3073_v5 = vpop.xlane.xlu1 %3072  ;;  %v3167_v2 = vadd.f32 %v6233_v1, %v3079_v12 }
 0x61e   : > { %v3165_v52 = vadd.f32 %v6233_v1, %v3073_v5 }
 0x61f   : > { %v3659_v50 = vperm.slane %v3167_v2, 0  ;;  %v3662_v11 = vperm.slane %v3167_v2, 3  ;;  %v3664_v4 = vperm.slane %v3167_v2, 5  ;;  %v3666_v32 = vperm.slane %v3167_v2, 7 }
 0x620   : > { %v3643_v20 = vperm.slane %v3165_v52, 0  ;;  %v3644_v0 = vperm.slane %v3165_v52, 1  ;;  %v3645_v13 = vperm.slane %v3165_v52, 2  ;;  %v3646_v46 = vperm.slane %v3165_v52, 3 }
 0x621   : > { %v3647_v61 = vperm.slane %v3165_v52, 4  ;;  %v3648_v56 = vperm.slane %v3165_v52, 5  ;;  %v3649_v47 = vperm.slane %v3165_v52, 6  ;;  %v3650_v39 = vperm.slane %v3165_v52, 7 }
 0x622   : > { %4212 = vst [vmem:[#allocation1] ss:$9 sm:$0xff] %v3643_v20 }
 0x623   : > { %4213 = vst [vmem:[#allocation1 + $0x1] ss:$9 sm:$0xff] %v3644_v0 }
 0x624   : > { %4214 = vst [vmem:[#allocation1 + $0x2] ss:$9 sm:$0xff] %v3645_v13 }
 0x625   : > { %4215 = vst [vmem:[#allocation1 + $0x3] ss:$9 sm:$0xff] %v3646_v46  ;;  %3096 = vadd.xlane.f32.xlu0 %v3095_v24  ;;  %v2308_v24 = vpop.f32.mrf.mxu2 }
 0x626   : > { %4216 = vst [vmem:[#allocation1 + $0x4] ss:$9 sm:$0xff] %v3647_v61 }
 0x627   : > { %4217 = vst [vmem:[#allocation1 + $0x5] ss:$9 sm:$0xff] %v3648_v56 }
 0x628   : > { %4218 = vst [vmem:[#allocation1 + $0x6] ss:$9 sm:$0xff] %v3649_v47  ;;  %v3660_v47 = vperm.slane %v3167_v2, 1 }
 0x629   : > { %4219 = vst [vmem:[#allocation1 + $0x7] ss:$9 sm:$0xff] %v3650_v39  ;;  %v3661_v39 = vperm.slane %v3167_v2, 2 }
 0x62a   : > { %v3076_v57 = vpop.xlane.xlu2 %3075 }
 0x62b   : > { %v3166_v26 = vadd.f32 %v6233_v1, %v3076_v57  ;;  %v3663_v57 = vperm.slane %v3167_v2, 4 }
 0x62d   : > { %v3651_v44 = vperm.slane %v3166_v26, 0  ;;  %v3652_v43 = vperm.slane %v3166_v26, 1  ;;  %v3653_v25 = vperm.slane %v3166_v26, 2  ;;  %v3654_v5 = vperm.slane %v3166_v26, 3 }
 0x62e   : > { %v3655_v52 = vperm.slane %v3166_v26, 4  ;;  %v3656_v36 = vperm.slane %v3166_v26, 5  ;;  %v3657_v19 = vperm.slane %v3166_v26, 6  ;;  %v3658_v20 = vperm.slane %v3166_v26, 7 }
 0x62f   : > { %v4448_v13 = vpop.permute.xlu0 %4447  ;;  %v3665_v26 = vperm.slane %v3167_v2, 6 }
 0x630   : > { %v6892_v33 = vld [vmem:[#allocation1] sm:$0xff]  ;;  %3090 = vadd.xlane.f32.xlu1 %v3089_v3  ;;  %v4629_v46 = vperm.slane %v4448_v13, %v6512_v27 }
 0x631   : > { %4221 = vst [vmem:[#allocation1] ss:$9 sm:$0xff] %v3651_v44 }
 0x632   : > { %4222 = vst [vmem:[#allocation1 + $0x1] ss:$9 sm:$0xff] %v3652_v43 }
 0x633   : > { %4223 = vst [vmem:[#allocation1 + $0x2] ss:$9 sm:$0xff] %v3653_v25  ;;  %v2707_v25 = vadd.f32 %v2706_v7, %v2305_v62 }
 0x634   : > { %4224 = vst [vmem:[#allocation1 + $0x3] ss:$9 sm:$0xff] %v3654_v5  ;;  %v4451_v5 = vpop.permute.xlu2 %4450 }
 0x635   : > { %4225 = vst [vmem:[#allocation1 + $0x4] ss:$9 sm:$0xff] %v3655_v52  ;;  %v4445_v9 = vpop.permute.xlu1 %4444 }
 0x636   : > { %4226 = vst [vmem:[#allocation1 + $0x5] ss:$9 sm:$0xff] %v3656_v36  ;;  %v4627_v0 = vperm.slane %v4445_v9, %v6518_v53 }
 0x637   : > { %4227 = vst [vmem:[#allocation1 + $0x6] ss:$9 sm:$0xff] %v3657_v19 }
 0x638   : > { %4228 = vst [vmem:[#allocation1 + $0x7] ss:$9 sm:$0xff] %v3658_v20  ;;  %v4628_v61 = vsel %vm4541_vm4, %v4627_v0, %v4626_v30  ;;  %v2311_v30 = vpop.f32.mrf.mxu2  ;;  %v2710_v20 = vadd.f32 %v2709_v17, %v2308_v24 }
 0x639   : > { %3093 = vadd.xlane.f32.xlu2 %v3092_v8  ;;  %v6901_v56 = vsel %vm4545_vm5, %v4629_v46, %v4628_v61  ;;  %4465 = vperm.xlu0 %5096, %v6810_v22   ;;  %v2712_v22 = vpop.f32.mrf.mxu3 }
 0x63a   : > { %v2713_v44 = vadd.f32 %v2712_v22, %v2311_v30 }
 0x63c   : > { %v2786_v12 = vadd.f32 %v6794_v55, %v2713_v44 }
 0x63e   : > { %v2850_v41 = vmax.f32 %v2786_v12, 0.0 }
 0x63f   : > { %v6903_v14 = vld [vmem:[#allocation1] sm:$0xff] }
 0x640   : > { %4230 = vst [vmem:[#allocation1] ss:$9 sm:$0xff] %v3659_v50  ;;  %v2918_v13 = vmul.f32 %v6787_v31, %v2850_v41  ;;  %v2785_v50 = vadd.f32 %v6794_v55, %v2710_v20 }
 0x641   : > { %4231 = vst [vmem:[#allocation1 + $0x1] ss:$9 sm:$0xff] %v3660_v47 }
 0x642   : > { %4232 = vst [vmem:[#allocation1 + $0x2] ss:$9 sm:$0xff] %v3661_v39  ;;  %v3104_v47 = vsel %vm1918_vm2, %v2918_v13, 0.0 }
 0x643   : > { %4233 = vst [vmem:[#allocation1 + $0x3] ss:$9 sm:$0xff] %v3662_v11  ;;  %v4631_v11 = vperm.slane %v4451_v5, %v6529_v29 }
 0x644   : > { %4234 = vst [vmem:[#allocation1 + $0x4] ss:$9 sm:$0xff] %v3663_v57  ;;  %v2849_v57 = vmax.f32 %v2785_v50, 0.0 }
 0x645   : > { %4235 = vst [vmem:[#allocation1 + $0x5] ss:$9 sm:$0xff] %v3664_v4  ;;  %v4632_v7 = vsel %vm4549_vm6, %v4631_v11, %v6901_v56 }
 0x646   : > { %4236 = vst [vmem:[#allocation1 + $0x6] ss:$9 sm:$0xff] %v3665_v26  ;;  %v2917_v24 = vmul.f32 %v6787_v31, %v2849_v57 }
 0x647   : > { %4237 = vst [vmem:[#allocation1 + $0x7] ss:$9 sm:$0xff] %v3666_v32 }
 0x649   : > { %4462 = vperm.xlu1 %5097, %v6799_v63  }
 0x64e   : > { %v6910_v63 = vld [vmem:[#allocation1] sm:$0xff] }
 0x651   : > { %4468 = vperm.xlu2 %5098, %v6818_v40   ;;  %v2784_v40 = vadd.f32 %v6794_v55, %v2707_v25 }
 0x653   : > { %v2848_v2 = vmax.f32 %v2784_v40, 0.0 }
 0x655   : > { %v2916_v4 = vmul.f32 %v6787_v31, %v2848_v2 }
 0x657   : > { %v3098_v17 = vsel %vm1918_vm2, %v2916_v4, 0.0 }
 0x65a   : > { %v3088_v26 = vpop.xlane.xlu0 %3087 }
 0x65b   : > { %v3170_v40 = vadd.f32 %v6233_v1, %v3088_v26 }
 0x65d   : > { %v3683_v20 = vperm.slane %v3170_v40, 0  ;;  %v3687_v2 = vperm.slane %v3170_v40, 4  ;;  %v3690_v50 = vperm.slane %v3170_v40, 7 }
 0x660   : > { %v3082_v3 = vpop.xlane.xlu1 %3081 }
 0x661   : > { %v3168_v43 = vadd.f32 %v6233_v1, %v3082_v3 }
 0x663   : > { %v3667_v52 = vperm.slane %v3168_v43, 0  ;;  %v3668_v36 = vperm.slane %v3168_v43, 1  ;;  %v3669_v19 = vperm.slane %v3168_v43, 2  ;;  %v3670_v8 = vperm.slane %v3168_v43, 3  ;;  %3105 = vadd.xlane.f32.xlu0 %v3104_v47  ;;  %v2715_v47 = vpop.f32.mrf.mxu3 }
 0x664   : > { %v3671_v9 = vperm.slane %v3168_v43, 4  ;;  %v3672_v0 = vperm.slane %v3168_v43, 5  ;;  %v3673_v46 = vperm.slane %v3168_v43, 6  ;;  %v3674_v61 = vperm.slane %v3168_v43, 7 }
 0x665   : > { %4239 = vst [vmem:[#allocation1] ss:$9 sm:$0xff] %v3667_v52  ;;  %v3101_v43 = vsel %vm1918_vm2, %v2917_v24, 0.0 }
 0x666   : > { %4240 = vst [vmem:[#allocation1 + $0x1] ss:$9 sm:$0xff] %v3668_v36 }
 0x667   : > { %4241 = vst [vmem:[#allocation1 + $0x2] ss:$9 sm:$0xff] %v3669_v19 }
 0x668   : > { %4242 = vst [vmem:[#allocation1 + $0x3] ss:$9 sm:$0xff] %v3670_v8 }
 0x669   : > { %4243 = vst [vmem:[#allocation1 + $0x4] ss:$9 sm:$0xff] %v3671_v9 }
 0x66a   : > { %4244 = vst [vmem:[#allocation1 + $0x5] ss:$9 sm:$0xff] %v3672_v0  ;;  %v3684_v0 = vperm.slane %v3170_v40, 1 }
 0x66b   : > { %v3085_v39 = vpop.xlane.xlu2 %3084  ;;  %4245 = vst [vmem:[#allocation1 + $0x6] ss:$9 sm:$0xff] %v3673_v46  ;;  %v3685_v46 = vperm.slane %v3170_v40, 2  ;;  %v2718_v57 = vpop.f32.mrf.mxu3 }
 0x66c   : > { %4246 = vst [vmem:[#allocation1 + $0x7] ss:$9 sm:$0xff] %v3674_v61  ;;  %v3169_v62 = vadd.f32 %v6233_v1, %v3085_v39  ;;  %v3686_v61 = vperm.slane %v3170_v40, 3 }
 0x66d   : > { %v4457_v56 = vpop.permute.xlu0 %4456 }
 0x66e   : > { %v3675_v32 = vperm.slane %v3169_v62, 0  ;;  %v3676_v30 = vperm.slane %v3169_v62, 1  ;;  %v3677_v44 = vperm.slane %v3169_v62, 2  ;;  %v3678_v12 = vperm.slane %v3169_v62, 3 }
 0x66f   : > { %v3679_v3 = vperm.slane %v3169_v62, 4  ;;  %v3680_v25 = vperm.slane %v3169_v62, 5  ;;  %v3681_v41 = vperm.slane %v3169_v62, 6  ;;  %v3682_v52 = vperm.slane %v3169_v62, 7 }
 0x670   : > { %v4635_v19 = vperm.slane %v4457_v56, %v6571_v35 }
 0x673   : > { %v6923_v22 = vld [vmem:[#allocation1] sm:$0xff]  ;;  %3099 = vadd.xlane.f32.xlu1 %v3098_v17 }
 0x674   : > { %4248 = vst [vmem:[#allocation1] ss:$9 sm:$0xff] %v3675_v32 }
 0x675   : > { %4249 = vst [vmem:[#allocation1 + $0x1] ss:$9 sm:$0xff] %v3676_v30 }
 0x676   : > { %4250 = vst [vmem:[#allocation1 + $0x2] ss:$9 sm:$0xff] %v3677_v44 }
 0x677   : > { %4251 = vst [vmem:[#allocation1 + $0x3] ss:$9 sm:$0xff] %v3678_v12  ;;  %4474 = vperm.xlu0 %5096, %v6837_v37   ;;  %v3688_v37 = vperm.slane %v3170_v40, 5 }
 0x678   : > { %4252 = vst [vmem:[#allocation1 + $0x4] ss:$9 sm:$0xff] %v3679_v3  ;;  %v4454_v5 = vpop.permute.xlu1 %4453 }
 0x679   : > { %4253 = vst [vmem:[#allocation1 + $0x5] ss:$9 sm:$0xff] %v3680_v25  ;;  %v4633_v36 = vperm.slane %v4454_v5, %v6574_v49 }
 0x67a   : > { %3102 = vadd.xlane.f32.xlu2 %v3101_v43  ;;  %4254 = vst [vmem:[#allocation1 + $0x6] ss:$9 sm:$0xff] %v3681_v41  ;;  %v4460_v43 = vpop.permute.xlu2 %4459 }
 0x67b   : > { %4255 = vst [vmem:[#allocation1 + $0x7] ss:$9 sm:$0xff] %v3682_v52  ;;  %v4634_v8 = vsel %vm4553_vm7, %v4633_v36, %v4632_v7 }
 0x67c   : > { %v6930_v9 = vsel %vm4557_vm8, %v4635_v19, %v4634_v8 }
 0x67f   : > { %4483 = vperm.xlu0 %5096, %v6866_v42   ;;  %v3689_v42 = vperm.slane %v3170_v40, 6 }
 0x682   : > { %v4256_v13 = vld [vmem:[#allocation1] sm:$0xff] }
 0x683   : > { %4257 = vst [vmem:[#allocation1] ss:$9 sm:$0xff] %v3683_v20 }
 0x684   : > { %4258 = vst [vmem:[#allocation1 + $0x1] ss:$9 sm:$0xff] %v3684_v0 }
 0x685   : > { %4259 = vst [vmem:[#allocation1 + $0x2] ss:$9 sm:$0xff] %v3685_v46 }
 0x686   : > { %4260 = vst [vmem:[#allocation1 + $0x3] ss:$9 sm:$0xff] %v3686_v61 }
 0x687   : > { %4492 = vperm.xlu0 %5096, %v6903_v14   ;;  %4261 = vst [vmem:[#allocation1 + $0x4] ss:$9 sm:$0xff] %v3687_v2 }
 0x688   : > { %4262 = vst [vmem:[#allocation1 + $0x5] ss:$9 sm:$0xff] %v3688_v37 }
 0x689   : > { %4263 = vst [vmem:[#allocation1 + $0x6] ss:$9 sm:$0xff] %v3689_v42 }
 0x68a   : > { %4264 = vst [vmem:[#allocation1 + $0x7] ss:$9 sm:$0xff] %v3690_v50 }
 0x68c   : > { %4471 = vperm.xlu1 %5097, %v6826_v18   ;;  %v2314_v18 = vpop.f32.mrf.mxu2 }
 0x68d   : > { %v2716_v11 = vadd.f32 %v2715_v47, %v2314_v18 }
 0x68f   : > { %4501 = vperm.xlu0 %5096, %v4256_v13   ;;  %v2787_v14 = vadd.f32 %v6794_v55, %v2716_v11 }
 0x691   : > { %v2851_v4 = vmax.f32 %v2787_v14, 0.0  ;;  %v6945_v41 = vld [vmem:[#allocation1] sm:$0xff] }
 0x692   : > { %4477 = vperm.xlu2 %5098, %v6849_v21  }
 0x693   : > { %v2919_v24 = vmul.f32 %v6787_v31, %v2851_v4 }
 0x694   : > { %v2317_v39 = vpop.f32.mrf.mxu2 }
 0x695   : > { %v2719_v21 = vadd.f32 %v2718_v57, %v2317_v39  ;;  %v3107_v12 = vsel %vm1918_vm2, %v2919_v24, 0.0 }
 0x697   : > { %v2788_v62 = vadd.f32 %v6794_v55, %v2719_v21 }
 0x698   : > { %v3097_v30 = vpop.xlane.xlu0 %3096 }
 0x699   : > { %v2852_v7 = vmax.f32 %v2788_v62, 0.0  ;;  %v3173_v14 = vadd.f32 %v6233_v1, %v3097_v30 }
 0x69b   : > { %v2920_v17 = vmul.f32 %v6787_v31, %v2852_v7  ;;  %v4637_v31 = vperm.slane %v4460_v43, %v6583_v6  ;;  %v3707_v62 = vperm.slane %v3173_v14, 0  ;;  %v3708_v4 = vperm.slane %v3173_v14, 1 }
 0x69c   : > { %v3709_v7 = vperm.slane %v3173_v14, 2  ;;  %v3711_v24 = vperm.slane %v3173_v14, 4 }
 0x69d   : > { %v3110_v25 = vsel %vm1918_vm2, %v2920_v17, 0.0  ;;  %v4638_v20 = vsel %vm4561_vm9, %v4637_v31, %v6930_v9  ;;  %v3712_v17 = vperm.slane %v3173_v14, 5  ;;  %vm7064_vm2 = vcmask 1048512  }
 0x6a3   : > { %v3091_v26 = vpop.xlane.xlu1 %3090 }
 0x6a4   : > { %v3171_v32 = vadd.f32 %v6233_v1, %v3091_v26 }
 0x6a6   : > { %v3691_v44 = vperm.slane %v3171_v32, 0  ;;  %v3692_v3 = vperm.slane %v3171_v32, 1  ;;  %v3693_v56 = vperm.slane %v3171_v32, 2  ;;  %v3694_v55 = vperm.slane %v3171_v32, 3 }
 0x6a7   : > { %v3695_v5 = vperm.slane %v3171_v32, 4  ;;  %v3696_v52 = vperm.slane %v3171_v32, 5  ;;  %v3697_v36 = vperm.slane %v3171_v32, 6  ;;  %v3698_v19 = vperm.slane %v3171_v32, 7 }
 0x6a8   : > { %4266 = vst [vmem:[#allocation1] ss:$9 sm:$0xff] %v3691_v44  ;;  %v3710_v32 = vperm.slane %v3173_v14, 3 }
 0x6a9   : > { %4267 = vst [vmem:[#allocation1 + $0x1] ss:$9 sm:$0xff] %v3692_v3 }
 0x6aa   : > { %4268 = vst [vmem:[#allocation1 + $0x2] ss:$9 sm:$0xff] %v3693_v56 }
 0x6ab   : > { %4269 = vst [vmem:[#allocation1 + $0x3] ss:$9 sm:$0xff] %v3694_v55  ;;  %v4466_v8 = vpop.permute.xlu0 %4465 }
 0x6ac   : > { %4270 = vst [vmem:[#allocation1 + $0x4] ss:$9 sm:$0xff] %v3695_v5  ;;  %v3094_v0 = vpop.xlane.xlu2 %3093  ;;  %v4641_v46 = vperm.slane %v4466_v8, %v6634_v28 }
 0x6ad   : > { %4271 = vst [vmem:[#allocation1 + $0x5] ss:$9 sm:$0xff] %v3696_v52  ;;  %v3172_v2 = vadd.f32 %v6233_v1, %v3094_v0 }
 0x6ae   : > { %4272 = vst [vmem:[#allocation1 + $0x6] ss:$9 sm:$0xff] %v3697_v36 }
 0x6af   : > { %4273 = vst [vmem:[#allocation1 + $0x7] ss:$9 sm:$0xff] %v3698_v19  ;;  %v3699_v42 = vperm.slane %v3172_v2, 0  ;;  %v3700_v50 = vperm.slane %v3172_v2, 1  ;;  %v3701_v47 = vperm.slane %v3172_v2, 2  ;;  %v3702_v9 = vperm.slane %v3172_v2, 3 }
 0x6b0   : > { %v3703_v39 = vperm.slane %v3172_v2, 4  ;;  %v3704_v11 = vperm.slane %v3172_v2, 5  ;;  %v3705_v57 = vperm.slane %v3172_v2, 6  ;;  %v3706_v21 = vperm.slane %v3172_v2, 7 }
 0x6b6   : > { %3108 = vadd.xlane.f32.xlu1 %v3107_v12  ;;  %v4274_v18 = vld [vmem:[#allocation1] sm:$0xff] }
 0x6b7   : > { %4275 = vst [vmem:[#allocation1] ss:$9 sm:$0xff] %v3699_v42 }
 0x6b8   : > { %4276 = vst [vmem:[#allocation1 + $0x1] ss:$9 sm:$0xff] %v3700_v50 }
 0x6b9   : > { %4277 = vst [vmem:[#allocation1 + $0x2] ss:$9 sm:$0xff] %v3701_v47 }
 0x6ba   : > { %4278 = vst [vmem:[#allocation1 + $0x3] ss:$9 sm:$0xff] %v3702_v9 }
 0x6bb   : > { %3111 = vadd.xlane.f32.xlu2 %v3110_v25  ;;  %v4463_v40 = vpop.permute.xlu1 %4462  ;;  %4279 = vst [vmem:[#allocation1 + $0x4] ss:$9 sm:$0xff] %v3703_v39 }
 0x6bc   : > { %v4639_v13 = vperm.slane %v4463_v40, %v6619_v60  ;;  %4280 = vst [vmem:[#allocation1 + $0x5] ss:$9 sm:$0xff] %v3704_v11 }
 0x6bd   : > { %4281 = vst [vmem:[#allocation1 + $0x6] ss:$9 sm:$0xff] %v3705_v57 }
 0x6be   : > { %v4640_v61 = vsel %vm4565_vm10, %v4639_v13, %v4638_v20  ;;  %4282 = vst [vmem:[#allocation1 + $0x7] ss:$9 sm:$0xff] %v3706_v21 }
 0x6bf   : > { %v6955_v37 = vsel %vm4569_vm11, %v4641_v46, %v4640_v61 }
 0x6c5   : > { %v4283_v26 = vld [vmem:[#allocation1] sm:$0xff] }
 0x6c6   : > { %4510 = vperm.xlu0 %5096, %v4283_v26   ;;  %4284 = vst [vmem:[#allocation1] ss:$9 sm:$0xff] %v3707_v62 }
 0x6c7   : > { %4285 = vst [vmem:[#allocation1 + $0x1] ss:$9 sm:$0xff] %v3708_v4 }
 0x6c8   : > { %4286 = vst [vmem:[#allocation1 + $0x2] ss:$9 sm:$0xff] %v3709_v7 }
 0x6c9   : > { %4287 = vst [vmem:[#allocation1 + $0x3] ss:$9 sm:$0xff] %v3710_v32 }
 0x6ca   : > { %4288 = vst [vmem:[#allocation1 + $0x4] ss:$9 sm:$0xff] %v3711_v24 }
 0x6cb   : > { %4289 = vst [vmem:[#allocation1 + $0x5] ss:$9 sm:$0xff] %v3712_v17 }
 0x6cf   : > { %4480 = vperm.xlu1 %5097, %v6858_v10   ;;  %v3713_v10 = vperm.slane %v3173_v14, 6 }
 0x6d1   : > { %4290 = vst [vmem:[#allocation1 + $0x6] ss:$9 sm:$0xff] %v3713_v10 }
 0x6d3   : > { %4486 = vperm.xlu2 %5098, %v6880_v34   ;;  %v3714_v34 = vperm.slane %v3173_v14, 7 }
 0x6d5   : > { %4291 = vst [vmem:[#allocation1 + $0x7] ss:$9 sm:$0xff] %v3714_v34 }
 0x6d6   : > { %v3106_v50 = vpop.xlane.xlu0 %3105 }
 0x6d7   : > { %4489 = vperm.xlu1 %5097, %v6892_v33   ;;  %v3176_v47 = vadd.f32 %v6233_v1, %v3106_v50 }
 0x6d9   : > { %v3731_v9 = vperm.slane %v3176_v47, 0  ;;  %v3732_v39 = vperm.slane %v3176_v47, 1  ;;  %v3733_v57 = vperm.slane %v3176_v47, 2  ;;  %v3734_v21 = vperm.slane %v3176_v47, 3 }
 0x6da   : > { %v3735_v14 = vperm.slane %v3176_v47, 4  ;;  %v3736_v62 = vperm.slane %v3176_v47, 5  ;;  %v3737_v4 = vperm.slane %v3176_v47, 6  ;;  %v3738_v26 = vperm.slane %v3176_v47, 7 }
 0x6db   : > { %4495 = vperm.xlu2 %5098, %v6910_v63   ;;  %v4469_v63 = vpop.permute.xlu2 %4468 }
 0x6dc   : > { %v4292_v33 = vld [vmem:[#allocation1] sm:$0xff] }
 0x6df   : > { %4498 = vperm.xlu1 %5097, %v6923_v22   ;;  %v4643_v22 = vperm.slane %v4469_v63, %v6641_v59 }
 0x6e1   : > { %v4644_v52 = vsel %vm4573_vm12, %v4643_v22, %v6955_v37 }
 0x6e3   : > { %4504 = vperm.xlu2 %5098, %v6945_v41  }
 0x6e6   : > { %v3100_v30 = vpop.xlane.xlu1 %3099 }
 0x6e7   : > { %v3174_v44 = vadd.f32 %v6233_v1, %v3100_v30  ;;  %4507 = vperm.xlu1 %5097, %v4274_v18  }
 0x6e9   : > { %v3715_v12 = vperm.slane %v3174_v44, 0  ;;  %v3716_v3 = vperm.slane %v3174_v44, 1  ;;  %v3717_v43 = vperm.slane %v3174_v44, 2  ;;  %v3718_v25 = vperm.slane %v3174_v44, 3  ;;  %v4475_v32 = vpop.permute.xlu0 %4474 }
 0x6ea   : > { %v3719_v56 = vperm.slane %v3174_v44, 4  ;;  %v3720_v55 = vperm.slane %v3174_v44, 5  ;;  %v3721_v5 = vperm.slane %v3174_v44, 6  ;;  %v3722_v41 = vperm.slane %v3174_v44, 7 }
 0x6eb   : > { %4513 = vperm.xlu2 %5098, %v4292_v33   ;;  %4293 = vst [vmem:[#allocation1] ss:$9 sm:$0xff] %v3715_v12  ;;  %v4647_v34 = vperm.slane %v4475_v32, %v6663_v23 }
 0x6ec   : > { %4294 = vst [vmem:[#allocation1 + $0x1] ss:$9 sm:$0xff] %v3716_v3 }
 0x6ed   : > { %4295 = vst [vmem:[#allocation1 + $0x2] ss:$9 sm:$0xff] %v3717_v43  ;;  %v3103_v36 = vpop.xlane.xlu2 %3102 }
 0x6ee   : > { %4296 = vst [vmem:[#allocation1 + $0x3] ss:$9 sm:$0xff] %v3718_v25  ;;  %v3175_v31 = vadd.f32 %v6233_v1, %v3103_v36 }
 0x6ef   : > { %4297 = vst [vmem:[#allocation1 + $0x4] ss:$9 sm:$0xff] %v3719_v56 }
 0x6f0   : > { %4298 = vst [vmem:[#allocation1 + $0x5] ss:$9 sm:$0xff] %v3720_v55  ;;  %v3723_v19 = vperm.slane %v3175_v31, 0  ;;  %v3724_v8 = vperm.slane %v3175_v31, 1  ;;  %v3725_v20 = vperm.slane %v3175_v31, 2  ;;  %v3726_v0 = vperm.slane %v3175_v31, 3 }
 0x6f1   : > { %4299 = vst [vmem:[#allocation1 + $0x6] ss:$9 sm:$0xff] %v3721_v5  ;;  %v3727_v13 = vperm.slane %v3175_v31, 4  ;;  %v3728_v46 = vperm.slane %v3175_v31, 5  ;;  %v3729_v61 = vperm.slane %v3175_v31, 6  ;;  %v3730_v37 = vperm.slane %v3175_v31, 7 }
 0x6f2   : > { %4300 = vst [vmem:[#allocation1 + $0x7] ss:$9 sm:$0xff] %v3722_v41 }
 0x6f5   : > { %v4478_v10 = vpop.permute.xlu2 %4477 }
 0x6f6   : > { %v4649_v3 = vperm.slane %v4478_v10, %v6671_v51 }
 0x6f9   : > { %v4301_v40 = vld [vmem:[#allocation1] sm:$0xff] }
 0x6fa   : > { %4516 = vperm.xlu1 %5097, %v4301_v40   ;;  %4302 = vst [vmem:[#allocation1] ss:$9 sm:$0xff] %v3723_v19 }
 0x6fb   : > { %4303 = vst [vmem:[#allocation1 + $0x1] ss:$9 sm:$0xff] %v3724_v8 }
 0x6fc   : > { %4304 = vst [vmem:[#allocation1 + $0x2] ss:$9 sm:$0xff] %v3725_v20 }
 0x6fd   : > { %4305 = vst [vmem:[#allocation1 + $0x3] ss:$9 sm:$0xff] %v3726_v0 }
 0x6fe   : > { %4306 = vst [vmem:[#allocation1 + $0x4] ss:$9 sm:$0xff] %v3727_v13  ;;  %v4472_v2 = vpop.permute.xlu1 %4471 }
 0x6ff   : > { %4307 = vst [vmem:[#allocation1 + $0x5] ss:$9 sm:$0xff] %v3728_v46  ;;  %v4645_v42 = vperm.slane %v4472_v2, %v6656_v15 }
 0x700   : > { %4308 = vst [vmem:[#allocation1 + $0x6] ss:$9 sm:$0xff] %v3729_v61  ;;  %v4484_v61 = vpop.permute.xlu0 %4483 }
 0x701   : > { %4309 = vst [vmem:[#allocation1 + $0x7] ss:$9 sm:$0xff] %v3730_v37  ;;  %v4646_v18 = vsel %vm4577_vm13, %v4645_v42, %v4644_v52 }
 0x702   : > { %v4648_v63 = vsel %vm4581_vm14, %v4647_v34, %v4646_v18 }
 0x703   : > { %v6977_v55 = vsel %vm4585_vm15, %v4649_v3, %v4648_v63 }
 0x708   : > { %v4310_v11 = vld [vmem:[#allocation1] sm:$0xff]  ;;  %v4493_v42 = vpop.permute.xlu0 %4492 }
 0x709   : > { %4519 = vperm.xlu0 %5096, %v4310_v11   ;;  %4311 = vst [vmem:[#allocation1] ss:$9 sm:$0xff] %v3731_v9 }
 0x70a   : > { %4312 = vst [vmem:[#allocation1 + $0x1] ss:$9 sm:$0xff] %v3732_v39  ;;  %v4653_v39 = vperm.slane %v4484_v61, %v5356_v58 }
 0x70b   : > { %4313 = vst [vmem:[#allocation1 + $0x2] ss:$9 sm:$0xff] %v3733_v57 }
 0x70c   : > { %4314 = vst [vmem:[#allocation1 + $0x3] ss:$9 sm:$0xff] %v3734_v21 }
 0x70d   : > { %4315 = vst [vmem:[#allocation1 + $0x4] ss:$9 sm:$0xff] %v3735_v14  ;;  %v4658_v14 = vperm.slane %v4493_v42, %v6518_v53 }
 0x70e   : > { %4316 = vst [vmem:[#allocation1 + $0x5] ss:$9 sm:$0xff] %v3736_v62 }
 0x70f   : > { %4317 = vst [vmem:[#allocation1 + $0x6] ss:$9 sm:$0xff] %v3737_v4 }
 0x710   : > { %4318 = vst [vmem:[#allocation1 + $0x7] ss:$9 sm:$0xff] %v3738_v26  ;;  %v4502_v11 = vpop.permute.xlu0 %4501 }
 0x717   : > { %v4319_v7 = vld [vmem:[#allocation1] sm:$0xff] }
 0x718   : > { %4522 = vperm.xlu2 %5098, %v4319_v7  }
 0x729   : > { %v3109_v24 = vpop.xlane.xlu1 %3108 }
 0x72a   : > { %v3177_v17 = vadd.f32 %v6233_v1, %v3109_v24  ;;  %v4664_v24 = vperm.slane %v4502_v11, %v6574_v49 }
 0x72c   : > { %v3739_v30 = vperm.slane %v3177_v17, 0  ;;  %v3740_v33 = vperm.slane %v3177_v17, 1  ;;  %v3741_v44 = vperm.slane %v3177_v17, 2  ;;  %v3742_v12 = vperm.slane %v3177_v17, 3 }
 0x72d   : > { %v3743_v43 = vperm.slane %v3177_v17, 4  ;;  %v3744_v25 = vperm.slane %v3177_v17, 5  ;;  %v3745_v56 = vperm.slane %v3177_v17, 6  ;;  %v3746_v5 = vperm.slane %v3177_v17, 7 }
 0x72e   : > { %4320 = vst [vmem:[#allocation1] ss:$9 sm:$0xff] %v3739_v30  ;;  %v3112_v22 = vpop.xlane.xlu2 %3111 }
 0x72f   : > { %4321 = vst [vmem:[#allocation1 + $0x1] ss:$9 sm:$0xff] %v3740_v33  ;;  %v3178_v41 = vadd.f32 %v6233_v1, %v3112_v22 }
 0x730   : > { %4322 = vst [vmem:[#allocation1 + $0x2] ss:$9 sm:$0xff] %v3741_v44 }
 0x731   : > { %4323 = vst [vmem:[#allocation1 + $0x3] ss:$9 sm:$0xff] %v3742_v12  ;;  %v3747_v52 = vperm.slane %v3178_v41, 0  ;;  %v3748_v36 = vperm.slane %v3178_v41, 1  ;;  %v3749_v19 = vperm.slane %v3178_v41, 2  ;;  %v3750_v8 = vperm.slane %v3178_v41, 3 }
 0x732   : > { %4324 = vst [vmem:[#allocation1 + $0x4] ss:$9 sm:$0xff] %v3743_v43  ;;  %v3751_v40 = vperm.slane %v3178_v41, 4  ;;  %v3752_v20 = vperm.slane %v3178_v41, 5  ;;  %v3753_v0 = vperm.slane %v3178_v41, 6  ;;  %v3754_v13 = vperm.slane %v3178_v41, 7 }
 0x733   : > { %4325 = vst [vmem:[#allocation1 + $0x5] ss:$9 sm:$0xff] %v3744_v25 }
 0x734   : > { %4326 = vst [vmem:[#allocation1 + $0x6] ss:$9 sm:$0xff] %v3745_v56 }
 0x735   : > { %4327 = vst [vmem:[#allocation1 + $0x7] ss:$9 sm:$0xff] %v3746_v5 }
 0x736   : > { %v4487_v2 = vpop.permute.xlu2 %4486 }
 0x737   : > { %v4654_v47 = vperm.slane %v4487_v2, %v6447_v48 }
 0x739   : > { %v4655_v57 = vsel %vm4533_vm0, %v4654_v47, %v4653_v39  ;;  %vm7065_vm0 = vmmov %vm7064_vm2 }
 0x73c   : > { %v4328_v31 = vld [vmem:[#allocation1] sm:$0xff] }
 0x73d   : > { %4525 = vperm.xlu1 %5097, %v4328_v31   ;;  %4329 = vst [vmem:[#allocation1] ss:$9 sm:$0xff] %v3747_v52 }
 0x73e   : > { %4330 = vst [vmem:[#allocation1 + $0x1] ss:$9 sm:$0xff] %v3748_v36  ;;  %v4496_v50 = vpop.permute.xlu2 %4495 }
 0x73f   : > { %4331 = vst [vmem:[#allocation1 + $0x2] ss:$9 sm:$0xff] %v3749_v19  ;;  %v4660_v32 = vperm.slane %v4496_v50, %v6512_v27 }
 0x740   : > { %4332 = vst [vmem:[#allocation1 + $0x3] ss:$9 sm:$0xff] %v3750_v8 }
 0x741   : > { %4333 = vst [vmem:[#allocation1 + $0x4] ss:$9 sm:$0xff] %v3751_v40  ;;  %v4481_v1 = vpop.permute.xlu1 %4480 }
 0x742   : > { %4334 = vst [vmem:[#allocation1 + $0x5] ss:$9 sm:$0xff] %v3752_v20  ;;  %v4651_v25 = vperm.slane %v4481_v1, %v6685_v38 }
 0x743   : > { %4335 = vst [vmem:[#allocation1 + $0x6] ss:$9 sm:$0xff] %v3753_v0 }
 0x744   : > { %4336 = vst [vmem:[#allocation1 + $0x7] ss:$9 sm:$0xff] %v3754_v13 }
 0x746   : > { %v4505_v62 = vpop.permute.xlu2 %4504 }
 0x747   : > { %v4666_v10 = vperm.slane %v4505_v62, %v6571_v35 }
 0x749   : > { %v4490_v37 = vpop.permute.xlu1 %4489 }
 0x74a   : > { %v4656_v9 = vperm.slane %v4490_v37, %v6462_v45  ;;  %v4511_v45 = vpop.permute.xlu0 %4510 }
 0x74b   : > { %v4337_v46 = vld [vmem:[#allocation1] sm:$0xff]  ;;  %v4670_v33 = vperm.slane %v4511_v45, %v6619_v60 }
 0x74c   : > { %4528 = vperm.xlu0 %5096, %v4337_v46   ;;  %v4657_v21 = vsel %vm4537_vm3, %v4656_v9, %v4655_v57  ;;  %vm4689_vm3 = vcmask 1042434  }
 0x74d   : > { %v4659_v4 = vsel %vm4541_vm4, %v4658_v14, %v4657_v21  ;;  %vm4691_vm4 = vcmask 1041408  }
 0x74e   : > { %v4661_v48 = vsel %vm4545_vm5, %v4660_v32, %v4659_v4  ;;  %vm4696_vm5 = vcmp.lt.s32.totalorder %v329_v54, 512 }
 0x751   : > { %v4499_v18 = vpop.permute.xlu1 %4498 }
 0x752   : > { %v4662_v26 = vperm.slane %v4499_v18, %v6529_v29  ;;  %v4514_v29 = vpop.permute.xlu2 %4513 }
 0x753   : > { %v4672_v12 = vperm.slane %v4514_v29, %v6634_v28 }
 0x754   : > { %v4663_v58 = vsel %vm4549_vm6, %v4662_v26, %v4661_v48 }
 0x755   : > { %v4665_v17 = vsel %vm4553_vm7, %v4664_v24, %v4663_v58 }
 0x756   : > { %v4667_v27 = vsel %vm4557_vm8, %v4666_v10, %v4665_v17 }
 0x759   : > { %v4508_v7 = vpop.permute.xlu1 %4507 }
 0x75a   : > { %v4668_v53 = vperm.slane %v4508_v7, %v6583_v6 }
 0x75c   : > { %v4669_v30 = vsel %vm4561_vm9, %v4668_v53, %v4667_v27 }
 0x75d   : > { %v4671_v63 = vsel %vm4565_vm10, %v4670_v33, %v4669_v30 }
 0x75e   : > { %v4673_v43 = vsel %vm4569_vm11, %v4672_v12, %v4671_v63 }
 0x76c   : > { %v4517_v34 = vpop.permute.xlu1 %4516 }
 0x76d   : > { %v4674_v49 = vperm.slane %v4517_v34, %v6641_v59 }
 0x76f   : > { %v4675_v56 = vsel %vm4573_vm12, %v4674_v49, %v4673_v43 }
 0x772   : > { %v4523_v3 = vpop.permute.xlu2 %4522 }
 0x773   : > { %v4678_v28 = vperm.slane %v4523_v3, %v6663_v23 }
 0x77b   : > { %v4520_v44 = vpop.permute.xlu0 %4519 }
 0x77c   : > { %v4676_v6 = vperm.slane %v4520_v44, %v6656_v15  ;;  %v4652_v15 = vsel %vm7064_vm2, %v4651_v25, %v6977_v55 }
 0x77d   : > { %v4685_v23 = vrot.slane %v4652_v15, 6 }
 0x77e   : > { %v4677_v60 = vsel %vm4577_vm13, %v4676_v6, %v4675_v56 }
 0x77f   : > { %v4679_v22 = vsel %vm4581_vm14, %v4678_v28, %v4677_v60 }
 0x7af   : > { %v4526_v35 = vpop.permute.xlu1 %4525 }
 0x7b0   : > { %v4680_v59 = vperm.slane %v4526_v35, %v6671_v51 }
 0x7b2   : > { %v4681_v52 = vsel %vm4585_vm15, %v4680_v59, %v4679_v22 }
 0x7be   : > { %v4529_v5 = vpop.permute.xlu0 %4528 }
 0x7bf   : > { %v4682_v41 = vperm.slane %v4529_v5, %v6685_v38 }
 0x7c1   : > { %v4683_v36 = vsel %vm7065_vm0, %v4682_v41, %v4681_v52 }
 0x7c2   : > { %v4686_v51 = vrot.slane %v4683_v36, 5 }
 0x7c4   : > { %v4690_v55 = vsel %vm4689_vm3, %v4685_v23, %v4686_v51 }
 0x7c5   : > { %v4692_v38 = vsel %vm4691_vm4, %v6876_v16, %v4690_v55 }
 0x7c6   : > { %4698 = vst.msk [vmem:[%s316_s7] sm:$0xf] %vm4696_vm5, %v4692_v38 }
 0x7c7   : > { %5134 = shalt.err (!%p5131_p3)
}
 0x7c8   : > { %5055 = dma.vmem_to_hbm [thread:$0]  (%p5259_p5), %s4713_s28, 64, %s4715_s11, %s4700_s13  }
 0x7c9 PF: > { %p5061_p4 = scmp.ge.s32.totalorder %s5169_s10, 2  ;;  %s4726_s21 = sand.u32 1, %s5157_s29  }
 0x7ca   : > { %s4727_s25 = scalar_lea.sflag [#allocation4], %s4726_s21 }
 0x7cb   : > { %p5058_p7 = pnand %p5061_p4, %p5263_p6 }
 0x7cd   : > { %p5059_p8 = pneg %p5058_p7 }
 0x7cf   : > { %5152 = dma.done.wait (%p5059_p8), %s4727_s25, 64  }
 0x7d0   : > { %5154 = vsyncadd (%p5059_p8), %s4727_s25, 4294967232  ;;  %p19_p9 = scmp.ge.s32.totalorder %s5246_s12, 4   ;;  %s7066_s29 = smov %s5161_s30 }
 0x7d1   : > { %s7067_s30 = smov %s5165_s9  ;;  %s7068_s9 = smov %s5257_s15 }
 0x7d2   : > { %s7069_s10 = smov %s5246_s12  ;;  %21 = sbr.rel (!%p19_p9) target bundleno = 5 (0x5), region = 97 }
 0x7d7   :  { %4733 = vsyncpa [#allocation4], 1 }
 0x7d8   :  { %4735 = vsyncpa [#allocation4 + $0x1], 1 }

</bundles_post_ra>
